<compile_context>
chip_gen: v7x
topology: tpu7x:2x2x1
jax: 0.10.0
libtpu: 0.0.40
codegen_flags: <defaults>
</compile_context>

<pallas_src>
import jax
import jax.numpy as jnp
from jax import lax
from jax.experimental import pallas as pl
from jax.experimental.pallas import tpu as pltpu


def _pick_tile(n, target):
    """Largest multiple of 8 that divides n and is <= target (else n itself)."""
    if n <= target:
        return n
    best = 0
    t = 8
    while t <= target:
        if n % t == 0:
            best = t
        t += 8
    return best if best else n


def self_attn_pallas(x_nchw, wq, bq, wk, bk, wv, bv, gamma, *,
                     q_tile=256, kv_tile=512):
    """x_nchw: (B, C, W, H) float32.  Weights in PyTorch Conv2d layout:
       wq/wk: (C//8, C, 1, 1), wv: (C, C, 1, 1), biases 1-D, gamma scalar."""
    B, C, W, H = x_nchw.shape
    N = W * H
    C8 = wq.shape[0]
    TQ = _pick_tile(N, q_tile)
    TKV = _pick_tile(N, kv_tile)

    # Flatten spatial and put channels last: (B, N, C)
    x_bnc = jnp.transpose(x_nchw.reshape(B, C, N), (0, 2, 1)).astype(jnp.float32)

    # Conv weights -> (Cin, Cout) matmul operands (bf16 for the MXU fast path).
    wq_t = jnp.transpose(wq.reshape(C8, C), (1, 0)).astype(jnp.bfloat16)       # (C, C8)
    # Fused [V | K] projection weight: both consume the same kv tile.
    wvk_t = jnp.concatenate(
        [jnp.transpose(wv.reshape(C, C), (1, 0)),
         jnp.transpose(wk.reshape(C8, C), (1, 0))], axis=1).astype(jnp.bfloat16)  # (C, C+C8)
    bq_r = bq.reshape(1, C8).astype(jnp.float32)
    bvk_r = jnp.concatenate([bv, bk]).reshape(1, C + C8).astype(jnp.float32)
    gamma_s = jnp.asarray(gamma, jnp.float32).reshape(1)

    def kernel(xq_ref, xkv_ref, wq_ref, bq_ref, wvk_ref, bvk_ref, gamma_ref,
               o_ref, q_scr, m_scr, l_scr, acc_scr):
        ki = pl.program_id(2)

        @pl.when(ki == 0)
        def _init():
            # Q projection for this q-tile (computed once, cached in VMEM).
            xq = xq_ref[0].astype(jnp.bfloat16)                       # (TQ, C)
            q = jnp.dot(xq, wq_ref[...],
                        preferred_element_type=jnp.float32) + bq_ref[...]
            q_scr[...] = q.astype(jnp.bfloat16)                       # (TQ, C8)
            m_scr[...] = jnp.full_like(m_scr, -jnp.inf)
            l_scr[...] = jnp.zeros_like(l_scr)
            acc_scr[...] = jnp.zeros_like(acc_scr)

        # Fused V/K projection on the current kv tile (one matmul instead of two).
        xkv = xkv_ref[0].astype(jnp.bfloat16)                         # (TKV, C)
        vk = jnp.dot(xkv, wvk_ref[...],
                     preferred_element_type=jnp.float32) + bvk_ref[...]
        v = vk[:, :C].astype(jnp.bfloat16)                            # (TKV, C)
        k = vk[:, C:].astype(jnp.bfloat16)                            # (TKV, C8)

        # energy[i, j] = <q_i, k_j>  (contraction over last dims, no explicit .T)
        s = lax.dot_general(q_scr[...], k, (((1,), (1,)), ((), ())),
                            preferred_element_type=jnp.float32)       # (TQ, TKV)

        # Online (flash-style) softmax update.
        m_prev = m_scr[...]
        m_new = jnp.maximum(m_prev, jnp.max(s, axis=-1, keepdims=True))
        alpha = jnp.exp(m_prev - m_new)
        p = jnp.exp(s - m_new)
        l_scr[...] = alpha * l_scr[...] + jnp.sum(p, axis=-1, keepdims=True)
        acc_scr[...] = alpha * acc_scr[...] + jnp.dot(
            p.astype(jnp.bfloat16), v, preferred_element_type=jnp.float32)
        m_scr[...] = m_new

        @pl.when(ki == pl.num_programs(2) - 1)
        def _finalize():
            inv_l = pl.reciprocal(l_scr[...], approx=True)
            gamma_v = gamma_ref[0]
            out = gamma_v * (acc_scr[...] * inv_l) + xq_ref[0]
            o_ref[0] = out.astype(o_ref.dtype)

    out_bnc = pl.pallas_call(
        kernel,
        out_shape=jax.ShapeDtypeStruct((B, N, C), jnp.float32),
        grid_spec=pltpu.PrefetchScalarGridSpec(
            num_scalar_prefetch=0,
            grid=(B, N // TQ, N // TKV),
            in_specs=[
                pl.BlockSpec((1, TQ, C), lambda b, qi, ki: (b, qi, 0)),    # x (query tile)
                pl.BlockSpec((1, TKV, C), lambda b, qi, ki: (b, ki, 0)),   # x (k/v tile)
                pl.BlockSpec((C, C8), lambda b, qi, ki: (0, 0)),           # Wq^T  (bf16)
                pl.BlockSpec((1, C8), lambda b, qi, ki: (0, 0)),           # bq
                pl.BlockSpec((C, C + C8), lambda b, qi, ki: (0, 0)),       # [Wv|Wk]^T (bf16)
                pl.BlockSpec((1, C + C8), lambda b, qi, ki: (0, 0)),       # [bv|bk]
                pl.BlockSpec(memory_space=pltpu.MemorySpace.SMEM),         # gamma scalar
            ],
            out_specs=pl.BlockSpec((1, TQ, C), lambda b, qi, ki: (b, qi, 0)),
            scratch_shapes=[
                pltpu.VMEM((TQ, C8), jnp.bfloat16),   # cached Q tile
                pltpu.VMEM((TQ, 1), jnp.float32),     # running max
                pltpu.VMEM((TQ, 1), jnp.float32),     # running denom
                pltpu.VMEM((TQ, C), jnp.float32),     # output accumulator
            ]),
        compiler_params=pltpu.CompilerParams(
            dimension_semantics=("parallel", "parallel", "arbitrary"),
            vmem_limit_bytes=48 * 1024 * 1024),
    )(x_bnc, x_bnc, wq_t, bq_r, wvk_t, bvk_r, gamma_s)

    # Back to NCHW.
    return jnp.transpose(out_bnc, (0, 2, 1)).reshape(B, C, W, H)


def self_attn_reference(x_nchw, wq, bq, wk, bk, wv, bv, gamma):
    """Pure-JAX reference mirroring the PyTorch forward exactly (f32)."""
    B, C, W, H = x_nchw.shape
    N = W * H
    C8 = wq.shape[0]
    xf = x_nchw.reshape(B, C, N)                                  # (B, C, N)
    q = jnp.einsum('oc,bcn->bon', wq.reshape(C8, C), xf) + bq[None, :, None]
    k = jnp.einsum('oc,bcn->bon', wk.reshape(C8, C), xf) + bk[None, :, None]
    v = jnp.einsum('oc,bcn->bon', wv.reshape(C, C), xf) + bv[None, :, None]
    energy = jnp.einsum('bci,bcj->bij', q, k)                     # (B, N, N)
    attn = jax.nn.softmax(energy, axis=-1)
    out = jnp.einsum('bcj,bij->bci', v, attn)                     # (B, C, N)
    out = out.reshape(B, C, W, H)
    return gamma * out + x_nchw


if __name__ == "__main__":
    key = jax.random.PRNGKey(0)
    B, C, W, H = 2, 32, 16, 16        # in_dim must be divisible by 8; N = 256
    C8 = C // 8

    ks = jax.random.split(key, 8)
    x = jax.random.normal(ks[0], (B, C, W, H), dtype=jnp.float32)

    # Deterministic parameter init (PyTorch Conv2d shapes).
    scale = 0.1
    wq = scale * jax.random.normal(ks[1], (C8, C, 1, 1), dtype=jnp.float32)
    bq = scale * jax.random.normal(ks[2], (C8,), dtype=jnp.float32)
    wk = scale * jax.random.normal(ks[3], (C8, C, 1, 1), dtype=jnp.float32)
    bk = scale * jax.random.normal(ks[4], (C8,), dtype=jnp.float32)
    wv = scale * jax.random.normal(ks[5], (C, C, 1, 1), dtype=jnp.float32)
    bv = scale * jax.random.normal(ks[6], (C,), dtype=jnp.float32)

    # gamma = 0 (as in the module's __init__): out must equal x.
    gamma0 = jnp.float32(0.0)
    out0 = jax.block_until_ready(self_attn_pallas(x, wq, bq, wk, bk, wv, bv, gamma0))
    ref0 = self_attn_reference(x, wq, bq, wk, bk, wv, bv, gamma0)
    assert jnp.allclose(out0, ref0, atol=3e-2, rtol=3e-2)

    # Nonzero gamma with small tiles to exercise the multi-step online softmax
    # (grid = (2, 2, 4): 2 q-tiles x 4 kv-tiles per image).
    gamma1 = jnp.float32(0.7)
    out1 = jax.block_until_ready(
        self_attn_pallas(x, wq, bq, wk, bk, wv, bv, gamma1, q_tile=128, kv_tile=64))
    ref1 = self_attn_reference(x, wq, bq, wk, bk, wv, bv, gamma1)
    assert jnp.allclose(out1, ref1, atol=3e-2, rtol=3e-2)

    print("KERNEL_OK")
</pallas_src>

<mosaic_0001>
module attributes {stable_mosaic.version = 11 : i64} {
  func.func @kernel(%arg0: i32, %arg1: i32, %arg2: i32, %arg3: memref<1x256x32xf32, #tpu.memory_space<vmem>>, %arg4: memref<1x256x32xf32, #tpu.memory_space<vmem>>, %arg5: memref<32x4xbf16, #tpu.memory_space<vmem>>, %arg6: memref<1x4xf32, #tpu.memory_space<vmem>>, %arg7: memref<32x36xbf16, #tpu.memory_space<vmem>>, %arg8: memref<1x36xf32, #tpu.memory_space<vmem>>, %arg9: memref<1xf32, #tpu.memory_space<smem>>, %arg10: memref<1x256x32xf32, #tpu.memory_space<vmem>>, %arg11: memref<256x4xbf16, #tpu.memory_space<vmem>>, %arg12: memref<256x1xf32, #tpu.memory_space<vmem>>, %arg13: memref<256x1xf32, #tpu.memory_space<vmem>>, %arg14: memref<256x32xf32, #tpu.memory_space<vmem>>) attributes {dimension_semantics = [#tpu.dimension_semantics<parallel>, #tpu.dimension_semantics<parallel>, #tpu.dimension_semantics<arbitrary>], iteration_bounds = array<i64: 2, 1, 1>, scalar_prefetch = 0 : i64, scratch_operands = 4 : i64, tpu.core_type = #tpu.core_type<tc>, window_params = [{transform_indices = @transform_0, window_bounds = array<i64: 1, 256, 32>}, {transform_indices = @transform_1, window_bounds = array<i64: 1, 256, 32>}, {pipeline_mode = #tpu.pipeline_mode<synchronous>, transform_indices = @transform_2, window_bounds = array<i64: 32, 4>}, {pipeline_mode = #tpu.pipeline_mode<synchronous>, transform_indices = @transform_3, window_bounds = array<i64: 1, 4>}, {pipeline_mode = #tpu.pipeline_mode<synchronous>, transform_indices = @transform_4, window_bounds = array<i64: 32, 36>}, {pipeline_mode = #tpu.pipeline_mode<synchronous>, transform_indices = @transform_5, window_bounds = array<i64: 1, 36>}, {transform_indices = @transform_6, window_bounds = array<i64: 1>}, {transform_indices = @transform_7, window_bounds = array<i64: 1, 256, 32>}]} {
    %c0_i32 = arith.constant 0 : i32
    %0 = arith.cmpi eq, %arg2, %c0_i32 : i32
    %1 = arith.extui %0 : i1 to i32
    %c0_i32_0 = arith.constant 0 : i32
    %2 = arith.cmpi ne, %1, %c0_i32_0 : i32
    scf.if %2 {
      %c0_27 = arith.constant 0 : index
      %c0_28 = arith.constant 0 : index
      %c0_29 = arith.constant 0 : index
      %43 = vector.load %arg3[%c0_27, %c0_28, %c0_29] : memref<1x256x32xf32, #tpu.memory_space<vmem>>, vector<1x256x32xf32>
      %44 = vector.shape_cast %43 : vector<1x256x32xf32> to vector<256x32xf32>
      %45 = arith.truncf %44 : vector<256x32xf32> to vector<256x32xbf16>
      %c0_30 = arith.constant 0 : index
      %c0_31 = arith.constant 0 : index
      %46 = vector.load %arg5[%c0_30, %c0_31] : memref<32x4xbf16, #tpu.memory_space<vmem>>, vector<32x4xbf16>
      %cst_32 = arith.constant dense<0.000000e+00> : vector<256x4xf32>
      %47 = tpu.matmul %45, %46, %cst_32 {dimension_numbers = #tpu.dot_dimension_numbers<[1], [0], [0], [1], [0, 0, 1, 1], [], []>} : vector<256x32xbf16>, vector<32x4xbf16>, vector<256x4xf32> -> vector<256x4xf32>
      %c0_33 = arith.constant 0 : index
      %c0_34 = arith.constant 0 : index
      %48 = vector.load %arg6[%c0_33, %c0_34] : memref<1x4xf32, #tpu.memory_space<vmem>>, vector<1x4xf32>
      %49 = vector.broadcast %48 : vector<1x4xf32> to vector<256x4xf32>
      %50 = arith.addf %47, %49 : vector<256x4xf32>
      %51 = arith.truncf %50 : vector<256x4xf32> to vector<256x4xbf16>
      %c0_35 = arith.constant 0 : index
      %c0_36 = arith.constant 0 : index
      %52 = vector.load %arg11[%c0_35, %c0_36] : memref<256x4xbf16, #tpu.memory_space<vmem>>, vector<256x4xbf16>
      tpu.vector_store %arg11[%c0_35, %c0_36], %51 {strides = array<i32>} : memref<256x4xbf16, #tpu.memory_space<vmem>>, vector<256x4xbf16>,
      %cst_37 = arith.constant 0xFF800000 : f32
      %53 = vector.broadcast %cst_37 : f32 to vector<256x1xf32>
      %c0_38 = arith.constant 0 : index
      %c0_39 = arith.constant 0 : index
      %54 = vector.load %arg12[%c0_38, %c0_39] : memref<256x1xf32, #tpu.memory_space<vmem>>, vector<256x1xf32>
      tpu.vector_store %arg12[%c0_38, %c0_39], %53 {strides = array<i32>} : memref<256x1xf32, #tpu.memory_space<vmem>>, vector<256x1xf32>,
      %cst_40 = arith.constant 0.000000e+00 : f32
      %55 = vector.broadcast %cst_40 : f32 to vector<256x1xf32>
      %c0_41 = arith.constant 0 : index
      %c0_42 = arith.constant 0 : index
      %56 = vector.load %arg13[%c0_41, %c0_42] : memref<256x1xf32, #tpu.memory_space<vmem>>, vector<256x1xf32>
      tpu.vector_store %arg13[%c0_41, %c0_42], %55 {strides = array<i32>} : memref<256x1xf32, #tpu.memory_space<vmem>>, vector<256x1xf32>,
      %cst_43 = arith.constant 0.000000e+00 : f32
      %57 = vector.broadcast %cst_43 : f32 to vector<256x32xf32>
      %c0_44 = arith.constant 0 : index
      %c0_45 = arith.constant 0 : index
      %58 = vector.load %arg14[%c0_44, %c0_45] : memref<256x32xf32, #tpu.memory_space<vmem>>, vector<256x32xf32>
      tpu.vector_store %arg14[%c0_44, %c0_45], %57 {strides = array<i32>} : memref<256x32xf32, #tpu.memory_space<vmem>>, vector<256x32xf32>,
    } else {
    }
    %c0 = arith.constant 0 : index
    %c0_1 = arith.constant 0 : index
    %c0_2 = arith.constant 0 : index
    %3 = vector.load %arg4[%c0, %c0_1, %c0_2] : memref<1x256x32xf32, #tpu.memory_space<vmem>>, vector<1x256x32xf32>
    %4 = vector.shape_cast %3 : vector<1x256x32xf32> to vector<256x32xf32>
    %5 = arith.truncf %4 : vector<256x32xf32> to vector<256x32xbf16>
    %c0_3 = arith.constant 0 : index
    %c0_4 = arith.constant 0 : index
    %6 = vector.load %arg7[%c0_3, %c0_4] : memref<32x36xbf16, #tpu.memory_space<vmem>>, vector<32x36xbf16>
    %cst = arith.constant dense<0.000000e+00> : vector<256x36xf32>
    %7 = tpu.matmul %5, %6, %cst {dimension_numbers = #tpu.dot_dimension_numbers<[1], [0], [0], [1], [0, 0, 1, 1], [], []>} : vector<256x32xbf16>, vector<32x36xbf16>, vector<256x36xf32> -> vector<256x36xf32>
    %c0_5 = arith.constant 0 : index
    %c0_6 = arith.constant 0 : index
    %8 = vector.load %arg8[%c0_5, %c0_6] : memref<1x36xf32, #tpu.memory_space<vmem>>, vector<1x36xf32>
    %9 = vector.broadcast %8 : vector<1x36xf32> to vector<256x36xf32>
    %10 = arith.addf %7, %9 : vector<256x36xf32>
    %11 = vector.extract_strided_slice %10 {offsets = [0, 0], sizes = [256, 32], strides = [1, 1]} : vector<256x36xf32> to vector<256x32xf32>
    %12 = arith.truncf %11 : vector<256x32xf32> to vector<256x32xbf16>
    %13 = vector.extract_strided_slice %10 {offsets = [0, 32], sizes = [256, 4], strides = [1, 1]} : vector<256x36xf32> to vector<256x4xf32>
    %14 = arith.truncf %13 : vector<256x4xf32> to vector<256x4xbf16>
    %c0_7 = arith.constant 0 : index
    %c0_8 = arith.constant 0 : index
    %15 = vector.load %arg11[%c0_7, %c0_8] : memref<256x4xbf16, #tpu.memory_space<vmem>>, vector<256x4xbf16>
    %cst_9 = arith.constant dense<0.000000e+00> : vector<256x256xf32>
    %16 = tpu.matmul %15, %14, %cst_9 {dimension_numbers = #tpu.dot_dimension_numbers<[1], [1], [0], [0], [0, 0, 1, 0], [], []>} : vector<256x4xbf16>, vector<256x4xbf16>, vector<256x256xf32> -> vector<256x256xf32>
    %c0_10 = arith.constant 0 : index
    %c0_11 = arith.constant 0 : index
    %17 = vector.load %arg12[%c0_10, %c0_11] : memref<256x1xf32, #tpu.memory_space<vmem>>, vector<256x1xf32>
    %cst_12 = arith.constant dense<0xFF800000> : vector<256xf32>
    %18 = vector.multi_reduction <maximumf>, %16, %cst_12 [1] : vector<256x256xf32> to vector<256xf32>
    %19 = vector.shape_cast %18 : vector<256xf32> to vector<256x1xf32>
    %20 = arith.maximumf %17, %19 : vector<256x1xf32>
    %21 = arith.subf %17, %20 : vector<256x1xf32>
    %22 = math.exp %21 : vector<256x1xf32>
    %23 = vector.broadcast %20 : vector<256x1xf32> to vector<256x256xf32>
    %24 = arith.subf %16, %23 : vector<256x256xf32>
    %25 = math.exp %24 : vector<256x256xf32>
    %c0_13 = arith.constant 0 : index
    %c0_14 = arith.constant 0 : index
    %26 = vector.load %arg13[%c0_13, %c0_14] : memref<256x1xf32, #tpu.memory_space<vmem>>, vector<256x1xf32>
    %27 = arith.mulf %22, %26 : vector<256x1xf32>
    %cst_15 = arith.constant dense<0.000000e+00> : vector<256xf32>
    %28 = vector.multi_reduction <add>, %25, %cst_15 [1] : vector<256x256xf32> to vector<256xf32>
    %29 = vector.shape_cast %28 : vector<256xf32> to vector<256x1xf32>
    %30 = arith.addf %27, %29 : vector<256x1xf32>
    %c0_16 = arith.constant 0 : index
    %c0_17 = arith.constant 0 : index
    %31 = vector.load %arg13[%c0_16, %c0_17] : memref<256x1xf32, #tpu.memory_space<vmem>>, vector<256x1xf32>
    tpu.vector_store %arg13[%c0_16, %c0_17], %30 {strides = array<i32>} : memref<256x1xf32, #tpu.memory_space<vmem>>, vector<256x1xf32>,
    %c0_18 = arith.constant 0 : index
    %c0_19 = arith.constant 0 : index
    %32 = vector.load %arg14[%c0_18, %c0_19] : memref<256x32xf32, #tpu.memory_space<vmem>>, vector<256x32xf32>
    %33 = vector.broadcast %22 : vector<256x1xf32> to vector<256x32xf32>
    %34 = arith.mulf %33, %32 : vector<256x32xf32>
    %35 = arith.truncf %25 : vector<256x256xf32> to vector<256x256xbf16>
    %cst_20 = arith.constant dense<0.000000e+00> : vector<256x32xf32>
    %36 = tpu.matmul %35, %12, %cst_20 {dimension_numbers = #tpu.dot_dimension_numbers<[1], [0], [0], [1], [0, 0, 1, 1], [], []>} : vector<256x256xbf16>, vector<256x32xbf16>, vector<256x32xf32> -> vector<256x32xf32>
    %37 = arith.addf %34, %36 : vector<256x32xf32>
    %c0_21 = arith.constant 0 : index
    %c0_22 = arith.constant 0 : index
    %38 = vector.load %arg14[%c0_21, %c0_22] : memref<256x32xf32, #tpu.memory_space<vmem>>, vector<256x32xf32>
    tpu.vector_store %arg14[%c0_21, %c0_22], %37 {strides = array<i32>} : memref<256x32xf32, #tpu.memory_space<vmem>>, vector<256x32xf32>,
    %c0_23 = arith.constant 0 : index
    %c0_24 = arith.constant 0 : index
    %39 = vector.load %arg12[%c0_23, %c0_24] : memref<256x1xf32, #tpu.memory_space<vmem>>, vector<256x1xf32>
    tpu.vector_store %arg12[%c0_23, %c0_24], %20 {strides = array<i32>} : memref<256x1xf32, #tpu.memory_space<vmem>>, vector<256x1xf32>,
    %c0_i32_25 = arith.constant 0 : i32
    %40 = arith.cmpi eq, %arg2, %c0_i32_25 : i32
    %41 = arith.extui %40 : i1 to i32
    %c0_i32_26 = arith.constant 0 : i32
    %42 = arith.cmpi ne, %41, %c0_i32_26 : i32
    scf.if %42 {
      %c0_27 = arith.constant 0 : index
      %c0_28 = arith.constant 0 : index
      %43 = vector.load %arg13[%c0_27, %c0_28] : memref<256x1xf32, #tpu.memory_space<vmem>>, vector<256x1xf32>
      %44 = tpu.reciprocal %43 {approx = true} : vector<256x1xf32> -> vector<256x1xf32>
      %c0_29 = arith.constant 0 : index
      %45 = memref.load %arg9[%c0_29] : memref<1xf32, #tpu.memory_space<smem>>
      %c0_30 = arith.constant 0 : index
      %c0_31 = arith.constant 0 : index
      %46 = vector.load %arg14[%c0_30, %c0_31] : memref<256x32xf32, #tpu.memory_space<vmem>>, vector<256x32xf32>
      %47 = vector.broadcast %44 : vector<256x1xf32> to vector<256x32xf32>
      %48 = arith.mulf %46, %47 : vector<256x32xf32>
      %49 = vector.broadcast %45 : f32 to vector<256x32xf32>
      %50 = arith.mulf %49, %48 : vector<256x32xf32>
      %c0_32 = arith.constant 0 : index
      %c0_33 = arith.constant 0 : index
      %c0_34 = arith.constant 0 : index
      %51 = vector.load %arg3[%c0_32, %c0_33, %c0_34] : memref<1x256x32xf32, #tpu.memory_space<vmem>>, vector<1x256x32xf32>
      %52 = vector.shape_cast %51 : vector<1x256x32xf32> to vector<256x32xf32>
      %53 = arith.addf %50, %52 : vector<256x32xf32>
      %c0_35 = arith.constant 0 : index
      %c0_36 = arith.constant 0 : index
      %c0_37 = arith.constant 0 : index
      %54 = vector.load %arg10[%c0_35, %c0_36, %c0_37] : memref<1x256x32xf32, #tpu.memory_space<vmem>>, vector<1x256x32xf32>
      %55 = vector.shape_cast %54 : vector<1x256x32xf32> to vector<256x32xf32>
      %56 = vector.shape_cast %53 : vector<256x32xf32> to vector<1x256x32xf32>
      tpu.vector_store %arg10[%c0_35, %c0_36, %c0_37], %56 {strides = array<i32>} : memref<1x256x32xf32, #tpu.memory_space<vmem>>, vector<1x256x32xf32>,
    } else {
    }
    return
  }
  func.func @transform_0(%arg0: i32, %arg1: i32, %arg2: i32) -> (i32, i32, i32) {
    %c0_i32 = arith.constant 0 : i32
    %c0_i32_0 = arith.constant 0 : i32
    return %arg0, %arg1, %c0_i32 : i32, i32, i32
  }
  func.func @transform_1(%arg0: i32, %arg1: i32, %arg2: i32) -> (i32, i32, i32) {
    %c0_i32 = arith.constant 0 : i32
    %c0_i32_0 = arith.constant 0 : i32
    return %arg0, %arg2, %c0_i32 : i32, i32, i32
  }
  func.func @transform_2(%arg0: i32, %arg1: i32, %arg2: i32) -> (i32, i32) {
    %c0_i32 = arith.constant 0 : i32
    %c0_i32_0 = arith.constant 0 : i32
    %c0_i32_1 = arith.constant 0 : i32
    return %c0_i32, %c0_i32_0 : i32, i32
  }
  func.func @transform_3(%arg0: i32, %arg1: i32, %arg2: i32) -> (i32, i32) {
    %c0_i32 = arith.constant 0 : i32
    %c0_i32_0 = arith.constant 0 : i32
    %c0_i32_1 = arith.constant 0 : i32
    return %c0_i32, %c0_i32_0 : i32, i32
  }
  func.func @transform_4(%arg0: i32, %arg1: i32, %arg2: i32) -> (i32, i32) {
    %c0_i32 = arith.constant 0 : i32
    %c0_i32_0 = arith.constant 0 : i32
    %c0_i32_1 = arith.constant 0 : i32
    return %c0_i32, %c0_i32_0 : i32, i32
  }
  func.func @transform_5(%arg0: i32, %arg1: i32, %arg2: i32) -> (i32, i32) {
    %c0_i32 = arith.constant 0 : i32
    %c0_i32_0 = arith.constant 0 : i32
    %c0_i32_1 = arith.constant 0 : i32
    return %c0_i32, %c0_i32_0 : i32, i32
  }
  func.func @transform_6(%arg0: i32, %arg1: i32, %arg2: i32) -> i32 {
    %c0_i32 = arith.constant 0 : i32
    %c0_i32_0 = arith.constant 0 : i32
    return %c0_i32 : i32
  }
  func.func @transform_7(%arg0: i32, %arg1: i32, %arg2: i32) -> (i32, i32, i32) {
    %c0_i32 = arith.constant 0 : i32
    %c0_i32_0 = arith.constant 0 : i32
    return %arg0, %arg1, %c0_i32 : i32, i32, i32
  }
}

</mosaic_0001>

<bundles_post_ra>
// kernel: tpu_custom_call.1
= control target key start
LH: loop header
LB: loop body
LE: loop exit
PB: predicated region body
PF: predicated region fallthrough
CT: control target
= control target key end

     0   :  { %s4011_s26 = smov 0   ;;  %s4013_s27 = smov 0   ;;  %s5644_s0 = inlined_call_operand.vmem [shape: f32[2,256,32], index: 0, kind: input, shape index: {}]   ;;  %s5645_s1 = inlined_call_operand.vmem [shape: f32[2,256,32], index: 1, kind: input, shape index: {}]   ;;  %s5646_s2 = inlined_call_operand.vmem [shape: bf16[32,4], index: 2, kind: input, shape index: {}]   ;;  %s5647_s3 = inlined_call_operand.vmem [shape: f32[1,4], index: 3, kind: input, shape index: {}]   ;;  %s5648_s4 = inlined_call_operand.vmem [shape: bf16[32,36], index: 4, kind: input, shape index: {}]   ;;  %s5649_s5 = inlined_call_operand.vmem [shape: f32[1,36], index: 5, kind: input, shape index: {}]   ;;  %s5650_s6 = inlined_call_operand.<no memory space> [shape: f32[1], index: 6, kind: input, shape index: {}]   ;;  %s5651_s7 = inlined_call_operand.vmem [shape: f32[2,256,32], index: 7, kind: output, shape index: {}]  }
   0x1   :  { %12 = sst [smem:[#allocation6]] %s5650_s6  ;;  %s4015_s28 = smov 0  }
   0x2 LB: > { %s37_s6 = sadd.s32 1, %s3958_s27  ;;  %p3308_p0 = scmp.ge.s32.totalorder %s3962_s28, 1  ;;  %s3962_s28 = sphi %s4015_s28, %s18_s28   ;;  %s3958_s27 = sphi %s4013_s27, %s5913_s27   ;;  %s3954_s26 = sphi %s4011_s26, %s5912_s26  }
   0x3   : > { %p39_p1 = scmp.ge.s32.totalorder %s37_s6, 2  ;;  %p283_p2 = scmp.lt.s32.totalorder %s3962_s28, 3 }
   0x5   : > { %s5915_s6 = smov (%p39_p1, %s37_s6), 0  ;;  %p284_p3 = pnand %p3308_p0, %p283_p2 }
   0x7   : > { %287 = sbr.rel (%p284_p3) target bundleno = 1393 (0x571), region = 48 }
   0xe   : > { %v3680_v0 = vld [vmem:[%s5648_s4] sm:$0xff]   ;;  %p333_p4 = scmp.lt.s32.totalorder %s3954_s26, 1  ;;  %v3681_v1 = vld [vmem:[%s5648_s4 + $0x8] sm:$0xff]   ;;  %vm438_vm0 = vcmask 261120   ;;  %s3964_s23 = smov 96   ;;  %vm664_vm1 = vcmask 31744  }
   0xf   : > { %3606 = vmatprep.subr.bf16.mxu1 %v3680_v0  ;;  %v3682_v2 = vld [vmem:[%s5646_s2] sm:$0xff]   ;;  %v3683_v3 = vld [vmem:[%s5646_s2 + $0x8] sm:$0xff]   ;;  %vm681_vm2 = vcmask 7168  }
  0x10   : > { %s5917_s26 = smov (!%p333_p4, %s3954_s26), 1  ;;  %3607 = vmatpush3.bf16.msra.mxu1 %v3680_v0  ;;  %3570 = vmatprep.subr.bf16.mxu0 %v3682_v2 }
  0x11   : > { %3608 = vmatprep.subr.bf16.mxu1 %v3681_v1  ;;  %s4041_s14 = sshll.u32 %s5917_s26, 8  ;;  %3571 = vmatpush3.bf16.msra.mxu0 %v3682_v2  ;;  %s2842_s26 = sld [smem:[#allocation6]] }
  0x12   : > { %s4047_s17 = scalar_lea.vmem %s5645_s1, %s4041_s14  ;;  %3572 = vmatprep.subr.bf16.mxu0 %v3683_v3  ;;  %s4066_s20 = scalar_lea.vmem %s5644_s0, %s4041_s14 }
  0x13   : > { %v778_v4 = vld [vmem:[%s4047_s17] sm:$0xff]  ;;  %v779_v5 = vld [vmem:[%s4047_s17 + $0x8] sm:$0xff]  ;;  %v780_v6 = vld [vmem:[%s4047_s17 + $0x10] sm:$0xff]  ;;  %s5507_s8 = scalar_lea.vmem %s5651_s7, %s4041_s14 }
  0x14   : > { %3609 = vmatpush3.bf16.msra.mxu1 %v3681_v1  ;;  %v810_v7 = vpack.c.bf16 %v779_v5, %v778_v4  ;;  %v781_v8 = vld [vmem:[%s4047_s17 + $0x18] sm:$0xff]  ;;  %v782_v9 = vld [vmem:[%s4047_s17 + $0x20] sm:$0xff]  ;;  %v783_v10 = vld [vmem:[%s4047_s17 + $0x28] sm:$0xff] }
  0x15   : > { %v811_v11 = vpack.c.bf16 %v781_v8, %v780_v6  ;;  %v812_v12 = vpack.c.bf16 %v783_v10, %v782_v9  ;;  %3573 = vmatpush3.bf16.msra.mxu0 %v3683_v3  ;;  %v784_v13 = vld [vmem:[%s4047_s17 + $0x30] sm:$0xff]  ;;  %v785_v14 = vld [vmem:[%s4047_s17 + $0x38] sm:$0xff]  ;;  %v786_v15 = vld [vmem:[%s4047_s17 + $0x40] sm:$0xff] }
  0x16   : > { %3610 = vmatprep.mubr.msk.bf16.mxu1 %vm438_vm0, %v810_v7  ;;  %v787_v16 = vld [vmem:[%s4047_s17 + $0x48] sm:$0xff]  ;;  %v813_v17 = vpack.c.bf16 %v785_v14, %v784_v13  ;;  %v367_v19 = vld [vmem:[%s4066_s20] sm:$0xff]  ;;  %v369_v21 = vld [vmem:[%s4066_s20 + $0x10] sm:$0xff] }
  0x17   : > { %3611 = vmatmul.mubr.msk.bf16.vlgmr.msra.gmra.mrb[0].mxu1 %vm438_vm0, %v811_v11  ;;  %v814_v18 = vpack.c.bf16 %v787_v16, %v786_v15  ;;  %v368_v20 = vld [vmem:[%s4066_s20 + $0x8] sm:$0xff]  ;;  %v370_v22 = vld [vmem:[%s4066_s20 + $0x18] sm:$0xff]  ;;  %v788_v25 = vld [vmem:[%s4047_s17 + $0x50] sm:$0xff] }
  0x18   : > { %3614 = vmatprep.mubr.msk.bf16.mxu1 %vm438_vm0, %v812_v12  ;;  %v399_v23 = vpack.c.bf16 %v368_v20, %v367_v19  ;;  %v400_v24 = vpack.c.bf16 %v370_v22, %v369_v21  ;;  %v789_v26 = vld [vmem:[%s4047_s17 + $0x58] sm:$0xff]  ;;  %v790_v27 = vld [vmem:[%s4047_s17 + $0x60] sm:$0xff]  ;;  %v791_v28 = vld [vmem:[%s4047_s17 + $0x68] sm:$0xff] }
  0x19   : > { %v815_v29 = vpack.c.bf16 %v789_v26, %v788_v25  ;;  %v816_v30 = vpack.c.bf16 %v791_v28, %v790_v27  ;;  %v792_v31 = vld [vmem:[%s4047_s17 + $0x70] sm:$0xff]  ;;  %v793_v32 = vld [vmem:[%s4047_s17 + $0x78] sm:$0xff]  ;;  %v794_v33 = vld [vmem:[%s4047_s17 + $0x80] sm:$0xff] }
  0x1a   : > { %3574 = vmatprep.mubr.msk.bf16.mxu0 %vm438_vm0, %v399_v23  ;;  %v795_v34 = vld [vmem:[%s4047_s17 + $0x88] sm:$0xff]  ;;  %v817_v35 = vpack.c.bf16 %v793_v32, %v792_v31  ;;  %v796_v37 = vld [vmem:[%s4047_s17 + $0x90] sm:$0xff]  ;;  %v797_v38 = vld [vmem:[%s4047_s17 + $0x98] sm:$0xff] }
  0x1b   : > { %3575 = vmatmul.mubr.msk.bf16.vlgmr.msra.gmra.mrb[0].mxu0 %vm438_vm0, %v400_v24  ;;  %v818_v36 = vpack.c.bf16 %v795_v34, %v794_v33  ;;  %v798_v39 = vld [vmem:[%s4047_s17 + $0xa0] sm:$0xff]  ;;  %v799_v40 = vld [vmem:[%s4047_s17 + $0xa8] sm:$0xff]  ;;  %v819_v41 = vpack.c.bf16 %v797_v38, %v796_v37  ;;  %v800_v43 = vld [vmem:[%s4047_s17 + $0xb0] sm:$0xff] }
  0x1c   : > { %v820_v42 = vpack.c.bf16 %v799_v40, %v798_v39  ;;  %v801_v44 = vld [vmem:[%s4047_s17 + $0xb8] sm:$0xff]  ;;  %v802_v45 = vld [vmem:[%s4047_s17 + $0xc0] sm:$0xff]  ;;  %v803_v46 = vld [vmem:[%s4047_s17 + $0xc8] sm:$0xff] }
  0x1d   : > { %v821_v47 = vpack.c.bf16 %v801_v44, %v800_v43  ;;  %v822_v48 = vpack.c.bf16 %v803_v46, %v802_v45  ;;  %v804_v49 = vld [vmem:[%s4047_s17 + $0xd0] sm:$0xff]  ;;  %v805_v50 = vld [vmem:[%s4047_s17 + $0xd8] sm:$0xff]  ;;  %v806_v51 = vld [vmem:[%s4047_s17 + $0xe0] sm:$0xff] }
  0x1e   : > { %v807_v52 = vld [vmem:[%s4047_s17 + $0xe8] sm:$0xff]  ;;  %v823_v53 = vpack.c.bf16 %v805_v50, %v804_v49  ;;  %v808_v55 = vld [vmem:[%s4047_s17 + $0xf0] sm:$0xff]  ;;  %v809_v56 = vld [vmem:[%s4047_s17 + $0xf8] sm:$0xff] }
  0x1f   : > { %3615 = vmatmul.mubr.msk.bf16.gmra.mrb[4].mxu1 %vm438_vm0, %v813_v17  ;;  %v824_v54 = vpack.c.bf16 %v807_v52, %v806_v51  ;;  %v825_v57 = vpack.c.bf16 %v809_v56, %v808_v55  ;;  %v371_v58 = vld [vmem:[%s4066_s20 + $0x20] sm:$0xff]  ;;  %v372_v59 = vld [vmem:[%s4066_s20 + $0x28] sm:$0xff]  ;;  %v373_v61 = vld [vmem:[%s4066_s20 + $0x30] sm:$0xff] }
  0x20   : > { %3618 = vmatprep.mubr.msk.bf16.mxu1 %vm438_vm0, %v814_v18  ;;  %v401_v60 = vpack.c.bf16 %v372_v59, %v371_v58  ;;  %v374_v62 = vld [vmem:[%s4066_s20 + $0x38] sm:$0xff]  ;;  %v375_v0 = vld [vmem:[%s4066_s20 + $0x40] sm:$0xff]  ;;  %v376_v1 = vld [vmem:[%s4066_s20 + $0x48] sm:$0xff] }
  0x21   : > { %v402_v63 = vpack.c.bf16 %v374_v62, %v373_v61  ;;  %v403_v2 = vpack.c.bf16 %v376_v1, %v375_v0  ;;  %v377_v3 = vld [vmem:[%s4066_s20 + $0x50] sm:$0xff]  ;;  %v378_v4 = vld [vmem:[%s4066_s20 + $0x58] sm:$0xff]  ;;  %v379_v6 = vld [vmem:[%s4066_s20 + $0x60] sm:$0xff] }
  0x22   : > { %3578 = vmatprep.mubr.msk.bf16.mxu0 %vm438_vm0, %v401_v60  ;;  %v404_v5 = vpack.c.bf16 %v378_v4, %v377_v3  ;;  %v380_v7 = vld [vmem:[%s4066_s20 + $0x68] sm:$0xff]  ;;  %v381_v9 = vld [vmem:[%s4066_s20 + $0x70] sm:$0xff]  ;;  %v382_v10 = vld [vmem:[%s4066_s20 + $0x78] sm:$0xff] }
  0x23   : > { %3579 = vmatmul.mubr.msk.bf16.gmra.mrb[4].mxu0 %vm438_vm0, %v402_v63  ;;  %v405_v8 = vpack.c.bf16 %v380_v7, %v379_v6  ;;  %v406_v11 = vpack.c.bf16 %v382_v10, %v381_v9  ;;  %v383_v12 = vld [vmem:[%s4066_s20 + $0x80] sm:$0xff]  ;;  %v384_v13 = vld [vmem:[%s4066_s20 + $0x88] sm:$0xff]  ;;  %v385_v15 = vld [vmem:[%s4066_s20 + $0x90] sm:$0xff] }
  0x24   : > { %3582 = vmatprep.mubr.msk.bf16.mxu0 %vm438_vm0, %v403_v2  ;;  %v407_v14 = vpack.c.bf16 %v384_v13, %v383_v12  ;;  %v386_v16 = vld [vmem:[%s4066_s20 + $0x98] sm:$0xff]  ;;  %v387_v18 = vld [vmem:[%s4066_s20 + $0xa0] sm:$0xff]  ;;  %v388_v19 = vld [vmem:[%s4066_s20 + $0xa8] sm:$0xff] }
  0x25   : > { %v408_v17 = vpack.c.bf16 %v386_v16, %v385_v15  ;;  %v409_v20 = vpack.c.bf16 %v388_v19, %v387_v18  ;;  %v389_v21 = vld [vmem:[%s4066_s20 + $0xb0] sm:$0xff]  ;;  %v390_v22 = vld [vmem:[%s4066_s20 + $0xb8] sm:$0xff]  ;;  %v391_v24 = vld [vmem:[%s4066_s20 + $0xc0] sm:$0xff] }
  0x26   : > { %v410_v23 = vpack.c.bf16 %v390_v22, %v389_v21  ;;  %v392_v25 = vld [vmem:[%s4066_s20 + $0xc8] sm:$0xff]  ;;  %v393_v26 = vld [vmem:[%s4066_s20 + $0xd0] sm:$0xff]  ;;  %v394_v28 = vld [vmem:[%s4066_s20 + $0xd8] sm:$0xff] }
  0x27   : > { %3619 = vmatmul.mubr.msk.bf16.gmra.mrb[8].mxu1 %vm438_vm0, %v815_v29  ;;  %v411_v27 = vpack.c.bf16 %v392_v25, %v391_v24  ;;  %v395_v29 = vld [vmem:[%s4066_s20 + $0xe0] sm:$0xff]  ;;  %v412_v31 = vpack.c.bf16 %v394_v28, %v393_v26  ;;  %v397_v33 = vld [vmem:[%s4066_s20 + $0xf0] sm:$0xff]  ;;  %v398_v34 = vld [vmem:[%s4066_s20 + $0xf8] sm:$0xff] }
  0x28   : > { %3622 = vmatprep.mubr.msk.bf16.mxu1 %vm438_vm0, %v816_v30  ;;  %v396_v30 = vld [vmem:[%s4066_s20 + $0xe8] sm:$0xff]  ;;  %v4154_v37 = vld [vmem:[%s5649_s5] ss:$0 sm:$0xff] }
  0x29   : > { %v413_v32 = vpack.c.bf16 %v396_v30, %v395_v29 }
  0x2b   : > { %3583 = vmatmul.mubr.msk.bf16.gmra.mrb[8].mxu0 %vm438_vm0, %v404_v5 }
  0x2c   : > { %3586 = vmatprep.mubr.msk.bf16.mxu0 %vm438_vm0, %v405_v8 }
  0x2f   : > { %3623 = vmatmul.mubr.msk.bf16.gmra.mrb[12].mxu1 %vm438_vm0, %v817_v35  ;;  %v414_v35 = vpack.c.bf16 %v398_v34, %v397_v33 }
  0x30   : > { %3626 = vmatprep.mubr.msk.bf16.mxu1 %vm438_vm0, %v818_v36 }
  0x33   : > { %3587 = vmatmul.mubr.msk.bf16.gmra.mrb[12].mxu0 %vm438_vm0, %v406_v11 }
  0x34   : > { %3590 = vmatprep.mubr.msk.bf16.mxu0 %vm438_vm0, %v407_v14 }
  0x37   : > { %3627 = vmatmul.mubr.msk.bf16.gmra.mrb[16].mxu1 %vm438_vm0, %v819_v41 }
  0x38   : > { %3630 = vmatprep.mubr.msk.bf16.mxu1 %vm438_vm0, %v820_v42 }
  0x3b   : > { %3591 = vmatmul.mubr.msk.bf16.gmra.mrb[16].mxu0 %vm438_vm0, %v408_v17 }
  0x3c   : > { %3594 = vmatprep.mubr.msk.bf16.mxu0 %vm438_vm0, %v409_v20 }
  0x3f   : > { %3631 = vmatmul.mubr.msk.bf16.gmra.mrb[20].mxu1 %vm438_vm0, %v821_v47 }
  0x40   : > { %3634 = vmatprep.mubr.msk.bf16.mxu1 %vm438_vm0, %v822_v48 }
  0x43   : > { %3595 = vmatmul.mubr.msk.bf16.gmra.mrb[20].mxu0 %vm438_vm0, %v410_v23 }
  0x44   : > { %3598 = vmatprep.mubr.msk.bf16.mxu0 %vm438_vm0, %v411_v27 }
  0x47   : > { %3635 = vmatmul.mubr.msk.bf16.gmra.mrb[24].mxu1 %vm438_vm0, %v823_v53 }
  0x48   : > { %3638 = vmatprep.mubr.msk.bf16.mxu1 %vm438_vm0, %v824_v54 }
  0x4b   : > { %3599 = vmatmul.mubr.msk.bf16.gmra.mrb[24].mxu0 %vm438_vm0, %v412_v31 }
  0x4c   : > { %3602 = vmatprep.mubr.msk.bf16.mxu0 %vm438_vm0, %v413_v32 }
  0x4f   : > { %3639 = vmatmul.mubr.msk.bf16.gmra.mrb[28].mxu1 %vm438_vm0, %v825_v57 }
  0x53   : > { %3603 = vmatmul.mubr.msk.bf16.gmra.mrb[28].mxu0 %vm438_vm0, %v414_v35 }
  0xea   : > { %v3612_v36 = vpop.f32.mrb[0].mxu1 }
  0xeb   : > { %v932_v38 = vpop.f32.mrb[1].mxu1  ;;  %v941_v40 = vadd.f32 %v3612_v36, %v4154_v37 }
  0xec   : > { %v3613_v39 = vpop.f32.mrb[2].mxu1  ;;  %v933_v43 = vadd.f32 %v4154_v37, %v932_v38 }
  0xed   : > { %v944_v41 = vadd.f32 %v3613_v39, %v4154_v37  ;;  %v935_v42 = vpop.f32.mrb[3].mxu1 }
  0xee   : > { %v936_v44 = vadd.f32 %v4154_v37, %v935_v42 }
  0xef   : > { %v1060_v45 = vpack.c.bf16 %v944_v41, %v941_v40 }
  0xf0   : > { %v1059_v46 = vpack.c.bf16 %v936_v44, %v933_v43 }
  0xf1   : > { %1109 = vrot.lane.b32.xlu1 %v1060_v45, %s3964_s23 }
  0xf2   : > { %v3616_v47 = vpop.f32.mrb[4].mxu1  ;;  %1107 = vrot.lane.b32.xlu0 %v1059_v46, %s3964_s23 }
  0xf3   : > { %v948_v48 = vpop.f32.mrb[5].mxu1  ;;  %v957_v50 = vadd.f32 %v3616_v47, %v4154_v37 }
  0xf4   : > { %v3617_v49 = vpop.f32.mrb[6].mxu1  ;;  %v949_v53 = vadd.f32 %v4154_v37, %v948_v48 }
  0xf5   : > { %v960_v51 = vadd.f32 %v3617_v49, %v4154_v37  ;;  %v951_v52 = vpop.f32.mrb[7].mxu1 }
  0xf6   : > { %v952_v54 = vadd.f32 %v4154_v37, %v951_v52 }
  0xf7   : > { %v4166_v55 = vpack.c.bf16 %v960_v51, %v957_v50 }
  0xf8   : > { %v1061_v56 = vpack.c.bf16 %v952_v54, %v949_v53  ;;  %v3576_v54 = vpop.f32.mrb[0].mxu0 }
  0xfa   : > { %v3620_v57 = vpop.f32.mrb[8].mxu1 }
  0xfb   : > { %v964_v58 = vpop.f32.mrb[9].mxu1  ;;  %v973_v60 = vadd.f32 %v3620_v57, %v4154_v37 }
  0xfc   : > { %v3621_v59 = vpop.f32.mrb[10].mxu1  ;;  %v965_v63 = vadd.f32 %v4154_v37, %v964_v58 }
  0xfd   : > { %v976_v61 = vadd.f32 %v3621_v59, %v4154_v37  ;;  %v967_v62 = vpop.f32.mrb[11].mxu1 }
  0xfe   : > { %v968_v0 = vadd.f32 %v4154_v37, %v967_v62 }
  0xff   : > { %v4172_v1 = vpack.c.bf16 %v976_v61, %v973_v60 }
 0x100   : > { %v1063_v2 = vpack.c.bf16 %v968_v0, %v965_v63 }
 0x102   : > { %v3624_v3 = vpop.f32.mrb[12].mxu1 }
 0x103   : > { %v980_v4 = vpop.f32.mrb[13].mxu1  ;;  %v989_v6 = vadd.f32 %v3624_v3, %v4154_v37 }
 0x104   : > { %v3625_v5 = vpop.f32.mrb[14].mxu1  ;;  %v981_v9 = vadd.f32 %v4154_v37, %v980_v4 }
 0x105   : > { %v992_v7 = vadd.f32 %v3625_v5, %v4154_v37  ;;  %v983_v8 = vpop.f32.mrb[15].mxu1 }
 0x106   : > { %v984_v10 = vadd.f32 %v4154_v37, %v983_v8 }
 0x107   : > { %v4178_v11 = vpack.c.bf16 %v992_v7, %v989_v6 }
 0x108   : > { %v4180_v12 = vpack.c.bf16 %v984_v10, %v981_v9 }
 0x10a   : > { %v3628_v13 = vpop.f32.mrb[16].mxu1 }
 0x10b   : > { %v996_v14 = vpop.f32.mrb[17].mxu1  ;;  %v1005_v16 = vadd.f32 %v3628_v13, %v4154_v37 }
 0x10c   : > { %v3629_v15 = vpop.f32.mrb[18].mxu1  ;;  %v997_v19 = vadd.f32 %v4154_v37, %v996_v14 }
 0x10d   : > { %v1008_v17 = vadd.f32 %v3629_v15, %v4154_v37  ;;  %v999_v18 = vpop.f32.mrb[19].mxu1 }
 0x10e   : > { %v1000_v20 = vadd.f32 %v4154_v37, %v999_v18 }
 0x10f   : > { %v1068_v21 = vpack.c.bf16 %v1008_v17, %v1005_v16 }
 0x110   : > { %v1067_v22 = vpack.c.bf16 %v1000_v20, %v997_v19 }
 0x111   : > { %1125 = vrot.lane.b32.xlu1 %v1068_v21, %s3964_s23 }
 0x112   : > { %v3632_v23 = vpop.f32.mrb[20].mxu1  ;;  %3458 = vmatprep.subr.bf16.mxu1 %v1067_v22  ;;  %1123 = vrot.lane.b32.xlu0 %v1067_v22, %s3964_s23 }
 0x113   : > { %v1021_v24 = vadd.f32 %v3632_v23, %v4154_v37  ;;  %v1012_v25 = vpop.f32.mrb[21].mxu1  ;;  %3459 = vmatpush3.bf16.msra.mxu1 %v1059_v46 }
 0x114   : > { %v1013_v26 = vadd.f32 %v4154_v37, %v1012_v25  ;;  %v3633_v27 = vpop.f32.mrb[22].mxu1  ;;  %3460 = vmatprep.subr.bf16.mxu1 %v1068_v21 }
 0x115   : > { %v1024_v28 = vadd.f32 %v3633_v27, %v4154_v37  ;;  %v1015_v29 = vpop.f32.mrb[23].mxu1 }
 0x116   : > { %v1016_v30 = vadd.f32 %v4154_v37, %v1015_v29  ;;  %1111 = vrot.lane.b32.xlu0 %v1061_v56, %s3964_s23 }
 0x117   : > { %v1070_v31 = vpack.c.bf16 %v1024_v28, %v1021_v24  ;;  %3461 = vmatpush3.bf16.msra.mxu1 %v1060_v45 }
 0x118   : > { %v1069_v32 = vpack.c.bf16 %v1016_v30, %v1013_v26 }
 0x11a   : > { %v3636_v33 = vpop.f32.mrb[24].mxu1  ;;  %1113 = vrot.lane.b32.xlu0 %v4166_v55, %s3964_s23  ;;  %3462 = vmatprep.subr.bf16.mxu1 %v1069_v32 }
 0x11b   : > { %v1037_v34 = vadd.f32 %v3636_v33, %v4154_v37  ;;  %v1028_v35 = vpop.f32.mrb[25].mxu1  ;;  %1127 = vrot.lane.b32.xlu1 %v1069_v32, %s3964_s23  ;;  %3463 = vmatpush3.bf16.msra.mxu1 %v1061_v56  ;;  %v521_v56 = vpop.f32.mrb[1].mxu0 }
 0x11c   : > { %v1029_v36 = vadd.f32 %v4154_v37, %v1028_v35  ;;  %v3637_v38 = vpop.f32.mrb[26].mxu1  ;;  %3464 = vmatprep.subr.bf16.mxu1 %v1070_v31  ;;  %v3577_v58 = vpop.f32.mrb[2].mxu0 }
 0x11d   : > { %v1040_v39 = vadd.f32 %v3637_v38, %v4154_v37  ;;  %v1031_v40 = vpop.f32.mrb[27].mxu1  ;;  %v524_v60 = vpop.f32.mrb[3].mxu0 }
 0x11e   : > { %v1032_v41 = vadd.f32 %v4154_v37, %v1031_v40  ;;  %1115 = vrot.lane.b32.xlu0 %v1063_v2, %s3964_s23 }
 0x11f   : > { %v1072_v42 = vpack.c.bf16 %v1040_v39, %v1037_v34  ;;  %1129 = vrot.lane.b32.xlu1 %v1070_v31, %s3964_s23  ;;  %3465 = vmatpush3.bf16.msra.mxu1 %v4166_v55 }
 0x120   : > { %v1071_v43 = vpack.c.bf16 %v1032_v41, %v1029_v36 }
 0x122   : > { %v3640_v44 = vpop.f32.mrb[28].mxu1  ;;  %1117 = vrot.lane.b32.xlu0 %v4172_v1, %s3964_s23  ;;  %3466 = vmatprep.subr.bf16.mxu1 %v1071_v43 }
 0x123   : > { %v1053_v45 = vadd.f32 %v3640_v44, %v4154_v37  ;;  %v1044_v46 = vpop.f32.mrb[29].mxu1  ;;  %3467 = vmatpush3.bf16.msra.mxu1 %v1063_v2  ;;  %1131 = vrot.lane.b32.xlu1 %v1071_v43, %s3964_s23 }
 0x124   : > { %v1045_v47 = vadd.f32 %v4154_v37, %v1044_v46  ;;  %v3641_v48 = vpop.f32.mrb[30].mxu1  ;;  %3468 = vmatprep.subr.bf16.mxu1 %v1072_v42 }
 0x125   : > { %v1056_v49 = vadd.f32 %v3641_v48, %v4154_v37  ;;  %v1047_v50 = vpop.f32.mrb[31].mxu1 }
 0x126   : > { %v1048_v51 = vadd.f32 %v4154_v37, %v1047_v50  ;;  %1119 = vrot.lane.b32.xlu0 %v4180_v12, %s3964_s23  ;;  %v4221_v37 = vld [vmem:[%s5647_s3] ss:$0 sm:$0xff] }
 0x127   : > { %v1074_v52 = vpack.c.bf16 %v1056_v49, %v1053_v45  ;;  %3469 = vmatpush3.bf16.msra.mxu1 %v4172_v1  ;;  %1133 = vrot.lane.b32.xlu1 %v1072_v42, %s3964_s23  ;;  %v530_v55 = vadd.f32 %v3576_v54, %v4221_v37  ;;  %v522_v57 = vadd.f32 %v4221_v37, %v521_v56  ;;  %v3580_v1 = vpop.f32.mrb[4].mxu0 }
 0x128   : > { %v1073_v53 = vpack.c.bf16 %v1048_v51, %v1045_v47  ;;  %v533_v59 = vadd.f32 %v3577_v58, %v4221_v37  ;;  %v525_v61 = vadd.f32 %v4221_v37, %v524_v60  ;;  %v546_v2 = vadd.f32 %v3580_v1, %v4221_v37  ;;  %v537_v3 = vpop.f32.mrb[5].mxu0 }
 0x129   : > { %v538_v4 = vadd.f32 %v4221_v37, %v537_v3  ;;  %v3581_v5 = vpop.f32.mrb[6].mxu0 }
 0x12a   : > { %1121 = vrot.lane.b32.xlu0 %v4178_v11, %s3964_s23  ;;  %3470 = vmatprep.subr.bf16.mxu1 %v1073_v53  ;;  %v649_v62 = vpack.c.bf16 %v533_v59, %v530_v55  ;;  %v648_v63 = vpack.c.bf16 %v525_v61, %v522_v57  ;;  %v549_v6 = vadd.f32 %v3581_v5, %v4221_v37  ;;  %v540_v7 = vpop.f32.mrb[7].mxu0 }
 0x12b   : > { %3471 = vmatpush3.bf16.msra.mxu1 %v4180_v12  ;;  %1135 = vrot.lane.b32.xlu1 %v1073_v53, %s3964_s23  ;;  %v541_v8 = vadd.f32 %v4221_v37, %v540_v7 }
 0x12c   : > { %3472 = vmatprep.subr.bf16.mxu1 %v1074_v52  ;;  %666 = vst.msk [vmem:[#allocation2 + $0x8] sm:$0xff] %vm664_vm1, %v649_v62  ;;  %665 = vst.msk [vmem:[#allocation2] sm:$0xff] %vm664_vm1, %v648_v63  ;;  %v651_v9 = vpack.c.bf16 %v549_v6, %v546_v2 }
 0x12d   : > { %v650_v10 = vpack.c.bf16 %v541_v8, %v538_v4 }
 0x12e   : > { %668 = vst.msk [vmem:[#allocation2 + $0x18] sm:$0xff] %vm664_vm1, %v651_v9 }
 0x12f   : > { %3473 = vmatpush3.bf16.msra.mxu1 %v4178_v11  ;;  %1137 = vrot.lane.b32.xlu1 %v1074_v52, %s3964_s23  ;;  %667 = vst.msk [vmem:[#allocation2 + $0x10] sm:$0xff] %vm664_vm1, %v650_v10  ;;  %v3584_v11 = vpop.f32.mrb[8].mxu0 }
 0x130   : > { %v562_v12 = vadd.f32 %v3584_v11, %v4221_v37  ;;  %v553_v13 = vpop.f32.mrb[9].mxu0 }
 0x131   : > { %v554_v14 = vadd.f32 %v4221_v37, %v553_v13  ;;  %v3585_v15 = vpop.f32.mrb[10].mxu0 }
 0x132   : > { %v565_v16 = vadd.f32 %v3585_v15, %v4221_v37  ;;  %v556_v17 = vpop.f32.mrb[11].mxu0 }
 0x133   : > { %v4231_v0 = vld [vmem:[#allocation2] sm:$0xff]  ;;  %v557_v18 = vadd.f32 %v4221_v37, %v556_v17  ;;  %v3588_v21 = vpop.f32.mrb[12].mxu0 }
 0x134   : > { %3426 = vmatprep.mubr.msk.bf16.mxu0 %vm664_vm1, %v4231_v0  ;;  %v653_v19 = vpack.c.bf16 %v565_v16, %v562_v12  ;;  %v578_v22 = vadd.f32 %v3588_v21, %v4221_v37  ;;  %v569_v23 = vpop.f32.mrb[13].mxu0 }
 0x135   : > { %v652_v20 = vpack.c.bf16 %v557_v18, %v554_v14  ;;  %v570_v24 = vadd.f32 %v4221_v37, %v569_v23  ;;  %v3589_v25 = vpop.f32.mrb[14].mxu0 }
 0x136   : > { %670 = vst.msk [vmem:[#allocation2 + $0x28] sm:$0xff] %vm664_vm1, %v653_v19  ;;  %v581_v26 = vadd.f32 %v3589_v25, %v4221_v37  ;;  %v572_v27 = vpop.f32.mrb[15].mxu0 }
 0x137   : > { %669 = vst.msk [vmem:[#allocation2 + $0x20] sm:$0xff] %vm664_vm1, %v652_v20  ;;  %v573_v28 = vadd.f32 %v4221_v37, %v572_v27  ;;  %v3592_v31 = vpop.f32.mrb[16].mxu0 }
 0x138   : > { %v655_v29 = vpack.c.bf16 %v581_v26, %v578_v22  ;;  %v594_v32 = vadd.f32 %v3592_v31, %v4221_v37  ;;  %v585_v33 = vpop.f32.mrb[17].mxu0 }
 0x139   : > { %v654_v30 = vpack.c.bf16 %v573_v28, %v570_v24  ;;  %v586_v34 = vadd.f32 %v4221_v37, %v585_v33  ;;  %v3593_v35 = vpop.f32.mrb[18].mxu0  ;;  %v1077_v33 = vld [vmem:[#allocation2 + $0x10] sm:$0xff] }
 0x13a   : > { %672 = vst.msk [vmem:[#allocation2 + $0x38] sm:$0xff] %vm664_vm1, %v655_v29  ;;  %v597_v36 = vadd.f32 %v3593_v35, %v4221_v37  ;;  %v588_v38 = vpop.f32.mrb[19].mxu0 }
 0x13b   : > { %671 = vst.msk [vmem:[#allocation2 + $0x30] sm:$0xff] %vm664_vm1, %v654_v30  ;;  %v589_v39 = vadd.f32 %v4221_v37, %v588_v38  ;;  %v3596_v43 = vpop.f32.mrb[20].mxu0 }
 0x13c   : > { %v657_v40 = vpack.c.bf16 %v597_v36, %v594_v32  ;;  %v610_v45 = vadd.f32 %v3596_v43, %v4221_v37  ;;  %v601_v46 = vpop.f32.mrb[21].mxu0  ;;  %v1076_v32 = vld [vmem:[#allocation2 + $0x8] sm:$0xff] }
 0x13d   : > { %v656_v41 = vpack.c.bf16 %v589_v39, %v586_v34  ;;  %v602_v47 = vadd.f32 %v4221_v37, %v601_v46  ;;  %v3597_v48 = vpop.f32.mrb[22].mxu0  ;;  %v1078_v34 = vld [vmem:[#allocation2 + $0x18] sm:$0xff] }
 0x13e   : > { %674 = vst.msk [vmem:[#allocation2 + $0x48] sm:$0xff] %vm664_vm1, %v657_v40  ;;  %v613_v50 = vadd.f32 %v3597_v48, %v4221_v37  ;;  %v604_v51 = vpop.f32.mrb[23].mxu0  ;;  %v1079_v35 = vld [vmem:[#allocation2 + $0x20] sm:$0xff] }
 0x13f   : > { %673 = vst.msk [vmem:[#allocation2 + $0x40] sm:$0xff] %vm664_vm1, %v656_v41  ;;  %v605_v53 = vadd.f32 %v4221_v37, %v604_v51  ;;  %v3600_v58 = vpop.f32.mrb[24].mxu0 }
 0x140   : > { %v659_v55 = vpack.c.bf16 %v613_v50, %v610_v45  ;;  %v626_v60 = vadd.f32 %v3600_v58, %v4221_v37  ;;  %v617_v61 = vpop.f32.mrb[25].mxu0 }
 0x141   : > { %v658_v56 = vpack.c.bf16 %v605_v53, %v602_v47  ;;  %v618_v62 = vadd.f32 %v4221_v37, %v617_v61  ;;  %v3601_v63 = vpop.f32.mrb[26].mxu0  ;;  %v1082_v38 = vld [vmem:[#allocation2 + $0x38] sm:$0xff]  ;;  %v3965_v47 = vmov -inf  }
 0x142   : > { %676 = vst.msk [vmem:[#allocation2 + $0x58] sm:$0xff] %vm664_vm1, %v659_v55  ;;  %v629_v1 = vadd.f32 %v3601_v63, %v4221_v37  ;;  %v620_v2 = vpop.f32.mrb[27].mxu0  ;;  %v1081_v36 = vld [vmem:[#allocation2 + $0x30] sm:$0xff] }
 0x143   : > { %675 = vst.msk [vmem:[#allocation2 + $0x50] sm:$0xff] %vm664_vm1, %v658_v56  ;;  %v621_v3 = vadd.f32 %v4221_v37, %v620_v2  ;;  %v3604_v11 = vpop.f32.mrb[28].mxu0  ;;  %v3966_v2 = vmov 0  }
 0x144   : > { %v661_v5 = vpack.c.bf16 %v629_v1, %v626_v60  ;;  %v642_v13 = vadd.f32 %v3604_v11, %v4221_v37  ;;  %v633_v14 = vpop.f32.mrb[29].mxu0  ;;  %682 = vst.msk [vmem:[#allocation3] sm:$0xff] %vm681_vm2, %v3965_v47  ;;  %683 = vst.msk [vmem:[#allocation3 + $0x8] sm:$0xff] %vm681_vm2, %v3965_v47  ;;  %3678 = vset.pattern.permute.xlu1 %v3966_v2  ;;  %3679 = vset.pattern.permute.xlu0 %v3966_v2 }
 0x145   : > { %v660_v6 = vpack.c.bf16 %v621_v3, %v618_v62  ;;  %v634_v15 = vadd.f32 %v4221_v37, %v633_v14  ;;  %v3605_v16 = vpop.f32.mrb[30].mxu0  ;;  %v1084_v40 = vld [vmem:[#allocation2 + $0x48] sm:$0xff]  ;;  %684 = vst.msk [vmem:[#allocation3 + $0x10] sm:$0xff] %vm681_vm2, %v3965_v47  ;;  %685 = vst.msk [vmem:[#allocation3 + $0x18] sm:$0xff] %vm681_vm2, %v3965_v47 }
 0x146   : > { %678 = vst.msk [vmem:[#allocation2 + $0x68] sm:$0xff] %vm664_vm1, %v661_v5  ;;  %v645_v17 = vadd.f32 %v3605_v16, %v4221_v37  ;;  %v636_v18 = vpop.f32.mrb[31].mxu0  ;;  %v1083_v39 = vld [vmem:[#allocation2 + $0x40] sm:$0xff] }
 0x147   : > { %677 = vst.msk [vmem:[#allocation2 + $0x60] sm:$0xff] %vm664_vm1, %v660_v6  ;;  %v637_v19 = vadd.f32 %v4221_v37, %v636_v18 }
 0x148   : > { %v663_v21 = vpack.c.bf16 %v645_v17, %v642_v13  ;;  %686 = vst.msk [vmem:[#allocation3 + $0x20] sm:$0xff] %vm681_vm2, %v3965_v47  ;;  %687 = vst.msk [vmem:[#allocation3 + $0x28] sm:$0xff] %vm681_vm2, %v3965_v47 }
 0x149   : > { %v662_v22 = vpack.c.bf16 %v637_v19, %v634_v15  ;;  %688 = vst.msk [vmem:[#allocation3 + $0x30] sm:$0xff] %vm681_vm2, %v3965_v47  ;;  %689 = vst.msk [vmem:[#allocation3 + $0x38] sm:$0xff] %vm681_vm2, %v3965_v47 }
 0x14a   : > { %680 = vst.msk [vmem:[#allocation2 + $0x78] sm:$0xff] %vm664_vm1, %v663_v21  ;;  %v1085_v41 = vld [vmem:[#allocation2 + $0x50] sm:$0xff] }
 0x14b   : > { %679 = vst.msk [vmem:[#allocation2 + $0x70] sm:$0xff] %vm664_vm1, %v662_v22 }
 0x14c   : > { %690 = vst.msk [vmem:[#allocation3 + $0x40] sm:$0xff] %vm681_vm2, %v3965_v47  ;;  %691 = vst.msk [vmem:[#allocation3 + $0x48] sm:$0xff] %vm681_vm2, %v3965_v47 }
 0x14d   : > { %692 = vst.msk [vmem:[#allocation3 + $0x50] sm:$0xff] %vm681_vm2, %v3965_v47  ;;  %693 = vst.msk [vmem:[#allocation3 + $0x58] sm:$0xff] %vm681_vm2, %v3965_v47 }
 0x14e   : > { %v1087_v43 = vld [vmem:[#allocation2 + $0x60] sm:$0xff]  ;;  %694 = vst.msk [vmem:[#allocation3 + $0x60] sm:$0xff] %vm681_vm2, %v3965_v47  ;;  %695 = vst.msk [vmem:[#allocation3 + $0x68] sm:$0xff] %vm681_vm2, %v3965_v47 }
 0x14f   : > { %696 = vst.msk [vmem:[#allocation3 + $0x70] sm:$0xff] %vm681_vm2, %v3965_v47  ;;  %697 = vst.msk [vmem:[#allocation3 + $0x78] sm:$0xff] %vm681_vm2, %v3965_v47 }
 0x150   : > { %698 = vst.msk [vmem:[#allocation3 + $0x80] sm:$0xff] %vm681_vm2, %v3965_v47  ;;  %699 = vst.msk [vmem:[#allocation3 + $0x88] sm:$0xff] %vm681_vm2, %v3965_v47 }
 0x151   : > { %v1090_v46 = vld [vmem:[#allocation2 + $0x78] sm:$0xff]  ;;  %700 = vst.msk [vmem:[#allocation3 + $0x90] sm:$0xff] %vm681_vm2, %v3965_v47  ;;  %701 = vst.msk [vmem:[#allocation3 + $0x98] sm:$0xff] %vm681_vm2, %v3965_v47 }
 0x152   : > { %v1089_v45 = vld [vmem:[#allocation2 + $0x70] sm:$0xff]  ;;  %702 = vst.msk [vmem:[#allocation3 + $0xa0] sm:$0xff] %vm681_vm2, %v3965_v47  ;;  %703 = vst.msk [vmem:[#allocation3 + $0xa8] sm:$0xff] %vm681_vm2, %v3965_v47 }
 0x153   : > { %704 = vst.msk [vmem:[#allocation3 + $0xb0] sm:$0xff] %vm681_vm2, %v3965_v47  ;;  %705 = vst.msk [vmem:[#allocation3 + $0xb8] sm:$0xff] %vm681_vm2, %v3965_v47 }
 0x154   : > { %706 = vst.msk [vmem:[#allocation3 + $0xc0] sm:$0xff] %vm681_vm2, %v3965_v47  ;;  %707 = vst.msk [vmem:[#allocation3 + $0xc8] sm:$0xff] %vm681_vm2, %v3965_v47 }
 0x155   : > { %708 = vst.msk [vmem:[#allocation3 + $0xd0] sm:$0xff] %vm681_vm2, %v3965_v47  ;;  %709 = vst.msk [vmem:[#allocation3 + $0xd8] sm:$0xff] %vm681_vm2, %v3965_v47 }
 0x156   : > { %710 = vst.msk [vmem:[#allocation3 + $0xe0] sm:$0xff] %vm681_vm2, %v3965_v47  ;;  %711 = vst.msk [vmem:[#allocation3 + $0xe8] sm:$0xff] %vm681_vm2, %v3965_v47 }
 0x157   : > { %712 = vst.msk [vmem:[#allocation3 + $0xf0] sm:$0xff] %vm681_vm2, %v3965_v47  ;;  %713 = vst.msk [vmem:[#allocation3 + $0xf8] sm:$0xff] %vm681_vm2, %v3965_v47 }
 0x163   : > { %v1110_v44 = vpop.permute.xlu1 %1109 }
 0x164   : > { %v1108_v42 = vpop.permute.xlu0 %1107  ;;  %v1192_v57 = vsel %vm664_vm1, %v1110_v44, 0  ;;  %v1088_v44 = vld [vmem:[#allocation2 + $0x68] sm:$0xff] }
 0x165   : > { %v1189_v52 = vsel %vm664_vm1, %v1108_v42, 0  ;;  %v1086_v42 = vld [vmem:[#allocation2 + $0x58] sm:$0xff] }
 0x183   : > { %v1126_v54 = vpop.permute.xlu1 %1125 }
 0x184   : > { %v1124_v49 = vpop.permute.xlu0 %1123 }
 0x185   : > { %3642 = vmatprep.subr.msk.bf16.mxu0 %vm664_vm1, %v1124_v49 }
 0x186   : > { %3411 = vmatpush3.bf16.xpose.msra.mxu0 %v1189_v52 }
 0x187   : > { %3643 = vmatprep.subr.msk.bf16.mxu0 %vm664_vm1, %v1126_v54 }
 0x188   : > { %v1112_v4 = vpop.permute.xlu0 %1111 }
 0x189   : > { %v1195_v7 = vsel %vm664_vm1, %v1112_v4, 0 }
 0x18c   : > { %v1114_v9 = vpop.permute.xlu0 %1113 }
 0x18d   : > { %v1128_v59 = vpop.permute.xlu1 %1127  ;;  %v1198_v10 = vsel %vm664_vm1, %v1114_v9, 0 }
 0x18e   : > { %3413 = vmatpush3.bf16.xpose.msra.mxu0 %v1192_v57 }
 0x18f   : > { %3644 = vmatprep.subr.msk.bf16.mxu0 %vm664_vm1, %v1128_v59 }
 0x190   : > { %v1116_v20 = vpop.permute.xlu0 %1115 }
 0x191   : > { %v1130_v8 = vpop.permute.xlu1 %1129  ;;  %v1201_v23 = vsel %vm664_vm1, %v1116_v20, 0 }
 0x194   : > { %v1118_v25 = vpop.permute.xlu0 %1117 }
 0x195   : > { %v1132_v12 = vpop.permute.xlu1 %1131  ;;  %v1204_v26 = vsel %vm664_vm1, %v1118_v25, 0 }
 0x196   : > { %3415 = vmatpush3.bf16.xpose.msra.mxu0 %v1195_v7 }
 0x197   : > { %3645 = vmatprep.subr.msk.bf16.mxu0 %vm664_vm1, %v1130_v8 }
 0x198   : > { %v1120_v37 = vpop.permute.xlu0 %1119 }
 0x199   : > { %v1134_v24 = vpop.permute.xlu1 %1133  ;;  %v1207_v28 = vsel %vm664_vm1, %v1120_v37, 0 }
 0x19c   : > { %v1122_v30 = vpop.permute.xlu0 %1121 }
 0x19d   : > { %v1136_v27 = vpop.permute.xlu1 %1135  ;;  %v1210_v31 = vsel %vm664_vm1, %v1122_v30, 0 }
 0x19e   : > { %3417 = vmatpush3.bf16.xpose.msra.mxu0 %v1198_v10  ;;  %v3967_v10 = vmov 0.0  }
 0x19f   : > { %3646 = vmatprep.subr.msk.bf16.mxu0 %vm664_vm1, %v1132_v12  ;;  %747 = vst.msk [vmem:[#allocation5 + $0x8] sm:$0xff] %vm438_vm0, %v3967_v10  ;;  %746 = vst.msk [vmem:[#allocation5] sm:$0xff] %vm438_vm0, %v3967_v10 }
 0x1a0   : > { %714 = vst.msk [vmem:[#allocation4] sm:$0xff] %vm681_vm2, %v3967_v10  ;;  %715 = vst.msk [vmem:[#allocation4 + $0x8] sm:$0xff] %vm681_vm2, %v3967_v10 }
 0x1a1   : > { %v1138_v29 = vpop.permute.xlu1 %1137  ;;  %716 = vst.msk [vmem:[#allocation4 + $0x10] sm:$0xff] %vm681_vm2, %v3967_v10  ;;  %717 = vst.msk [vmem:[#allocation4 + $0x18] sm:$0xff] %vm681_vm2, %v3967_v10 }
 0x1a2   : > { %718 = vst.msk [vmem:[#allocation4 + $0x20] sm:$0xff] %vm681_vm2, %v3967_v10  ;;  %719 = vst.msk [vmem:[#allocation4 + $0x28] sm:$0xff] %vm681_vm2, %v3967_v10 }
 0x1a3   : > { %720 = vst.msk [vmem:[#allocation4 + $0x30] sm:$0xff] %vm681_vm2, %v3967_v10  ;;  %721 = vst.msk [vmem:[#allocation4 + $0x38] sm:$0xff] %vm681_vm2, %v3967_v10 }
 0x1a4   : > { %722 = vst.msk [vmem:[#allocation4 + $0x40] sm:$0xff] %vm681_vm2, %v3967_v10  ;;  %723 = vst.msk [vmem:[#allocation4 + $0x48] sm:$0xff] %vm681_vm2, %v3967_v10 }
 0x1a5   : > { %724 = vst.msk [vmem:[#allocation4 + $0x50] sm:$0xff] %vm681_vm2, %v3967_v10  ;;  %725 = vst.msk [vmem:[#allocation4 + $0x58] sm:$0xff] %vm681_vm2, %v3967_v10 }
 0x1a6   : > { %3419 = vmatpush3.bf16.xpose.msra.mxu0 %v1201_v23  ;;  %726 = vst.msk [vmem:[#allocation4 + $0x60] sm:$0xff] %vm681_vm2, %v3967_v10  ;;  %727 = vst.msk [vmem:[#allocation4 + $0x68] sm:$0xff] %vm681_vm2, %v3967_v10 }
 0x1a7   : > { %3647 = vmatprep.subr.msk.bf16.mxu0 %vm664_vm1, %v1134_v24  ;;  %728 = vst.msk [vmem:[#allocation4 + $0x70] sm:$0xff] %vm681_vm2, %v3967_v10  ;;  %729 = vst.msk [vmem:[#allocation4 + $0x78] sm:$0xff] %vm681_vm2, %v3967_v10 }
 0x1a8   : > { %730 = vst.msk [vmem:[#allocation4 + $0x80] sm:$0xff] %vm681_vm2, %v3967_v10  ;;  %731 = vst.msk [vmem:[#allocation4 + $0x88] sm:$0xff] %vm681_vm2, %v3967_v10 }
 0x1a9   : > { %732 = vst.msk [vmem:[#allocation4 + $0x90] sm:$0xff] %vm681_vm2, %v3967_v10  ;;  %733 = vst.msk [vmem:[#allocation4 + $0x98] sm:$0xff] %vm681_vm2, %v3967_v10 }
 0x1aa   : > { %734 = vst.msk [vmem:[#allocation4 + $0xa0] sm:$0xff] %vm681_vm2, %v3967_v10  ;;  %735 = vst.msk [vmem:[#allocation4 + $0xa8] sm:$0xff] %vm681_vm2, %v3967_v10 }
 0x1ab   : > { %736 = vst.msk [vmem:[#allocation4 + $0xb0] sm:$0xff] %vm681_vm2, %v3967_v10  ;;  %737 = vst.msk [vmem:[#allocation4 + $0xb8] sm:$0xff] %vm681_vm2, %v3967_v10 }
 0x1ac   : > { %738 = vst.msk [vmem:[#allocation4 + $0xc0] sm:$0xff] %vm681_vm2, %v3967_v10  ;;  %739 = vst.msk [vmem:[#allocation4 + $0xc8] sm:$0xff] %vm681_vm2, %v3967_v10 }
 0x1ad   : > { %740 = vst.msk [vmem:[#allocation4 + $0xd0] sm:$0xff] %vm681_vm2, %v3967_v10  ;;  %741 = vst.msk [vmem:[#allocation4 + $0xd8] sm:$0xff] %vm681_vm2, %v3967_v10 }
 0x1ae   : > { %3421 = vmatpush3.bf16.xpose.msra.mxu0 %v1204_v26  ;;  %742 = vst.msk [vmem:[#allocation4 + $0xe0] sm:$0xff] %vm681_vm2, %v3967_v10  ;;  %743 = vst.msk [vmem:[#allocation4 + $0xe8] sm:$0xff] %vm681_vm2, %v3967_v10 }
 0x1af   : > { %3648 = vmatprep.subr.msk.bf16.mxu0 %vm664_vm1, %v1136_v27  ;;  %744 = vst.msk [vmem:[#allocation4 + $0xf0] sm:$0xff] %vm681_vm2, %v3967_v10  ;;  %745 = vst.msk [vmem:[#allocation4 + $0xf8] sm:$0xff] %vm681_vm2, %v3967_v10 }
 0x1b0   : > { %748 = vst.msk [vmem:[#allocation5 + $0x10] sm:$0xff] %vm438_vm0, %v3967_v10  ;;  %749 = vst.msk [vmem:[#allocation5 + $0x18] sm:$0xff] %vm438_vm0, %v3967_v10 }
 0x1b1   : > { %750 = vst.msk [vmem:[#allocation5 + $0x20] sm:$0xff] %vm438_vm0, %v3967_v10  ;;  %751 = vst.msk [vmem:[#allocation5 + $0x28] sm:$0xff] %vm438_vm0, %v3967_v10 }
 0x1b2   : > { %752 = vst.msk [vmem:[#allocation5 + $0x30] sm:$0xff] %vm438_vm0, %v3967_v10  ;;  %753 = vst.msk [vmem:[#allocation5 + $0x38] sm:$0xff] %vm438_vm0, %v3967_v10 }
 0x1b3   : > { %754 = vst.msk [vmem:[#allocation5 + $0x40] sm:$0xff] %vm438_vm0, %v3967_v10  ;;  %755 = vst.msk [vmem:[#allocation5 + $0x48] sm:$0xff] %vm438_vm0, %v3967_v10 }
 0x1b4   : > { %756 = vst.msk [vmem:[#allocation5 + $0x50] sm:$0xff] %vm438_vm0, %v3967_v10  ;;  %757 = vst.msk [vmem:[#allocation5 + $0x58] sm:$0xff] %vm438_vm0, %v3967_v10 }
 0x1b5   : > { %758 = vst.msk [vmem:[#allocation5 + $0x60] sm:$0xff] %vm438_vm0, %v3967_v10  ;;  %759 = vst.msk [vmem:[#allocation5 + $0x68] sm:$0xff] %vm438_vm0, %v3967_v10 }
 0x1b6   : > { %3423 = vmatpush3.bf16.xpose.msra.mxu0 %v1207_v28  ;;  %760 = vst.msk [vmem:[#allocation5 + $0x70] sm:$0xff] %vm438_vm0, %v3967_v10  ;;  %761 = vst.msk [vmem:[#allocation5 + $0x78] sm:$0xff] %vm438_vm0, %v3967_v10 }
 0x1b7   : > { %3649 = vmatprep.subr.msk.bf16.mxu0 %vm664_vm1, %v1138_v29  ;;  %762 = vst.msk [vmem:[#allocation5 + $0x80] sm:$0xff] %vm438_vm0, %v3967_v10  ;;  %763 = vst.msk [vmem:[#allocation5 + $0x88] sm:$0xff] %vm438_vm0, %v3967_v10 }
 0x1b8   : > { %764 = vst.msk [vmem:[#allocation5 + $0x90] sm:$0xff] %vm438_vm0, %v3967_v10  ;;  %765 = vst.msk [vmem:[#allocation5 + $0x98] sm:$0xff] %vm438_vm0, %v3967_v10 }
 0x1b9   : > { %766 = vst.msk [vmem:[#allocation5 + $0xa0] sm:$0xff] %vm438_vm0, %v3967_v10  ;;  %767 = vst.msk [vmem:[#allocation5 + $0xa8] sm:$0xff] %vm438_vm0, %v3967_v10 }
 0x1ba   : > { %768 = vst.msk [vmem:[#allocation5 + $0xb0] sm:$0xff] %vm438_vm0, %v3967_v10  ;;  %769 = vst.msk [vmem:[#allocation5 + $0xb8] sm:$0xff] %vm438_vm0, %v3967_v10 }
 0x1bb   : > { %770 = vst.msk [vmem:[#allocation5 + $0xc0] sm:$0xff] %vm438_vm0, %v3967_v10  ;;  %771 = vst.msk [vmem:[#allocation5 + $0xc8] sm:$0xff] %vm438_vm0, %v3967_v10 }
 0x1bc   : > { %772 = vst.msk [vmem:[#allocation5 + $0xd0] sm:$0xff] %vm438_vm0, %v3967_v10  ;;  %773 = vst.msk [vmem:[#allocation5 + $0xd8] sm:$0xff] %vm438_vm0, %v3967_v10 }
 0x1bd   : > { %774 = vst.msk [vmem:[#allocation5 + $0xe0] sm:$0xff] %vm438_vm0, %v3967_v10  ;;  %775 = vst.msk [vmem:[#allocation5 + $0xe8] sm:$0xff] %vm438_vm0, %v3967_v10 }
 0x1be   : > { %3425 = vmatpush3.bf16.xpose.msra.mxu0 %v1210_v31  ;;  %776 = vst.msk [vmem:[#allocation5 + $0xf0] sm:$0xff] %vm438_vm0, %v3967_v10  ;;  %777 = vst.msk [vmem:[#allocation5 + $0xf8] sm:$0xff] %vm438_vm0, %v3967_v10 }
 0x1c5   : > { %3427 = vmatmul.mubr.msk.bf16.vlgmr.msra.gmra.mrb[32].mxu0 %vm664_vm1, %v4231_v0  ;;  %v1080_v0 = vld [vmem:[#allocation2 + $0x28] sm:$0xff] }
 0x1c6   : > { %3428 = vmatprep.mubr.msk.bf16.mxu0 %vm664_vm1, %v1076_v32 }
 0x1cd   : > { %3429 = vmatmul.mubr.msk.bf16.gmra.mrb[36].mxu0 %vm664_vm1, %v1076_v32 }
 0x1ce   : > { %3430 = vmatprep.mubr.msk.bf16.mxu0 %vm664_vm1, %v1077_v33 }
 0x1d5   : > { %3431 = vmatmul.mubr.msk.bf16.gmra.mrb[40].mxu0 %vm664_vm1, %v1077_v33 }
 0x1d6   : > { %3432 = vmatprep.mubr.msk.bf16.mxu0 %vm664_vm1, %v1078_v34 }
 0x1dd   : > { %3433 = vmatmul.mubr.msk.bf16.gmra.mrb[44].mxu0 %vm664_vm1, %v1078_v34 }
 0x1de   : > { %3434 = vmatprep.mubr.msk.bf16.mxu0 %vm664_vm1, %v1079_v35 }
 0x1e5   : > { %3435 = vmatmul.mubr.msk.bf16.gmra.mrb[48].mxu0 %vm664_vm1, %v1079_v35 }
 0x1e6   : > { %3436 = vmatprep.mubr.msk.bf16.mxu0 %vm664_vm1, %v1080_v0 }
 0x1ed   : > { %3437 = vmatmul.mubr.msk.bf16.gmra.mrb[52].mxu0 %vm664_vm1, %v1080_v0 }
 0x1ee   : > { %3438 = vmatprep.mubr.msk.bf16.mxu0 %vm664_vm1, %v1081_v36 }
 0x1f5   : > { %3439 = vmatmul.mubr.msk.bf16.gmra.mrb[56].mxu0 %vm664_vm1, %v1081_v36 }
 0x1f6   : > { %3440 = vmatprep.mubr.msk.bf16.mxu0 %vm664_vm1, %v1082_v38 }
 0x1fd   : > { %3441 = vmatmul.mubr.msk.bf16.gmra.mrb[60].mxu0 %vm664_vm1, %v1082_v38 }
 0x1fe   : > { %3442 = vmatprep.mubr.msk.bf16.mxu0 %vm664_vm1, %v1083_v39 }
 0x205   : > { %3443 = vmatmul.mubr.msk.bf16.gmra.mrb[64].mxu0 %vm664_vm1, %v1083_v39 }
 0x206   : > { %3444 = vmatprep.mubr.msk.bf16.mxu0 %vm664_vm1, %v1084_v40 }
 0x20d   : > { %3445 = vmatmul.mubr.msk.bf16.gmra.mrb[68].mxu0 %vm664_vm1, %v1084_v40 }
 0x20e   : > { %3446 = vmatprep.mubr.msk.bf16.mxu0 %vm664_vm1, %v1085_v41 }
 0x215   : > { %3447 = vmatmul.mubr.msk.bf16.gmra.mrb[72].mxu0 %vm664_vm1, %v1085_v41 }
 0x216   : > { %3448 = vmatprep.mubr.msk.bf16.mxu0 %vm664_vm1, %v1086_v42 }
 0x21d   : > { %3449 = vmatmul.mubr.msk.bf16.gmra.mrb[76].mxu0 %vm664_vm1, %v1086_v42 }
 0x21e   : > { %3450 = vmatprep.mubr.msk.bf16.mxu0 %vm664_vm1, %v1087_v43 }
 0x225   : > { %3451 = vmatmul.mubr.msk.bf16.gmra.mrb[80].mxu0 %vm664_vm1, %v1087_v43 }
 0x226   : > { %3452 = vmatprep.mubr.msk.bf16.mxu0 %vm664_vm1, %v1088_v44 }
 0x22d   : > { %3453 = vmatmul.mubr.msk.bf16.gmra.mrb[84].mxu0 %vm664_vm1, %v1088_v44 }
 0x22e   : > { %3454 = vmatprep.mubr.msk.bf16.mxu0 %vm664_vm1, %v1089_v45 }
 0x235   : > { %3455 = vmatmul.mubr.msk.bf16.gmra.mrb[88].mxu0 %vm664_vm1, %v1089_v45 }
 0x236   : > { %3456 = vmatprep.mubr.msk.bf16.mxu0 %vm664_vm1, %v1090_v46 }
 0x23d   : > { %3457 = vmatmul.mubr.msk.bf16.gmra.mrb[92].mxu0 %vm664_vm1, %v1090_v46 }
 0x298   : > { %v4357_v48 = vpop.f32.mrb[32].mxu0 }
 0x299   : > { %v4359_v49 = vpop.f32.mrb[33].mxu0 }
 0x29a   : > { %v4361_v50 = vpop.f32.mrb[34].mxu0  ;;  %v1461_v51 = vmax.f32 %v4357_v48, %v4359_v49 }
 0x29b   : > { %v4365_v52 = vpop.f32.mrb[35].mxu0 }
 0x29c   : > { %1462 = vmax.xlane.f32.xlu0 %v1461_v51  ;;  %v1464_v53 = vmax.f32 %v4361_v50, %v4365_v52 }
 0x29e   : > { %1465 = vmax.xlane.f32.xlu1 %v1464_v53 }
 0x2a0   : > { %v4369_v54 = vpop.f32.mrb[36].mxu0 }
 0x2a1   : > { %v4371_v55 = vpop.f32.mrb[37].mxu0 }
 0x2a2   : > { %v4373_v56 = vpop.f32.mrb[38].mxu0  ;;  %v1467_v57 = vmax.f32 %v4369_v54, %v4371_v55 }
 0x2a3   : > { %v4377_v58 = vpop.f32.mrb[39].mxu0 }
 0x2a4   : > { %1468 = vmax.xlane.f32.xlu0 %v1467_v57  ;;  %v1470_v59 = vmax.f32 %v4373_v56, %v4377_v58 }
 0x2a8   : > { %1471 = vmax.xlane.f32.xlu0 %v1470_v59  ;;  %v4381_v60 = vpop.f32.mrb[40].mxu0 }
 0x2a9   : > { %v4383_v61 = vpop.f32.mrb[41].mxu0 }
 0x2aa   : > { %v4385_v62 = vpop.f32.mrb[42].mxu0  ;;  %v1473_v63 = vmax.f32 %v4381_v60, %v4383_v61 }
 0x2ab   : > { %5724 = vst [vmem:[#allocation7_spill] sm:$0xff] %v4385_v62  ;;  %v4389_v1 = vpop.f32.mrb[43].mxu0 }
 0x2ac   : > { %5725 = vst [vmem:[#allocation8_spill] sm:$0xff] %v4389_v1  ;;  %1474 = vmax.xlane.f32.xlu1 %v1473_v63  ;;  %v1476_v3 = vmax.f32 %v4385_v62, %v4389_v1 }
 0x2ae   : > { %1477 = vmax.xlane.f32.xlu0 %v1476_v3 }
 0x2b0   : > { %v4393_v4 = vpop.f32.mrb[44].mxu0 }
 0x2b1   : > { %5726 = vst [vmem:[#allocation9_spill] sm:$0xff] %v4393_v4  ;;  %v4395_v5 = vpop.f32.mrb[45].mxu0 }
 0x2b2   : > { %5727 = vst [vmem:[#allocation10_spill] sm:$0xff] %v4395_v5  ;;  %v4397_v6 = vpop.f32.mrb[46].mxu0  ;;  %v1479_v7 = vmax.f32 %v4393_v4, %v4395_v5 }
 0x2b3   : > { %5728 = vst [vmem:[#allocation11_spill] sm:$0xff] %v4397_v6  ;;  %v4401_v8 = vpop.f32.mrb[47].mxu0 }
 0x2b4   : > { %5729 = vst [vmem:[#allocation12_spill] sm:$0xff] %v4401_v8  ;;  %1480 = vmax.xlane.f32.xlu1 %v1479_v7  ;;  %v1482_v9 = vmax.f32 %v4397_v6, %v4401_v8 }
 0x2b6   : > { %1483 = vmax.xlane.f32.xlu0 %v1482_v9 }
 0x2b8   : > { %v4536_v11 = vpop.f32.mrb[48].mxu0 }
 0x2b9   : > { %5730 = vst [vmem:[#allocation13_spill] sm:$0xff] %v4536_v11  ;;  %v4538_v12 = vpop.f32.mrb[49].mxu0 }
 0x2ba   : > { %5731 = vst [vmem:[#allocation14_spill] sm:$0xff] %v4538_v12  ;;  %v4540_v13 = vpop.f32.mrb[50].mxu0  ;;  %v1485_v14 = vmax.f32 %v4536_v11, %v4538_v12  ;;  %v4902_v12 = vld [vmem:[#allocation3 + $0xb8] sm:$0xff]  ;;  %v4952_v11 = vld [vmem:[#allocation3 + $0xe0] sm:$0xff] }
 0x2bb   : > { %5732 = vst [vmem:[#allocation15_spill] sm:$0xff] %v4540_v13  ;;  %v4544_v15 = vpop.f32.mrb[51].mxu0  ;;  %5782 = vst [vmem:[#allocation65_spill] sm:$0xff] %v4902_v12 }
 0x2bc   : > { %5733 = vst [vmem:[#allocation16_spill] sm:$0xff] %v4544_v15  ;;  %1486 = vmax.xlane.f32.xlu1 %v1485_v14  ;;  %v1488_v16 = vmax.f32 %v4540_v13, %v4544_v15 }
 0x2be   : > { %1489 = vmax.xlane.f32.xlu0 %v1488_v16 }
 0x2c0   : > { %v4548_v17 = vpop.f32.mrb[52].mxu0 }
 0x2c1   : > { %5734 = vst [vmem:[#allocation17_spill] sm:$0xff] %v4548_v17  ;;  %v4550_v18 = vpop.f32.mrb[53].mxu0 }
 0x2c2   : > { %5735 = vst [vmem:[#allocation18_spill] sm:$0xff] %v4550_v18  ;;  %v4552_v19 = vpop.f32.mrb[54].mxu0  ;;  %v1491_v20 = vmax.f32 %v4548_v17, %v4550_v18  ;;  %v4882_v18 = vld [vmem:[#allocation3 + $0xa8] sm:$0xff] }
 0x2c3   : > { %5736 = vst [vmem:[#allocation19_spill] sm:$0xff] %v4552_v19  ;;  %v4556_v21 = vpop.f32.mrb[55].mxu0  ;;  %5780 = vst [vmem:[#allocation63_spill] sm:$0xff] %v4882_v18 }
 0x2c4   : > { %5737 = vst [vmem:[#allocation20_spill] sm:$0xff] %v4556_v21  ;;  %1492 = vmax.xlane.f32.xlu1 %v1491_v20  ;;  %v1494_v22 = vmax.f32 %v4552_v19, %v4556_v21 }
 0x2c6   : > { %1495 = vmax.xlane.f32.xlu0 %v1494_v22 }
 0x2c8   : > { %v4560_v23 = vpop.f32.mrb[56].mxu0 }
 0x2c9   : > { %5738 = vst [vmem:[#allocation21_spill] sm:$0xff] %v4560_v23  ;;  %v4562_v24 = vpop.f32.mrb[57].mxu0 }
 0x2ca   : > { %5739 = vst [vmem:[#allocation22_spill] sm:$0xff] %v4562_v24  ;;  %v4564_v25 = vpop.f32.mrb[58].mxu0  ;;  %v1497_v26 = vmax.f32 %v4560_v23, %v4562_v24  ;;  %v4862_v24 = vld [vmem:[#allocation3 + $0x98] sm:$0xff] }
 0x2cb   : > { %5740 = vst [vmem:[#allocation23_spill] sm:$0xff] %v4564_v25  ;;  %v4568_v27 = vpop.f32.mrb[59].mxu0  ;;  %5778 = vst [vmem:[#allocation61_spill] sm:$0xff] %v4862_v24 }
 0x2cc   : > { %5741 = vst [vmem:[#allocation24_spill] sm:$0xff] %v4568_v27  ;;  %1498 = vmax.xlane.f32.xlu1 %v1497_v26  ;;  %v1500_v37 = vmax.f32 %v4564_v25, %v4568_v27 }
 0x2ce   : > { %1501 = vmax.xlane.f32.xlu0 %v1500_v37 }
 0x2d0   : > { %v4572_v28 = vpop.f32.mrb[60].mxu0 }
 0x2d1   : > { %5742 = vst [vmem:[#allocation25_spill] sm:$0xff] %v4572_v28  ;;  %v4574_v29 = vpop.f32.mrb[61].mxu0 }
 0x2d2   : > { %5743 = vst [vmem:[#allocation26_spill] sm:$0xff] %v4574_v29  ;;  %v4576_v30 = vpop.f32.mrb[62].mxu0  ;;  %v1503_v31 = vmax.f32 %v4572_v28, %v4574_v29  ;;  %v4842_v29 = vld [vmem:[#allocation3 + $0x88] sm:$0xff] }
 0x2d3   : > { %5744 = vst [vmem:[#allocation27_spill] sm:$0xff] %v4576_v30  ;;  %v4580_v32 = vpop.f32.mrb[63].mxu0 }
 0x2d4   : > { %5745 = vst [vmem:[#allocation28_spill] sm:$0xff] %v4580_v32  ;;  %1504 = vmax.xlane.f32.xlu1 %v1503_v31  ;;  %v1506_v33 = vmax.f32 %v4576_v30, %v4580_v32 }
 0x2d6   : > { %1507 = vmax.xlane.f32.xlu0 %v1506_v33 }
 0x2d8   : > { %v4584_v34 = vpop.f32.mrb[64].mxu0 }
 0x2d9   : > { %5746 = vst [vmem:[#allocation29_spill] sm:$0xff] %v4584_v34  ;;  %v4586_v35 = vpop.f32.mrb[65].mxu0 }
 0x2da   : > { %5747 = vst [vmem:[#allocation30_spill] sm:$0xff] %v4586_v35  ;;  %v4588_v0 = vpop.f32.mrb[66].mxu0  ;;  %v1509_v36 = vmax.f32 %v4584_v34, %v4586_v35  ;;  %v4822_v35 = vld [vmem:[#allocation3 + $0x78] sm:$0xff] }
 0x2db   : > { %5748 = vst [vmem:[#allocation31_spill] sm:$0xff] %v4588_v0  ;;  %v4592_v38 = vpop.f32.mrb[67].mxu0 }
 0x2dc   : > { %5749 = vst [vmem:[#allocation32_spill] sm:$0xff] %v4592_v38  ;;  %1510 = vmax.xlane.f32.xlu1 %v1509_v36  ;;  %v1512_v39 = vmax.f32 %v4588_v0, %v4592_v38 }
 0x2de   : > { %1513 = vmax.xlane.f32.xlu0 %v1512_v39 }
 0x2e0   : > { %v4596_v40 = vpop.f32.mrb[68].mxu0 }
 0x2e1   : > { %5750 = vst [vmem:[#allocation33_spill] sm:$0xff] %v4596_v40  ;;  %v4598_v41 = vpop.f32.mrb[69].mxu0 }
 0x2e2   : > { %5751 = vst [vmem:[#allocation34_spill] sm:$0xff] %v4598_v41  ;;  %v4600_v42 = vpop.f32.mrb[70].mxu0  ;;  %v1515_v43 = vmax.f32 %v4596_v40, %v4598_v41  ;;  %v4802_v41 = vld [vmem:[#allocation3 + $0x68] sm:$0xff] }
 0x2e3   : > { %5752 = vst [vmem:[#allocation35_spill] sm:$0xff] %v4600_v42  ;;  %v4604_v44 = vpop.f32.mrb[71].mxu0 }
 0x2e4   : > { %5753 = vst [vmem:[#allocation36_spill] sm:$0xff] %v4604_v44  ;;  %1516 = vmax.xlane.f32.xlu1 %v1515_v43  ;;  %v1518_v45 = vmax.f32 %v4600_v42, %v4604_v44 }
 0x2e6   : > { %1519 = vmax.xlane.f32.xlu0 %v1518_v45 }
 0x2e8   : > { %v4608_v46 = vpop.f32.mrb[72].mxu0 }
 0x2e9   : > { %5754 = vst [vmem:[#allocation37_spill] sm:$0xff] %v4608_v46  ;;  %v4610_v47 = vpop.f32.mrb[73].mxu0 }
 0x2ea   : > { %5755 = vst [vmem:[#allocation38_spill] sm:$0xff] %v4610_v47  ;;  %v4612_v51 = vpop.f32.mrb[74].mxu0  ;;  %v1521_v53 = vmax.f32 %v4608_v46, %v4610_v47  ;;  %v4782_v47 = vld [vmem:[#allocation3 + $0x58] sm:$0xff] }
 0x2eb   : > { %5756 = vst [vmem:[#allocation39_spill] sm:$0xff] %v4612_v51  ;;  %v4616_v57 = vpop.f32.mrb[75].mxu0 }
 0x2ec   : > { %5757 = vst [vmem:[#allocation40_spill] sm:$0xff] %v4616_v57  ;;  %1522 = vmax.xlane.f32.xlu1 %v1521_v53  ;;  %v1524_v59 = vmax.f32 %v4612_v51, %v4616_v57 }
 0x2ee   : > { %1525 = vmax.xlane.f32.xlu0 %v1524_v59 }
 0x2f0   : > { %v4620_v63 = vpop.f32.mrb[76].mxu0 }
 0x2f1   : > { %5758 = vst [vmem:[#allocation41_spill] sm:$0xff] %v4620_v63  ;;  %v4622_v2 = vpop.f32.mrb[77].mxu0 }
 0x2f2   : > { %5759 = vst [vmem:[#allocation42_spill] sm:$0xff] %v4622_v2  ;;  %v4624_v3 = vpop.f32.mrb[78].mxu0  ;;  %v1527_v7 = vmax.f32 %v4620_v63, %v4622_v2  ;;  %v4762_v2 = vld [vmem:[#allocation3 + $0x48] sm:$0xff] }
 0x2f3   : > { %5760 = vst [vmem:[#allocation43_spill] sm:$0xff] %v4624_v3  ;;  %v4628_v9 = vpop.f32.mrb[79].mxu0 }
 0x2f4   : > { %5761 = vst [vmem:[#allocation44_spill] sm:$0xff] %v4628_v9  ;;  %1528 = vmax.xlane.f32.xlu1 %v1527_v7  ;;  %v1530_v10 = vmax.f32 %v4624_v3, %v4628_v9 }
 0x2f6   : > { %1531 = vmax.xlane.f32.xlu0 %v1530_v10 }
 0x2f8   : > { %v4632_v14 = vpop.f32.mrb[80].mxu0 }
 0x2f9   : > { %5762 = vst [vmem:[#allocation45_spill] sm:$0xff] %v4632_v14  ;;  %v4634_v16 = vpop.f32.mrb[81].mxu0 }
 0x2fa   : > { %5763 = vst [vmem:[#allocation46_spill] sm:$0xff] %v4634_v16  ;;  %v4636_v20 = vpop.f32.mrb[82].mxu0  ;;  %v1533_v22 = vmax.f32 %v4632_v14, %v4634_v16 }
 0x2fb   : > { %5764 = vst [vmem:[#allocation47_spill] sm:$0xff] %v4636_v20  ;;  %v4640_v26 = vpop.f32.mrb[83].mxu0 }
 0x2fc   : > { %5765 = vst [vmem:[#allocation48_spill] sm:$0xff] %v4640_v26  ;;  %1534 = vmax.xlane.f32.xlu1 %v1533_v22  ;;  %v1536_v37 = vmax.f32 %v4636_v20, %v4640_v26  ;;  %v4722_v26 = vld [vmem:[#allocation3 + $0x28] sm:$0xff] }
 0x2fe   : > { %1537 = vmax.xlane.f32.xlu0 %v1536_v37 }
 0x300   : > { %v4644_v31 = vpop.f32.mrb[84].mxu0 }
 0x301   : > { %5766 = vst [vmem:[#allocation49_spill] sm:$0xff] %v4644_v31  ;;  %v4646_v33 = vpop.f32.mrb[85].mxu0 }
 0x302   : > { %5767 = vst [vmem:[#allocation50_spill] sm:$0xff] %v4646_v33  ;;  %v4648_v36 = vpop.f32.mrb[86].mxu0  ;;  %v1539_v39 = vmax.f32 %v4644_v31, %v4646_v33 }
 0x303   : > { %5768 = vst [vmem:[#allocation51_spill] sm:$0xff] %v4648_v36  ;;  %v4652_v43 = vpop.f32.mrb[87].mxu0 }
 0x304   : > { %5769 = vst [vmem:[#allocation52_spill] sm:$0xff] %v4652_v43  ;;  %1540 = vmax.xlane.f32.xlu1 %v1539_v39  ;;  %v1542_v45 = vmax.f32 %v4648_v36, %v4652_v43 }
 0x306   : > { %1543 = vmax.xlane.f32.xlu0 %v1542_v45 }
 0x308   : > { %v4656_v53 = vpop.f32.mrb[88].mxu0 }
 0x309   : > { %5770 = vst [vmem:[#allocation53_spill] sm:$0xff] %v4656_v53  ;;  %v4658_v59 = vpop.f32.mrb[89].mxu0 }
 0x30a   : > { %5771 = vst [vmem:[#allocation54_spill] sm:$0xff] %v4658_v59  ;;  %v4660_v7 = vpop.f32.mrb[90].mxu0  ;;  %v1545_v10 = vmax.f32 %v4656_v53, %v4658_v59 }
 0x30b   : > { %5772 = vst [vmem:[#allocation55_spill] sm:$0xff] %v4660_v7  ;;  %v4664_v22 = vpop.f32.mrb[91].mxu0 }
 0x30c   : > { %5773 = vst [vmem:[#allocation56_spill] sm:$0xff] %v4664_v22  ;;  %1546 = vmax.xlane.f32.xlu1 %v1545_v10  ;;  %v1548_v37 = vmax.f32 %v4660_v7, %v4664_v22  ;;  %v4680_v10 = vld [vmem:[#allocation3] sm:$0xff] }
 0x30e   : > { %1549 = vmax.xlane.f32.xlu0 %v1548_v37  ;;  %v4682_v37 = vld [vmem:[#allocation3 + $0x8] sm:$0xff] }
 0x310   : > { %v4668_v39 = vpop.f32.mrb[92].mxu0 }
 0x311   : > { %5774 = vst [vmem:[#allocation57_spill] sm:$0xff] %v4668_v39  ;;  %v4670_v43 = vpop.f32.mrb[93].mxu0 }
 0x312   : > { %5775 = vst [vmem:[#allocation58_spill] sm:$0xff] %v4670_v43  ;;  %v4672_v45 = vpop.f32.mrb[94].mxu0  ;;  %v1551_v36 = vmax.f32 %v4668_v39, %v4670_v43  ;;  %v4715_v39 = vld [vmem:[#allocation3 + $0x20] sm:$0xff] }
 0x313   : > { %5776 = vst [vmem:[#allocation59_spill] sm:$0xff] %v4672_v45  ;;  %v4676_v33 = vpop.f32.mrb[95].mxu0 }
 0x314   : > { %5777 = vst [vmem:[#allocation60_spill] sm:$0xff] %v4676_v33  ;;  %v1554_v59 = vmax.f32 %v4672_v45, %v4676_v33  ;;  %1552 = vmax.xlane.f32.xlu1 %v1551_v36  ;;  %v4705_v33 = vld [vmem:[#allocation3 + $0x18] sm:$0xff] }
 0x316   : > { %1555 = vmax.xlane.f32.xlu0 %v1554_v59  ;;  %v4700_v59 = vld [vmem:[#allocation3 + $0x10] sm:$0xff] }
 0x329   : > { %v1463_v22 = vpop.xlane.xlu0 %1462 }
 0x32a   : > { %v4685_v7 = vmax.f32 %v4680_v10, %v1463_v22 }
 0x32b   : > { %v1466_v53 = vpop.xlane.xlu1 %1465 }
 0x32c   : > { %2743 = vst.msk [vmem:[#allocation3] sm:$0xff] %vm681_vm2, %v4685_v7  ;;  %v4692_v43 = vmax.f32 %v4682_v37, %v1466_v53  ;;  %1687 = vperm.xlu1 %3678, %v4685_v7  }
 0x32e   : > { %2744 = vst.msk [vmem:[#allocation3 + $0x8] sm:$0xff] %vm681_vm2, %v4692_v43  ;;  %1692 = vperm.xlu0 %3679, %v4692_v43  }
 0x331   : > { %v1469_v22 = vpop.xlane.xlu0 %1468 }
 0x332   : > { %v4703_v31 = vmax.f32 %v4700_v59, %v1469_v22 }
 0x334   : > { %2745 = vst.msk [vmem:[#allocation3 + $0x10] sm:$0xff] %vm681_vm2, %v4703_v31  ;;  %1697 = vperm.xlu1 %3678, %v4703_v31  }
 0x335   : > { %v1472_v36 = vpop.xlane.xlu0 %1471 }
 0x336   : > { %v4713_v45 = vmax.f32 %v4705_v33, %v1472_v36  ;;  %v4742_v36 = vld [vmem:[#allocation3 + $0x38] sm:$0xff] }
 0x338   : > { %2746 = vst.msk [vmem:[#allocation3 + $0x18] sm:$0xff] %vm681_vm2, %v4713_v45  ;;  %1702 = vperm.xlu1 %3678, %v4713_v45  }
 0x339   : > { %v1475_v53 = vpop.xlane.xlu1 %1474 }
 0x33a   : > { %v4725_v20 = vmax.f32 %v4715_v39, %v1475_v53  ;;  %v4739_v53 = vld [vmem:[#allocation3 + $0x30] sm:$0xff] }
 0x33b   : > { %v1478_v16 = vpop.xlane.xlu0 %1477 }
 0x33c   : > { %2747 = vst.msk [vmem:[#allocation3 + $0x20] sm:$0xff] %vm681_vm2, %v4725_v20  ;;  %v4732_v22 = vmax.f32 %v4722_v26, %v1478_v16  ;;  %1707 = vperm.xlu1 %3678, %v4725_v20  }
 0x33e   : > { %2748 = vst.msk [vmem:[#allocation3 + $0x28] sm:$0xff] %vm681_vm2, %v4732_v22 }
 0x340   : > { %1712 = vperm.xlu1 %3678, %v4732_v22  }
 0x341   : > { %v1481_v9 = vpop.xlane.xlu1 %1480 }
 0x342   : > { %v4745_v3 = vmax.f32 %v4739_v53, %v1481_v9  ;;  %v4759_v9 = vld [vmem:[#allocation3 + $0x40] sm:$0xff] }
 0x343   : > { %v1484_v16 = vpop.xlane.xlu0 %1483 }
 0x344   : > { %2749 = vst.msk [vmem:[#allocation3 + $0x30] sm:$0xff] %vm681_vm2, %v4745_v3  ;;  %v4752_v14 = vmax.f32 %v4742_v36, %v1484_v16  ;;  %1717 = vperm.xlu1 %3678, %v4745_v3  }
 0x346   : > { %2750 = vst.msk [vmem:[#allocation3 + $0x38] sm:$0xff] %vm681_vm2, %v4752_v14 }
 0x348   : > { %1722 = vperm.xlu1 %3678, %v4752_v14  }
 0x349   : > { %v1487_v57 = vpop.xlane.xlu1 %1486 }
 0x34a   : > { %v4765_v51 = vmax.f32 %v4759_v9, %v1487_v57  ;;  %v4779_v57 = vld [vmem:[#allocation3 + $0x50] sm:$0xff] }
 0x34b   : > { %v1490_v16 = vpop.xlane.xlu0 %1489 }
 0x34c   : > { %2751 = vst.msk [vmem:[#allocation3 + $0x40] sm:$0xff] %vm681_vm2, %v4765_v51  ;;  %v4772_v63 = vmax.f32 %v4762_v2, %v1490_v16  ;;  %1727 = vperm.xlu1 %3678, %v4765_v51  }
 0x34e   : > { %2752 = vst.msk [vmem:[#allocation3 + $0x48] sm:$0xff] %vm681_vm2, %v4772_v63 }
 0x350   : > { %1732 = vperm.xlu1 %3678, %v4772_v63  }
 0x351   : > { %v1493_v44 = vpop.xlane.xlu1 %1492 }
 0x352   : > { %v4785_v42 = vmax.f32 %v4779_v57, %v1493_v44  ;;  %v4800_v44 = vld [vmem:[#allocation3 + $0x60] sm:$0xff] }
 0x353   : > { %v1496_v16 = vpop.xlane.xlu0 %1495 }
 0x354   : > { %2753 = vst.msk [vmem:[#allocation3 + $0x50] sm:$0xff] %vm681_vm2, %v4785_v42  ;;  %v4792_v46 = vmax.f32 %v4782_v47, %v1496_v16  ;;  %1737 = vperm.xlu0 %3679, %v4785_v42  }
 0x356   : > { %2754 = vst.msk [vmem:[#allocation3 + $0x58] sm:$0xff] %vm681_vm2, %v4792_v46  ;;  %1742 = vperm.xlu1 %3678, %v4792_v46  }
 0x359   : > { %v1499_v38 = vpop.xlane.xlu1 %1498 }
 0x35a   : > { %v4805_v0 = vmax.f32 %v4800_v44, %v1499_v38  ;;  %v4820_v38 = vld [vmem:[#allocation3 + $0x70] sm:$0xff] }
 0x35b   : > { %v1502_v16 = vpop.xlane.xlu0 %1501 }
 0x35c   : > { %2755 = vst.msk [vmem:[#allocation3 + $0x60] sm:$0xff] %vm681_vm2, %v4805_v0  ;;  %v4812_v40 = vmax.f32 %v4802_v41, %v1502_v16  ;;  %1747 = vperm.xlu0 %3679, %v4805_v0  }
 0x35e   : > { %2756 = vst.msk [vmem:[#allocation3 + $0x68] sm:$0xff] %vm681_vm2, %v4812_v40  ;;  %1752 = vperm.xlu1 %3678, %v4812_v40  }
 0x361   : > { %v1505_v32 = vpop.xlane.xlu1 %1504 }
 0x362   : > { %v4825_v30 = vmax.f32 %v4820_v38, %v1505_v32  ;;  %v4840_v32 = vld [vmem:[#allocation3 + $0x80] sm:$0xff] }
 0x363   : > { %v1508_v16 = vpop.xlane.xlu0 %1507 }
 0x364   : > { %2757 = vst.msk [vmem:[#allocation3 + $0x70] sm:$0xff] %vm681_vm2, %v4825_v30  ;;  %v4832_v34 = vmax.f32 %v4822_v35, %v1508_v16  ;;  %1757 = vperm.xlu0 %3679, %v4825_v30  }
 0x366   : > { %2758 = vst.msk [vmem:[#allocation3 + $0x78] sm:$0xff] %vm681_vm2, %v4832_v34  ;;  %1762 = vperm.xlu1 %3678, %v4832_v34  }
 0x369   : > { %v1511_v27 = vpop.xlane.xlu1 %1510 }
 0x36a   : > { %v4845_v25 = vmax.f32 %v4840_v32, %v1511_v27  ;;  %v4860_v27 = vld [vmem:[#allocation3 + $0x90] sm:$0xff] }
 0x36b   : > { %v1514_v16 = vpop.xlane.xlu0 %1513 }
 0x36c   : > { %2759 = vst.msk [vmem:[#allocation3 + $0x80] sm:$0xff] %vm681_vm2, %v4845_v25  ;;  %v4852_v28 = vmax.f32 %v4842_v29, %v1514_v16  ;;  %1767 = vperm.xlu0 %3679, %v4845_v25  }
 0x36e   : > { %2760 = vst.msk [vmem:[#allocation3 + $0x88] sm:$0xff] %vm681_vm2, %v4852_v28  ;;  %1772 = vperm.xlu1 %3678, %v4852_v28  }
 0x371   : > { %v1517_v21 = vpop.xlane.xlu1 %1516 }
 0x372   : > { %v4865_v19 = vmax.f32 %v4860_v27, %v1517_v21  ;;  %v4880_v21 = vld [vmem:[#allocation3 + $0xa0] sm:$0xff] }
 0x373   : > { %v1520_v16 = vpop.xlane.xlu0 %1519 }
 0x374   : > { %2761 = vst.msk [vmem:[#allocation3 + $0x90] sm:$0xff] %vm681_vm2, %v4865_v19  ;;  %v4872_v23 = vmax.f32 %v4862_v24, %v1520_v16  ;;  %1777 = vperm.xlu0 %3679, %v4865_v19  }
 0x376   : > { %5779 = vst [vmem:[#allocation62_spill] sm:$0xff] %v4872_v23  ;;  %2762 = vst.msk [vmem:[#allocation3 + $0x98] sm:$0xff] %vm681_vm2, %v4872_v23  ;;  %1782 = vperm.xlu1 %3678, %v4872_v23  }
 0x379   : > { %v1523_v15 = vpop.xlane.xlu1 %1522 }
 0x37a   : > { %v4885_v13 = vmax.f32 %v4880_v21, %v1523_v15  ;;  %v4900_v15 = vld [vmem:[#allocation3 + $0xb0] sm:$0xff] }
 0x37b   : > { %v1526_v16 = vpop.xlane.xlu0 %1525 }
 0x37c   : > { %2763 = vst.msk [vmem:[#allocation3 + $0xa0] sm:$0xff] %vm681_vm2, %v4885_v13  ;;  %v4892_v17 = vmax.f32 %v4882_v18, %v1526_v16  ;;  %1787 = vperm.xlu0 %3679, %v4885_v13   ;;  %v4920_v18 = vld [vmem:[#allocation3 + $0xc8] sm:$0xff] }
 0x37d   : > { %5784 = vst [vmem:[#allocation67_spill] sm:$0xff] %v4920_v18 }
 0x37e   : > { %5781 = vst [vmem:[#allocation64_spill] sm:$0xff] %v4892_v17  ;;  %2764 = vst.msk [vmem:[#allocation3 + $0xa8] sm:$0xff] %vm681_vm2, %v4892_v17  ;;  %1792 = vperm.xlu1 %3678, %v4892_v17   ;;  %v4918_v17 = vld [vmem:[#allocation3 + $0xc0] sm:$0xff] }
 0x381   : > { %v1529_v8 = vpop.xlane.xlu1 %1528 }
 0x382   : > { %v4905_v6 = vmax.f32 %v4900_v15, %v1529_v8 }
 0x383   : > { %v1532_v16 = vpop.xlane.xlu0 %1531 }
 0x384   : > { %2765 = vst.msk [vmem:[#allocation3 + $0xb0] sm:$0xff] %vm681_vm2, %v4905_v6  ;;  %v4910_v5 = vmax.f32 %v4902_v12, %v1532_v16  ;;  %1797 = vperm.xlu0 %3679, %v4905_v6   ;;  %v4938_v12 = vld [vmem:[#allocation3 + $0xd8] sm:$0xff] }
 0x385   : > { %5787 = vst [vmem:[#allocation70_spill] sm:$0xff] %v4938_v12 }
 0x386   : > { %5783 = vst [vmem:[#allocation66_spill] sm:$0xff] %v4910_v5  ;;  %2766 = vst.msk [vmem:[#allocation3 + $0xb8] sm:$0xff] %vm681_vm2, %v4910_v5  ;;  %1802 = vperm.xlu1 %3678, %v4910_v5   ;;  %v4936_v5 = vld [vmem:[#allocation3 + $0xd0] sm:$0xff] }
 0x387   : > { %5786 = vst [vmem:[#allocation69_spill] sm:$0xff] %v4936_v5 }
 0x389   : > { %v1535_v8 = vpop.xlane.xlu1 %1534 }
 0x38a   : > { %v4923_v4 = vmax.f32 %v4918_v17, %v1535_v8 }
 0x38b   : > { %v1538_v16 = vpop.xlane.xlu0 %1537 }
 0x38c   : > { %2767 = vst.msk [vmem:[#allocation3 + $0xc0] sm:$0xff] %vm681_vm2, %v4923_v4  ;;  %v4928_v23 = vmax.f32 %v4920_v18, %v1538_v16  ;;  %1807 = vperm.xlu0 %3679, %v4923_v4  }
 0x38e   : > { %5785 = vst [vmem:[#allocation68_spill] sm:$0xff] %v4928_v23  ;;  %2768 = vst.msk [vmem:[#allocation3 + $0xc8] sm:$0xff] %vm681_vm2, %v4928_v23  ;;  %1812 = vperm.xlu1 %3678, %v4928_v23  }
 0x391   : > { %v1541_v8 = vpop.xlane.xlu1 %1540 }
 0x392   : > { %v4941_v24 = vmax.f32 %v4936_v5, %v1541_v8  ;;  %v5790_v8 = vsub.f32 %v4682_v37, %v4692_v43  ;;  %v4957_v5 = vld [vmem:[#allocation3 + $0xe8] sm:$0xff]  ;;  %v5792_v43 = vsub.f32 %v4715_v39, %v4725_v20  ;;  %v4985_v20 = vld [vmem:[#allocation3 + $0xf8] sm:$0xff] }
 0x393   : > { %v1544_v16 = vpop.xlane.xlu0 %1543 }
 0x394   : > { %5788 = vst [vmem:[#allocation71_spill] sm:$0xff] %v4941_v24  ;;  %2769 = vst.msk [vmem:[#allocation3 + $0xd0] sm:$0xff] %vm681_vm2, %v4941_v24  ;;  %v4946_v1 = vmax.f32 %v4938_v12, %v1544_v16  ;;  %1817 = vperm.xlu0 %3679, %v4941_v24   ;;  %v1623_v23 = vmul.f32 1.442695, %v5790_v8  ;;  %v5791_v16 = vsub.f32 %v4680_v10, %v4685_v7  ;;  %v1629_v37 = vmul.f32 1.442695, %v5792_v43 }
 0x395   : > { %v4980_v10 = vld [vmem:[#allocation3 + $0xf0] sm:$0xff] }
 0x396   : > { %5789 = vst [vmem:[#allocation72_spill] sm:$0xff] %v4946_v1  ;;  %2770 = vst.msk [vmem:[#allocation3 + $0xd8] sm:$0xff] %vm681_vm2, %v4946_v1  ;;  %1822 = vperm.xlu1 %3678, %v4946_v1   ;;  %v1621_v12 = vmul.f32 1.442695, %v5791_v16  ;;  %3684 = vpow2.f32 %v1623_v23  ;;  %v5794_v23 = vsub.f32 %v4739_v53, %v4745_v3  ;;  %v5796_v53 = vsub.f32 %v4759_v9, %v4765_v51 }
 0x397   : > { %v5799_v9 = vsub.f32 %v4762_v2, %v4772_v63 }
 0x398   : > { %3686 = vpow2.f32 %v1621_v12  ;;  %v5795_v12 = vsub.f32 %v4705_v33, %v4713_v45  ;;  %v1637_v43 = vmul.f32 1.442695, %v5796_v53  ;;  %v5797_v33 = vsub.f32 %v4722_v26, %v4732_v22 }
 0x399   : > { %v1547_v18 = vpop.xlane.xlu1 %1546  ;;  %3688 = vpow2.f32 %v1629_v37  ;;  %v1639_v26 = vmul.f32 1.442695, %v5799_v9  ;;  %v5853_v37 = vld [vmem:[#allocation28_spill] sm:$0xff] }
 0x39a   : > { %v4960_v62 = vmax.f32 %v4952_v11, %v1547_v18  ;;  %v5793_v18 = vsub.f32 %v4700_v59, %v4703_v31  ;;  %v1627_v16 = vmul.f32 1.442695, %v5795_v12  ;;  %v1631_v45 = vmul.f32 1.442695, %v5797_v33 }
 0x39b   : > { %v1550_v24 = vpop.xlane.xlu0 %1549 }
 0x39c   : > { %2771 = vst.msk [vmem:[#allocation3 + $0xe0] sm:$0xff] %vm681_vm2, %v4960_v62  ;;  %v4968_v1 = vmax.f32 %v4957_v5, %v1550_v24  ;;  %1827 = vperm.xlu0 %3679, %v4960_v62   ;;  %v1625_v7 = vmul.f32 1.442695, %v5793_v18  ;;  %v1633_v24 = vmul.f32 1.442695, %v5794_v23  ;;  %v5800_v23 = vsub.f32 %v4779_v57, %v4785_v42 }
 0x39e   : > { %2772 = vst.msk [vmem:[#allocation3 + $0xe8] sm:$0xff] %vm681_vm2, %v4968_v1  ;;  %1832 = vperm.xlu1 %3678, %v4968_v1   ;;  %3690 = vpow2.f32 %v1625_v7  ;;  %v5798_v7 = vsub.f32 %v4742_v36, %v4752_v14  ;;  %v5801_v14 = vsub.f32 %v4800_v44, %v4805_v0 }
 0x39f   : > { %3692 = vpow2.f32 %v1633_v24  ;;  %v1641_v24 = vmul.f32 1.442695, %v5800_v23 }
 0x3a0   : > { %v5012_v18 = vpop.eup %3684  ;;  %3694 = vpow2.f32 %v1627_v16  ;;  %v1635_v51 = vmul.f32 1.442695, %v5798_v7  ;;  %v1645_v63 = vmul.f32 1.442695, %v5801_v14  ;;  %v5804_v7 = vsub.f32 %v4802_v41, %v4812_v40 }
 0x3a1   : > { %v1553_v8 = vpop.xlane.xlu1 %1552  ;;  %3696 = vpow2.f32 %v1637_v43 }
 0x3a2   : > { %v4988_v39 = vmax.f32 %v4980_v10, %v1553_v8  ;;  %v5021_v22 = vpop.eup %3686  ;;  %3698 = vpow2.f32 %v1631_v45 }
 0x3a3   : > { %v1556_v31 = vpop.xlane.xlu0 %1555  ;;  %v5027_v8 = vpop.eup %3688  ;;  %3700 = vpow2.f32 %v1635_v51  ;;  %v1647_v51 = vmul.f32 1.442695, %v5804_v7 }
 0x3a4   : > { %2773 = vst.msk [vmem:[#allocation3 + $0xf0] sm:$0xff] %vm681_vm2, %v4988_v39  ;;  %v4998_v3 = vmax.f32 %v4985_v20, %v1556_v31  ;;  %1837 = vperm.xlu0 %3679, %v4988_v39   ;;  %3702 = vpow2.f32 %v1639_v26 }
 0x3a5   : > { %3704 = vpow2.f32 %v1641_v24 }
 0x3a6   : > { %2774 = vst.msk [vmem:[#allocation3 + $0xf8] sm:$0xff] %vm681_vm2, %v4998_v3  ;;  %1842 = vperm.xlu1 %3678, %v4998_v3   ;;  %3706 = vpow2.f32 %v1645_v63 }
 0x3a8   : > { %2301 = vperm.xlu0 %3679, %v5012_v18   ;;  %v5035_v42 = vpop.eup %3690 }
 0x3a9   : > { %v5040_v0 = vpop.eup %3692 }
 0x3aa   : > { %2296 = vperm.xlu1 %3678, %v5021_v22   ;;  %v5046_v45 = vpop.eup %3694 }
 0x3ab   : > { %v1688_v2 = vpop.permute.xlu1 %1687 }
 0x3ac   : > { %v1845_v36 = vsub.f32 %v4357_v48, %v1688_v2  ;;  %v1846_v12 = vsub.f32 %v4359_v49, %v1688_v2  ;;  %2316 = vperm.xlu0 %3679, %v5027_v8   ;;  %v5802_v48 = vsub.f32 %v4782_v47, %v4792_v46  ;;  %v5055_v46 = vpop.eup %3696  ;;  %v5805_v47 = vsub.f32 %v4840_v32, %v4845_v25 }
 0x3ad   : > { %v1693_v57 = vpop.permute.xlu0 %1692  ;;  %v5060_v23 = vpop.eup %3698  ;;  %v5806_v25 = vsub.f32 %v4822_v35, %v4832_v34 }
 0x3ae   : > { %v1909_v16 = vmul.f32 1.442695, %v1845_v36  ;;  %v1911_v31 = vmul.f32 1.442695, %v1846_v12  ;;  %v1847_v53 = vsub.f32 %v4361_v50, %v1693_v57  ;;  %v1848_v43 = vsub.f32 %v4365_v52, %v1693_v57  ;;  %2306 = vperm.xlu1 %3678, %v5035_v42   ;;  %v5065_v40 = vpop.eup %3700 }
 0x3af   : > { %v1643_v49 = vmul.f32 1.442695, %v5802_v48  ;;  %v5803_v50 = vsub.f32 %v4820_v38, %v4825_v30  ;;  %v1653_v9 = vmul.f32 1.442695, %v5805_v47  ;;  %v5067_v41 = vpop.eup %3702  ;;  %v1651_v32 = vmul.f32 1.442695, %v5806_v25 }
 0x3b0   : > { %3708 = vpow2.f32 %v1909_v16  ;;  %v1913_v44 = vmul.f32 1.442695, %v1847_v53  ;;  %v1915_v33 = vmul.f32 1.442695, %v1848_v43  ;;  %2326 = vperm.xlu0 %3679, %v5040_v0   ;;  %v5073_v63 = vpop.eup %3704  ;;  %v5810_v47 = vld [vmem:[#allocation7_spill] sm:$0xff] }
 0x3b1   : > { %v1649_v52 = vmul.f32 1.442695, %v5803_v50  ;;  %3710 = vpow2.f32 %v1911_v31  ;;  %v5081_v34 = vpop.eup %3706 }
 0x3b2   : > { %3712 = vpow2.f32 %v1913_v44  ;;  %2311 = vperm.xlu1 %3678, %v5046_v45  }
 0x3b3   : > { %3714 = vpow2.f32 %v1915_v33  ;;  %v1698_v26 = vpop.permute.xlu1 %1697  ;;  %v5809_v33 = vsub.f32 %v4842_v29, %v4852_v28 }
 0x3b4   : > { %3716 = vpow2.f32 %v1643_v49  ;;  %v1849_v30 = vsub.f32 %v4369_v54, %v1698_v26  ;;  %v1850_v38 = vsub.f32 %v4371_v55, %v1698_v26  ;;  %2336 = vperm.xlu0 %3679, %v5055_v46   ;;  %v5807_v54 = vsub.f32 %v4860_v27, %v4865_v19  ;;  %v5811_v26 = vld [vmem:[#allocation8_spill] sm:$0xff] }
 0x3b5   : > { %3718 = vpow2.f32 %v1649_v52  ;;  %v5808_v19 = vsub.f32 %v4880_v21, %v4885_v13  ;;  %v1655_v13 = vmul.f32 1.442695, %v5809_v33 }
 0x3b6   : > { %3720 = vpow2.f32 %v1647_v51  ;;  %v1917_v24 = vmul.f32 1.442695, %v1849_v30  ;;  %v1919_v14 = vmul.f32 1.442695, %v1850_v38  ;;  %2321 = vperm.xlu1 %3678, %v5060_v23   ;;  %v1657_v55 = vmul.f32 1.442695, %v5807_v54 }
 0x3b7   : > { %3722 = vpow2.f32 %v1653_v9  ;;  %v1703_v2 = vpop.permute.xlu1 %1702  ;;  %v1661_v27 = vmul.f32 1.442695, %v5808_v19  ;;  %v1613_v51 = vsub.f32 %v4918_v17, %v4923_v4 }
 0x3b8   : > { %3724 = vpow2.f32 %v1917_v24  ;;  %v1851_v36 = vsub.f32 %v4373_v56, %v1703_v2  ;;  %v1852_v12 = vsub.f32 %v4377_v58, %v1703_v2  ;;  %2346 = vperm.xlu0 %3679, %v5073_v63   ;;  %v1611_v56 = vsub.f32 %v4900_v15, %v4905_v6  ;;  %v5813_v24 = vld [vmem:[#allocation62_spill] sm:$0xff] }
 0x3b9   : > { %3726 = vpow2.f32 %v1919_v14  ;;  %v1669_v2 = vmul.f32 1.442695, %v1613_v51 }
 0x3ba   : > { %v3709_v35 = vpop.eup %3708  ;;  %3728 = vpow2.f32 %v1651_v32  ;;  %v1921_v57 = vmul.f32 1.442695, %v1851_v36  ;;  %v1923_v16 = vmul.f32 1.442695, %v1852_v12  ;;  %2331 = vperm.xlu1 %3678, %v5065_v40   ;;  %v1665_v7 = vmul.f32 1.442695, %v1611_v56 }
 0x3bb   : > { %v3711_v31 = vpop.eup %3710  ;;  %3730 = vpow2.f32 %v1657_v55  ;;  %v1708_v58 = vpop.permute.xlu1 %1707  ;;  %v5812_v32 = vld [vmem:[#allocation61_spill] sm:$0xff]  ;;  %v5815_v36 = vld [vmem:[#allocation71_spill] sm:$0xff] }
 0x3bc   : > { %v3713_v53 = vpop.eup %3712  ;;  %3732 = vpow2.f32 %v1921_v57  ;;  %v1853_v43 = vsub.f32 %v4381_v60, %v1708_v58  ;;  %v1854_v48 = vsub.f32 %v4383_v61, %v1708_v58  ;;  %2356 = vperm.xlu0 %3679, %v5081_v34   ;;  %v5092_v49 = vadd.f32 %v3711_v31, %v3709_v35  ;;  %v5816_v12 = vld [vmem:[#allocation69_spill] sm:$0xff] }
 0x3bd   : > { %v3715_v44 = vpop.eup %3714  ;;  %3734 = vpow2.f32 %v1923_v16  ;;  %v2486_v21 = vpack.c.bf16 %v3713_v53, %v3709_v35  ;;  %v5814_v4 = vsub.f32 %v5812_v32, %v5813_v24  ;;  %v1615_v35 = vsub.f32 %v5816_v12, %v5815_v36  ;;  %v5827_v12 = vld [vmem:[#allocation72_spill] sm:$0xff] }
 0x3be   : > { %v5097_v50 = vpop.eup %3716  ;;  %v1925_v6 = vmul.f32 1.442695, %v1853_v43  ;;  %v1927_v15 = vmul.f32 1.442695, %v1854_v48  ;;  %2341 = vperm.xlu1 %3678, %v5067_v41   ;;  %v2487_v60 = vpack.c.bf16 %v3715_v44, %v3711_v31  ;;  %v5100_v52 = vadd.f32 %v3715_v44, %v3713_v53  ;;  %v5817_v31 = vld [vmem:[#allocation9_spill] sm:$0xff]  ;;  %v5819_v48 = vld [vmem:[#allocation63_spill] sm:$0xff] }
 0x3bf   : > { %v5102_v61 = vpop.eup %3718  ;;  %3736 = vpow2.f32 %v1661_v27  ;;  %v1713_v28 = vpop.permute.xlu1 %1712  ;;  %v1659_v17 = vmul.f32 1.442695, %v5814_v4  ;;  %v5818_v27 = vld [vmem:[#allocation10_spill] sm:$0xff]  ;;  %v5820_v44 = vld [vmem:[#allocation64_spill] sm:$0xff] }
 0x3c0   : > { %v5106_v29 = vpop.eup %3720  ;;  %3738 = vpow2.f32 %v1925_v6  ;;  %v1855_v9 = vsub.f32 %v5810_v47, %v1713_v28  ;;  %v1856_v30 = vsub.f32 %v5811_v26, %v1713_v28  ;;  %2550 = vmatprep.mubr.bf16.mxu1 %v2487_v60  ;;  %2366 = vperm.xlu0 %3679, %v5102_v61   ;;  %v5821_v33 = vsub.f32 %v5819_v48, %v5820_v44  ;;  %v5822_v47 = vld [vmem:[#allocation11_spill] sm:$0xff]  ;;  %v5823_v26 = vld [vmem:[#allocation12_spill] sm:$0xff] }
 0x3c1   : > { %v5111_v38 = vpop.eup %3722  ;;  %3740 = vpow2.f32 %v1927_v15  ;;  %2551 = vmatmul.mubr.bf16.vlgmr.msra.gmra.mrb[32].mxu1 %v2486_v21  ;;  %v1673_v60 = vmul.f32 1.442695, %v1615_v35 }
 0x3c2   : > { %v3725_v25 = vpop.eup %3724  ;;  %3742 = vpow2.f32 %v1655_v13  ;;  %v1929_v14 = vmul.f32 1.442695, %v1855_v9  ;;  %v1931_v54 = vmul.f32 1.442695, %v1856_v30  ;;  %2351 = vperm.xlu1 %3678, %v5097_v50   ;;  %v1663_v13 = vmul.f32 1.442695, %v5821_v33 }
 0x3c3   : > { %v3727_v55 = vpop.eup %3726  ;;  %3744 = vpow2.f32 %v1665_v7  ;;  %v1718_v57 = vpop.permute.xlu1 %1717  ;;  %v1617_v7 = vsub.f32 %v4952_v11, %v4960_v62 }
 0x3c4   : > { %v5119_v16 = vpop.eup %3728  ;;  %3746 = vpow2.f32 %v1929_v14  ;;  %v1857_v19 = vsub.f32 %v5817_v31, %v1718_v57  ;;  %v1858_v56 = vsub.f32 %v5818_v27, %v1718_v57  ;;  %2376 = vperm.xlu0 %3679, %v5111_v38   ;;  %v5124_v58 = vadd.f32 %v3727_v55, %v3725_v25  ;;  %v5824_v14 = vld [vmem:[#allocation65_spill] sm:$0xff] }
 0x3c5   : > { %v5126_v53 = vpop.eup %3730  ;;  %3748 = vpow2.f32 %v1931_v54  ;;  %v5825_v54 = vld [vmem:[#allocation66_spill] sm:$0xff]  ;;  %v1677_v57 = vmul.f32 1.442695, %v1617_v7  ;;  %v5829_v27 = vld [vmem:[#allocation13_spill] sm:$0xff] }
 0x3c6   : > { %v3733_v43 = vpop.eup %3732  ;;  %3750 = vpow2.f32 %v1659_v17  ;;  %v1933_v21 = vmul.f32 1.442695, %v1857_v19  ;;  %v1935_v6 = vmul.f32 1.442695, %v1858_v56  ;;  %2361 = vperm.xlu1 %3678, %v5106_v29   ;;  %v5826_v62 = vsub.f32 %v5824_v14, %v5825_v54  ;;  %v5835_v14 = vld [vmem:[#allocation15_spill] sm:$0xff] }
 0x3c7   : > { %v3735_v15 = vpop.eup %3734  ;;  %3752 = vpow2.f32 %v1669_v2  ;;  %v1723_v51 = vpop.permute.xlu1 %1722  ;;  %v2488_v28 = vpack.c.bf16 %v3733_v43, %v3725_v25 }
 0x3c8   : > { %3754 = vpow2.f32 %v1933_v21  ;;  %v1859_v9 = vsub.f32 %v5822_v47, %v1723_v51  ;;  %v1860_v30 = vsub.f32 %v5823_v26, %v1723_v51  ;;  %2386 = vperm.xlu0 %3679, %v5126_v53   ;;  %v2489_v32 = vpack.c.bf16 %v3735_v15, %v3727_v55  ;;  %v5828_v55 = vld [vmem:[#allocation70_spill] sm:$0xff]  ;;  %v5832_v21 = vld [vmem:[#allocation67_spill] sm:$0xff] }
 0x3c9   : > { %v5137_v24 = vpop.eup %3736  ;;  %3756 = vpow2.f32 %v1935_v6  ;;  %v5139_v4 = vadd.f32 %v3735_v15, %v3733_v43  ;;  %v1667_v11 = vmul.f32 1.442695, %v5826_v62  ;;  %v1616_v35 = vsub.f32 %v5828_v55, %v5827_v12  ;;  %v5830_v43 = vld [vmem:[#allocation14_spill] sm:$0xff]  ;;  %v5833_v6 = vld [vmem:[#allocation68_spill] sm:$0xff] }
 0x3ca   : > { %v3739_v17 = vpop.eup %3738  ;;  %3758 = vpow2.f32 %v1663_v13  ;;  %v1937_v25 = vmul.f32 1.442695, %v1859_v9  ;;  %v1939_v2 = vmul.f32 1.442695, %v1860_v30  ;;  %2558 = vmatprep.mubr.bf16.mxu1 %v2489_v32  ;;  %2371 = vperm.xlu1 %3678, %v5119_v16   ;;  %v5834_v15 = vsub.f32 %v5832_v21, %v5833_v6  ;;  %v5836_v62 = vld [vmem:[#allocation16_spill] sm:$0xff] }
 0x3cb   : > { %v3741_v36 = vpop.eup %3740  ;;  %3760 = vpow2.f32 %v1673_v60  ;;  %2559 = vmatmul.mubr.bf16.gmra.mrb[36].mxu1 %v2488_v28  ;;  %v1728_v31 = vpop.permute.xlu1 %1727  ;;  %v1675_v47 = vmul.f32 1.442695, %v1616_v35  ;;  %v1618_v9 = vsub.f32 %v4957_v5, %v4968_v1 }
 0x3cc   : > { %v5147_v19 = vpop.eup %3742  ;;  %3762 = vpow2.f32 %v1937_v25  ;;  %v1861_v56 = vsub.f32 %v5829_v27, %v1728_v31  ;;  %v1862_v48 = vsub.f32 %v5830_v43, %v1728_v31  ;;  %2396 = vperm.xlu0 %3679, %v5137_v24   ;;  %v5152_v44 = vadd.f32 %v3741_v36, %v3739_v17 }
 0x3cd   : > { %v5154_v33 = vpop.eup %3744  ;;  %3764 = vpow2.f32 %v1939_v2  ;;  %v1671_v60 = vmul.f32 1.442695, %v5834_v15  ;;  %v1679_v35 = vmul.f32 1.442695, %v1618_v9 }
 0x3ce   : > { %5831 = vst [vmem:[#allocation7_spill] sm:$0xff] %v5154_v33  ;;  %v3747_v13 = vpop.eup %3746  ;;  %3766 = vpow2.f32 %v1667_v11  ;;  %v1941_v7 = vmul.f32 1.442695, %v1861_v56  ;;  %v1943_v51 = vmul.f32 1.442695, %v1862_v48  ;;  %2381 = vperm.xlu1 %3678, %v5147_v19   ;;  %v5839_v56 = vld [vmem:[#allocation18_spill] sm:$0xff] }
 0x3cf   : > { %v3749_v28 = vpop.eup %3748  ;;  %3768 = vpow2.f32 %v1677_v57  ;;  %v1733_v26 = vpop.permute.xlu1 %1732  ;;  %v2490_v30 = vpack.c.bf16 %v3747_v13, %v3739_v17 }
 0x3d0   : > { %v5162_v32 = vpop.eup %3750  ;;  %3770 = vpow2.f32 %v1941_v7  ;;  %v1863_v54 = vsub.f32 %v5835_v14, %v1733_v26  ;;  %v1864_v11 = vsub.f32 %v5836_v62, %v1733_v26  ;;  %2406 = vperm.xlu0 %3679, %v5154_v33   ;;  %v2491_v25 = vpack.c.bf16 %v3749_v28, %v3741_v36  ;;  %v5838_v36 = vld [vmem:[#allocation17_spill] sm:$0xff]  ;;  %v5841_v7 = vld [vmem:[#allocation19_spill] sm:$0xff] }
 0x3d1   : > { %v5167_v2 = vpop.eup %3752  ;;  %3772 = vpow2.f32 %v1943_v51  ;;  %v5169_v12 = vadd.f32 %v3749_v28, %v3747_v13  ;;  %v5842_v28 = vld [vmem:[#allocation20_spill] sm:$0xff] }
 0x3d2   : > { %5837 = vst [vmem:[#allocation8_spill] sm:$0xff] %v5167_v2  ;;  %v3755_v55 = vpop.eup %3754  ;;  %3774 = vpow2.f32 %v1671_v60  ;;  %v1945_v1 = vmul.f32 1.442695, %v1863_v54  ;;  %v1947_v5 = vmul.f32 1.442695, %v1864_v11  ;;  %2566 = vmatprep.mubr.bf16.mxu1 %v2491_v25  ;;  %2391 = vperm.xlu1 %3678, %v5162_v32  }
 0x3d3   : > { %v3757_v17 = vpop.eup %3756  ;;  %3776 = vpow2.f32 %v1675_v47  ;;  %2567 = vmatmul.mubr.bf16.gmra.mrb[40].mxu1 %v2490_v30  ;;  %v1738_v57 = vpop.permute.xlu0 %1737 }
 0x3d4   : > { %v5172_v31 = vpop.eup %3758  ;;  %3778 = vpow2.f32 %v1945_v1  ;;  %v1865_v27 = vsub.f32 %v5838_v36, %v1738_v57  ;;  %v1866_v43 = vsub.f32 %v5839_v56, %v1738_v57  ;;  %2416 = vperm.xlu0 %3679, %v5167_v2   ;;  %v5177_v48 = vadd.f32 %v3757_v17, %v3755_v55  ;;  %v5844_v57 = vld [vmem:[#allocation21_spill] sm:$0xff] }
 0x3d5   : > { %v5179_v13 = vpop.eup %3760  ;;  %3780 = vpow2.f32 %v1947_v5  ;;  %v1743_v21 = vpop.permute.xlu1 %1742 }
 0x3d6   : > { %5840 = vst [vmem:[#allocation61_spill] sm:$0xff] %v5179_v13  ;;  %v3763_v6 = vpop.eup %3762  ;;  %v1949_v15 = vmul.f32 1.442695, %v1865_v27  ;;  %v1951_v60 = vmul.f32 1.442695, %v1866_v43  ;;  %v1867_v51 = vsub.f32 %v5841_v7, %v1743_v21  ;;  %v1868_v47 = vsub.f32 %v5842_v28, %v1743_v21  ;;  %2401 = vperm.xlu1 %3678, %v5172_v31   ;;  %v5845_v27 = vld [vmem:[#allocation22_spill] sm:$0xff] }
 0x3d7   : > { %v3765_v9 = vpop.eup %3764  ;;  %3782 = vpow2.f32 %v1679_v35  ;;  %v2492_v26 = vpack.c.bf16 %v3763_v6, %v3755_v55  ;;  %v5847_v7 = vld [vmem:[#allocation23_spill] sm:$0xff]  ;;  %v5848_v28 = vld [vmem:[#allocation24_spill] sm:$0xff] }
 0x3d8   : > { %v5184_v30 = vpop.eup %3766  ;;  %3784 = vpow2.f32 %v1949_v15  ;;  %v1953_v14 = vmul.f32 1.442695, %v1867_v51  ;;  %v1955_v54 = vmul.f32 1.442695, %v1868_v47  ;;  %2426 = vperm.xlu0 %3679, %v5179_v13   ;;  %v2493_v62 = vpack.c.bf16 %v3765_v9, %v3757_v17 }
 0x3d9   : > { %v5187_v11 = vpop.eup %3768  ;;  %3786 = vpow2.f32 %v1951_v60  ;;  %v5189_v25 = vadd.f32 %v3765_v9, %v3763_v6 }
 0x3da   : > { %5843 = vst [vmem:[#allocation62_spill] sm:$0xff] %v5187_v11  ;;  %v3771_v1 = vpop.eup %3770  ;;  %3788 = vpow2.f32 %v1953_v14  ;;  %2574 = vmatprep.mubr.bf16.mxu1 %v2493_v62  ;;  %2411 = vperm.xlu1 %3678, %v5184_v30  }
 0x3db   : > { %v3773_v5 = vpop.eup %3772  ;;  %3790 = vpow2.f32 %v1955_v54  ;;  %2575 = vmatmul.mubr.bf16.gmra.mrb[44].mxu1 %v2492_v26  ;;  %v1748_v55 = vpop.permute.xlu0 %1747 }
 0x3dc   : > { %v5192_v35 = vpop.eup %3774  ;;  %v1869_v36 = vsub.f32 %v5844_v57, %v1748_v55  ;;  %v1870_v17 = vsub.f32 %v5845_v27, %v1748_v55  ;;  %2436 = vperm.xlu0 %3679, %v5187_v11   ;;  %v5197_v56 = vadd.f32 %v3773_v5, %v3771_v1 }
 0x3dd   : > { %v5199_v43 = vpop.eup %3776  ;;  %v1753_v21 = vpop.permute.xlu1 %1752 }
 0x3de   : > { %5846 = vst [vmem:[#allocation71_spill] sm:$0xff] %v5199_v43  ;;  %v3779_v6 = vpop.eup %3778  ;;  %v1957_v15 = vmul.f32 1.442695, %v1869_v36  ;;  %v1959_v60 = vmul.f32 1.442695, %v1870_v17  ;;  %v1871_v51 = vsub.f32 %v5847_v7, %v1753_v21  ;;  %v1872_v47 = vsub.f32 %v5848_v28, %v1753_v21  ;;  %2421 = vperm.xlu1 %3678, %v5192_v35   ;;  %v5851_v7 = vld [vmem:[#allocation26_spill] sm:$0xff] }
 0x3df   : > { %v3781_v9 = vpop.eup %3780  ;;  %v2494_v26 = vpack.c.bf16 %v3779_v6, %v3771_v1  ;;  %v5850_v1 = vld [vmem:[#allocation25_spill] sm:$0xff] }
 0x3e0   : > { %3792 = vpow2.f32 %v1957_v15  ;;  %v1961_v14 = vmul.f32 1.442695, %v1871_v51  ;;  %v1963_v54 = vmul.f32 1.442695, %v1872_v47  ;;  %v2495_v62 = vpack.c.bf16 %v3781_v9, %v3773_v5 }
 0x3e1   : > { %v5204_v55 = vpop.eup %3782  ;;  %3794 = vpow2.f32 %v1959_v60  ;;  %v5206_v57 = vadd.f32 %v3781_v9, %v3779_v6 }
 0x3e2   : > { %5849 = vst [vmem:[#allocation69_spill] sm:$0xff] %v5204_v55  ;;  %v3785_v27 = vpop.eup %3784  ;;  %3796 = vpow2.f32 %v1961_v14  ;;  %2582 = vmatprep.mubr.bf16.mxu1 %v2495_v62  ;;  %2431 = vperm.xlu1 %3678, %v5199_v43   ;;  %v5852_v14 = vld [vmem:[#allocation27_spill] sm:$0xff] }
 0x3e3   : > { %v3787_v36 = vpop.eup %3786  ;;  %3798 = vpow2.f32 %v1963_v54  ;;  %2583 = vmatmul.mubr.bf16.gmra.mrb[48].mxu1 %v2494_v26  ;;  %v1758_v17 = vpop.permute.xlu0 %1757 }
 0x3e4   : > { %v3789_v21 = vpop.eup %3788  ;;  %v1873_v15 = vsub.f32 %v5850_v1, %v1758_v17  ;;  %v1874_v51 = vsub.f32 %v5851_v7, %v1758_v17  ;;  %v5211_v5 = vadd.f32 %v3787_v36, %v3785_v27 }
 0x3e5   : > { %v3791_v28 = vpop.eup %3790  ;;  %v1763_v60 = vpop.permute.xlu1 %1762  ;;  %v2496_v6 = vpack.c.bf16 %v3789_v21, %v3785_v27 }
 0x3e6   : > { %v1965_v47 = vmul.f32 1.442695, %v1873_v15  ;;  %v1967_v9 = vmul.f32 1.442695, %v1874_v51  ;;  %v1875_v62 = vsub.f32 %v5852_v14, %v1763_v60  ;;  %v1876_v59 = vsub.f32 %v5853_v37, %v1763_v60  ;;  %2441 = vperm.xlu1 %3678, %v5204_v55   ;;  %v5854_v51 = vld [vmem:[#allocation29_spill] sm:$0xff]  ;;  %v5855_v37 = vld [vmem:[#allocation30_spill] sm:$0xff] }
 0x3e7   : > { %v2497_v26 = vpack.c.bf16 %v3791_v28, %v3787_v36  ;;  %v5216_v54 = vadd.f32 %v3791_v28, %v3789_v21 }
 0x3e8   : > { %3800 = vpow2.f32 %v1965_v47  ;;  %v1969_v1 = vmul.f32 1.442695, %v1875_v62  ;;  %v1971_v11 = vmul.f32 1.442695, %v1876_v59 }
 0x3e9   : > { %3802 = vpow2.f32 %v1967_v9  ;;  %2590 = vmatprep.mubr.bf16.mxu1 %v2497_v26  ;;  %v5856_v9 = vld [vmem:[#allocation31_spill] sm:$0xff]  ;;  %v5857_v26 = vld [vmem:[#allocation32_spill] sm:$0xff] }
 0x3ea   : > { %v3793_v17 = vpop.eup %3792  ;;  %3804 = vpow2.f32 %v1969_v1 }
 0x3eb   : > { %v3795_v7 = vpop.eup %3794  ;;  %3806 = vpow2.f32 %v1971_v11  ;;  %2591 = vmatmul.mubr.bf16.gmra.mrb[52].mxu1 %v2496_v6  ;;  %v1768_v27 = vpop.permute.xlu0 %1767 }
 0x3ec   : > { %v3797_v15 = vpop.eup %3796  ;;  %v1877_v14 = vsub.f32 %v5854_v51, %v1768_v27  ;;  %v1878_v60 = vsub.f32 %v5855_v37, %v1768_v27  ;;  %v5220_v13 = vadd.f32 %v3795_v7, %v3793_v17  ;;  %v5858_v37 = vld [vmem:[#allocation33_spill] sm:$0xff] }
 0x3ed   : > { %v3799_v36 = vpop.eup %3798  ;;  %v1773_v21 = vpop.permute.xlu1 %1772  ;;  %v2498_v28 = vpack.c.bf16 %v3797_v15, %v3793_v17 }
 0x3ee   : > { %v1973_v47 = vmul.f32 1.442695, %v1877_v14  ;;  %v1975_v59 = vmul.f32 1.442695, %v1878_v60  ;;  %v1879_v62 = vsub.f32 %v5856_v9, %v1773_v21  ;;  %v1880_v1 = vsub.f32 %v5857_v26, %v1773_v21  ;;  %v5859_v9 = vld [vmem:[#allocation34_spill] sm:$0xff]  ;;  %v5861_v26 = vld [vmem:[#allocation36_spill] sm:$0xff] }
 0x3ef   : > { %v2499_v55 = vpack.c.bf16 %v3799_v36, %v3795_v7  ;;  %v5224_v11 = vadd.f32 %v3799_v36, %v3797_v15 }
 0x3f0   : > { %3808 = vpow2.f32 %v1973_v47  ;;  %v1977_v6 = vmul.f32 1.442695, %v1879_v62  ;;  %v1979_v2 = vmul.f32 1.442695, %v1880_v1 }
 0x3f1   : > { %3810 = vpow2.f32 %v1975_v59  ;;  %2598 = vmatprep.mubr.bf16.mxu1 %v2499_v55  ;;  %v5860_v59 = vld [vmem:[#allocation35_spill] sm:$0xff] }
 0x3f2   : > { %v3801_v27 = vpop.eup %3800  ;;  %3812 = vpow2.f32 %v1977_v6 }
 0x3f3   : > { %v3803_v51 = vpop.eup %3802  ;;  %3814 = vpow2.f32 %v1979_v2  ;;  %2599 = vmatmul.mubr.bf16.gmra.mrb[56].mxu1 %v2498_v28  ;;  %v1778_v17 = vpop.permute.xlu0 %1777 }
 0x3f4   : > { %v3805_v14 = vpop.eup %3804  ;;  %v1881_v60 = vsub.f32 %v5858_v37, %v1778_v17  ;;  %v1882_v43 = vsub.f32 %v5859_v9, %v1778_v17  ;;  %v5228_v21 = vadd.f32 %v3803_v51, %v3801_v27 }
 0x3f5   : > { %v3807_v7 = vpop.eup %3806  ;;  %v1783_v15 = vpop.permute.xlu1 %1782  ;;  %v2500_v36 = vpack.c.bf16 %v3805_v14, %v3801_v27 }
 0x3f6   : > { %v1981_v47 = vmul.f32 1.442695, %v1881_v60  ;;  %v1983_v62 = vmul.f32 1.442695, %v1882_v43  ;;  %v1883_v55 = vsub.f32 %v5860_v59, %v1783_v15  ;;  %v1884_v1 = vsub.f32 %v5861_v26, %v1783_v15  ;;  %v5862_v60 = vld [vmem:[#allocation37_spill] sm:$0xff]  ;;  %v5863_v15 = vld [vmem:[#allocation38_spill] sm:$0xff] }
 0x3f7   : > { %v2501_v6 = vpack.c.bf16 %v3807_v7, %v3803_v51  ;;  %v5232_v2 = vadd.f32 %v3807_v7, %v3805_v14  ;;  %v5864_v26 = vld [vmem:[#allocation39_spill] sm:$0xff] }
 0x3f8   : > { %3816 = vpow2.f32 %v1981_v47  ;;  %v1985_v28 = vmul.f32 1.442695, %v1883_v55  ;;  %v1987_v33 = vmul.f32 1.442695, %v1884_v1 }
 0x3f9   : > { %3818 = vpow2.f32 %v1983_v62  ;;  %2606 = vmatprep.mubr.bf16.mxu1 %v2501_v6  ;;  %v5865_v6 = vld [vmem:[#allocation40_spill] sm:$0xff] }
 0x3fa   : > { %v3809_v17 = vpop.eup %3808  ;;  %3820 = vpow2.f32 %v1985_v28 }
 0x3fb   : > { %v3811_v37 = vpop.eup %3810  ;;  %3822 = vpow2.f32 %v1987_v33  ;;  %2607 = vmatmul.mubr.bf16.gmra.mrb[60].mxu1 %v2500_v36  ;;  %2102 = vadd.xlane.f32.xlu0 %v5092_v49  ;;  %v1788_v43 = vpop.permute.xlu0 %1787 }
 0x3fc   : > { %v3813_v27 = vpop.eup %3812  ;;  %v1885_v9 = vsub.f32 %v5862_v60, %v1788_v43  ;;  %v1886_v51 = vsub.f32 %v5863_v15, %v1788_v43  ;;  %v5237_v14 = vadd.f32 %v3811_v37, %v3809_v17 }
 0x3fd   : > { %v3815_v7 = vpop.eup %3814  ;;  %v1793_v47 = vpop.permute.xlu1 %1792  ;;  %v2502_v59 = vpack.c.bf16 %v3813_v27, %v3809_v17 }
 0x3fe   : > { %v1989_v62 = vmul.f32 1.442695, %v1885_v9  ;;  %v1991_v55 = vmul.f32 1.442695, %v1886_v51  ;;  %v1887_v1 = vsub.f32 %v5864_v26, %v1793_v47  ;;  %v1888_v33 = vsub.f32 %v5865_v6, %v1793_v47  ;;  %v5866_v51 = vld [vmem:[#allocation41_spill] sm:$0xff]  ;;  %v5868_v6 = vld [vmem:[#allocation43_spill] sm:$0xff] }
 0x3ff   : > { %2108 = vadd.xlane.f32.xlu0 %v5124_v58  ;;  %v2503_v49 = vpack.c.bf16 %v3815_v7, %v3811_v37  ;;  %v5242_v36 = vadd.f32 %v3815_v7, %v3813_v27  ;;  %v5867_v58 = vld [vmem:[#allocation42_spill] sm:$0xff] }
 0x400   : > { %3824 = vpow2.f32 %v1989_v62  ;;  %v1993_v28 = vmul.f32 1.442695, %v1887_v1  ;;  %v1995_v60 = vmul.f32 1.442695, %v1888_v33 }
 0x401   : > { %3826 = vpow2.f32 %v1991_v55  ;;  %2614 = vmatprep.mubr.bf16.mxu1 %v2503_v49  ;;  %v5869_v49 = vld [vmem:[#allocation44_spill] sm:$0xff] }
 0x402   : > { %v3817_v43 = vpop.eup %3816  ;;  %3828 = vpow2.f32 %v1993_v28 }
 0x403   : > { %v3819_v15 = vpop.eup %3818  ;;  %3830 = vpow2.f32 %v1995_v60  ;;  %2615 = vmatmul.mubr.bf16.gmra.mrb[64].mxu1 %v2502_v59  ;;  %2111 = vadd.xlane.f32.xlu0 %v5139_v4  ;;  %v1798_v17 = vpop.permute.xlu0 %1797 }
 0x404   : > { %v3821_v9 = vpop.eup %3820  ;;  %v1889_v47 = vsub.f32 %v5866_v51, %v1798_v17  ;;  %v1890_v37 = vsub.f32 %v5867_v58, %v1798_v17  ;;  %v5247_v27 = vadd.f32 %v3819_v15, %v3817_v43 }
 0x405   : > { %v3823_v7 = vpop.eup %3822  ;;  %v1803_v62 = vpop.permute.xlu1 %1802  ;;  %v2504_v26 = vpack.c.bf16 %v3821_v9, %v3817_v43 }
 0x406   : > { %v1997_v55 = vmul.f32 1.442695, %v1889_v47  ;;  %v1999_v1 = vmul.f32 1.442695, %v1890_v37  ;;  %v1891_v33 = vsub.f32 %v5868_v6, %v1803_v62  ;;  %v1892_v28 = vsub.f32 %v5869_v49, %v1803_v62  ;;  %v5872_v49 = vld [vmem:[#allocation47_spill] sm:$0xff] }
 0x407   : > { %2117 = vadd.xlane.f32.xlu0 %v5169_v12  ;;  %v2505_v4 = vpack.c.bf16 %v3823_v7, %v3819_v15  ;;  %v5252_v59 = vadd.f32 %v3823_v7, %v3821_v9  ;;  %v5870_v12 = vld [vmem:[#allocation45_spill] sm:$0xff]  ;;  %v5871_v9 = vld [vmem:[#allocation46_spill] sm:$0xff] }
 0x408   : > { %3832 = vpow2.f32 %v1997_v55  ;;  %v2001_v60 = vmul.f32 1.442695, %v1891_v33  ;;  %v2003_v51 = vmul.f32 1.442695, %v1892_v28  ;;  %v5873_v28 = vld [vmem:[#allocation48_spill] sm:$0xff] }
 0x409   : > { %3834 = vpow2.f32 %v1999_v1  ;;  %2622 = vmatprep.mubr.bf16.mxu1 %v2505_v4 }
 0x40a   : > { %v3825_v17 = vpop.eup %3824  ;;  %3836 = vpow2.f32 %v2001_v60  ;;  %2105 = vadd.xlane.f32.xlu1 %v5100_v52 }
 0x40b   : > { %v3827_v43 = vpop.eup %3826  ;;  %3838 = vpow2.f32 %v2003_v51  ;;  %2623 = vmatmul.mubr.bf16.gmra.mrb[68].mxu1 %v2504_v26  ;;  %2123 = vadd.xlane.f32.xlu0 %v5189_v25  ;;  %v1808_v47 = vpop.permute.xlu0 %1807 }
 0x40c   : > { %v3829_v58 = vpop.eup %3828  ;;  %v1893_v15 = vsub.f32 %v5870_v12, %v1808_v47  ;;  %v1894_v37 = vsub.f32 %v5871_v9, %v1808_v47  ;;  %v5258_v7 = vadd.f32 %v3827_v43, %v3825_v17 }
 0x40d   : > { %v3831_v62 = vpop.eup %3830  ;;  %v1813_v55 = vpop.permute.xlu1 %1812  ;;  %v2506_v1 = vpack.c.bf16 %v3829_v58, %v3825_v17 }
 0x40e   : > { %v2005_v6 = vmul.f32 1.442695, %v1893_v15  ;;  %v2007_v33 = vmul.f32 1.442695, %v1894_v37  ;;  %v1895_v52 = vsub.f32 %v5872_v49, %v1813_v55  ;;  %v1896_v4 = vsub.f32 %v5873_v28, %v1813_v55  ;;  %2114 = vadd.xlane.f32.xlu1 %v5152_v44  ;;  %v5876_v49 = vld [vmem:[#allocation51_spill] sm:$0xff] }
 0x40f   : > { %2129 = vadd.xlane.f32.xlu0 %v5206_v57  ;;  %v2507_v25 = vpack.c.bf16 %v3831_v62, %v3827_v43  ;;  %v5264_v26 = vadd.f32 %v3831_v62, %v3829_v58  ;;  %v5874_v57 = vld [vmem:[#allocation49_spill] sm:$0xff]  ;;  %v5875_v58 = vld [vmem:[#allocation50_spill] sm:$0xff] }
 0x410   : > { %3840 = vpow2.f32 %v2005_v6  ;;  %v2009_v60 = vmul.f32 1.442695, %v1895_v52  ;;  %v2011_v51 = vmul.f32 1.442695, %v1896_v4  ;;  %v5877_v52 = vld [vmem:[#allocation52_spill] sm:$0xff] }
 0x411   : > { %3842 = vpow2.f32 %v2007_v33  ;;  %2630 = vmatprep.mubr.bf16.mxu1 %v2507_v25 }
 0x412   : > { %v3833_v47 = vpop.eup %3832  ;;  %3844 = vpow2.f32 %v2009_v60  ;;  %2120 = vadd.xlane.f32.xlu1 %v5177_v48 }
 0x413   : > { %v3835_v17 = vpop.eup %3834  ;;  %3846 = vpow2.f32 %v2011_v51  ;;  %2631 = vmatmul.mubr.bf16.gmra.mrb[72].mxu1 %v2506_v1  ;;  %2135 = vadd.xlane.f32.xlu0 %v5216_v54  ;;  %v1818_v44 = vpop.permute.xlu0 %1817 }
 0x414   : > { %v3837_v12 = vpop.eup %3836  ;;  %v1897_v43 = vsub.f32 %v5874_v57, %v1818_v44  ;;  %v1898_v15 = vsub.f32 %v5875_v58, %v1818_v44  ;;  %v5270_v9 = vadd.f32 %v3835_v17, %v3833_v47  ;;  %v5879_v44 = vld [vmem:[#allocation54_spill] sm:$0xff] }
 0x415   : > { %v3839_v37 = vpop.eup %3838  ;;  %v1823_v62 = vpop.permute.xlu1 %1822  ;;  %v2508_v55 = vpack.c.bf16 %v3837_v12, %v3833_v47 }
 0x416   : > { %v2013_v6 = vmul.f32 1.442695, %v1897_v43  ;;  %v2015_v33 = vmul.f32 1.442695, %v1898_v15  ;;  %v1899_v48 = vsub.f32 %v5876_v49, %v1823_v62  ;;  %v1900_v28 = vsub.f32 %v5877_v52, %v1823_v62  ;;  %2126 = vadd.xlane.f32.xlu1 %v5197_v56 }
 0x417   : > { %2141 = vadd.xlane.f32.xlu0 %v5224_v11  ;;  %v2509_v54 = vpack.c.bf16 %v3839_v37, %v3835_v17  ;;  %v5276_v1 = vadd.f32 %v3839_v37, %v3837_v12  ;;  %v5878_v11 = vld [vmem:[#allocation53_spill] sm:$0xff] }
 0x418   : > { %3848 = vpow2.f32 %v2013_v6  ;;  %v2017_v4 = vmul.f32 1.442695, %v1899_v48  ;;  %v2019_v25 = vmul.f32 1.442695, %v1900_v28  ;;  %v5880_v6 = vld [vmem:[#allocation55_spill] sm:$0xff] }
 0x419   : > { %3850 = vpow2.f32 %v2015_v33  ;;  %2638 = vmatprep.mubr.bf16.mxu1 %v2509_v54  ;;  %v5881_v33 = vld [vmem:[#allocation56_spill] sm:$0xff] }
 0x41a   : > { %v3841_v60 = vpop.eup %3840  ;;  %3852 = vpow2.f32 %v2017_v4  ;;  %2132 = vadd.xlane.f32.xlu1 %v5211_v5 }
 0x41b   : > { %v3843_v51 = vpop.eup %3842  ;;  %3854 = vpow2.f32 %v2019_v25  ;;  %2639 = vmatmul.mubr.bf16.gmra.mrb[76].mxu1 %v2508_v55  ;;  %2147 = vadd.xlane.f32.xlu0 %v5232_v2  ;;  %v1828_v56 = vpop.permute.xlu0 %1827  ;;  %v5882_v25 = vld [vmem:[#allocation57_spill] sm:$0xff] }
 0x41c   : > { %v3845_v47 = vpop.eup %3844  ;;  %v1901_v17 = vsub.f32 %v5878_v11, %v1828_v56  ;;  %v1902_v12 = vsub.f32 %v5879_v44, %v1828_v56  ;;  %v5282_v57 = vadd.f32 %v3843_v51, %v3841_v60 }
 0x41d   : > { %v3847_v43 = vpop.eup %3846  ;;  %v1833_v58 = vpop.permute.xlu1 %1832  ;;  %v2510_v15 = vpack.c.bf16 %v3845_v47, %v3841_v60  ;;  %v5883_v60 = vld [vmem:[#allocation58_spill] sm:$0xff] }
 0x41e   : > { %v2021_v37 = vmul.f32 1.442695, %v1901_v17  ;;  %v2023_v62 = vmul.f32 1.442695, %v1902_v12  ;;  %v1903_v5 = vsub.f32 %v5880_v6, %v1833_v58  ;;  %v1904_v49 = vsub.f32 %v5881_v33, %v1833_v58  ;;  %2138 = vadd.xlane.f32.xlu1 %v5220_v13 }
 0x41f   : > { %2153 = vadd.xlane.f32.xlu0 %v5242_v36  ;;  %v2511_v2 = vpack.c.bf16 %v3847_v43, %v3843_v51  ;;  %v2176_v55 = vadd.f32 %v3847_v43, %v3845_v47  ;;  %v5884_v43 = vld [vmem:[#allocation59_spill] sm:$0xff] }
 0x420   : > { %3856 = vpow2.f32 %v2021_v37  ;;  %v2025_v48 = vmul.f32 1.442695, %v1903_v5  ;;  %v2027_v52 = vmul.f32 1.442695, %v1904_v49 }
 0x421   : > { %3858 = vpow2.f32 %v2023_v62  ;;  %2646 = vmatprep.mubr.bf16.mxu1 %v2511_v2 }
 0x422   : > { %v3849_v28 = vpop.eup %3848  ;;  %3860 = vpow2.f32 %v2025_v48  ;;  %2144 = vadd.xlane.f32.xlu1 %v5228_v21  ;;  %v5885_v21 = vld [vmem:[#allocation60_spill] sm:$0xff] }
 0x423   : > { %v3851_v54 = vpop.eup %3850  ;;  %3862 = vpow2.f32 %v2027_v52  ;;  %2647 = vmatmul.mubr.bf16.gmra.mrb[80].mxu1 %v2510_v15  ;;  %2159 = vadd.xlane.f32.xlu0 %v5252_v59  ;;  %v1838_v4 = vpop.permute.xlu0 %1837 }
 0x424   : > { %v3853_v13 = vpop.eup %3852  ;;  %v1905_v36 = vsub.f32 %v5882_v25, %v1838_v4  ;;  %v1906_v51 = vsub.f32 %v5883_v60, %v1838_v4  ;;  %v2179_v56 = vadd.f32 %v3851_v54, %v3849_v28 }
 0x425   : > { %v3855_v47 = vpop.eup %3854  ;;  %v1843_v11 = vpop.permute.xlu1 %1842  ;;  %v2512_v17 = vpack.c.bf16 %v3853_v13, %v3849_v28 }
 0x426   : > { %v2029_v44 = vmul.f32 1.442695, %v1905_v36  ;;  %v2031_v12 = vmul.f32 1.442695, %v1906_v51  ;;  %v1907_v58 = vsub.f32 %v5884_v43, %v1843_v11  ;;  %v1908_v37 = vsub.f32 %v5885_v21, %v1843_v11  ;;  %2150 = vadd.xlane.f32.xlu1 %v5237_v14 }
 0x427   : > { %2165 = vadd.xlane.f32.xlu0 %v5264_v26  ;;  %v2513_v59 = vpack.c.bf16 %v3855_v47, %v3851_v54  ;;  %v2182_v15 = vadd.f32 %v3855_v47, %v3853_v13  ;;  %v5300_v25 = vpop.permute.xlu0 %2301  ;;  %v5886_v51 = vsub.f32 %v4980_v10, %v4988_v39 }
 0x428   : > { %3864 = vpow2.f32 %v2029_v44  ;;  %v2033_v62 = vmul.f32 1.442695, %v1907_v58  ;;  %v2035_v6 = vmul.f32 1.442695, %v1908_v37 }
 0x429   : > { %3866 = vpow2.f32 %v2031_v12  ;;  %2654 = vmatprep.mubr.bf16.mxu1 %v2513_v59  ;;  %v1681_v47 = vmul.f32 1.442695, %v5886_v51 }
 0x42a   : > { %v3857_v5 = vpop.eup %3856  ;;  %3868 = vpow2.f32 %v2033_v62  ;;  %2156 = vadd.xlane.f32.xlu1 %v5247_v27 }
 0x42b   : > { %v3859_v33 = vpop.eup %3858  ;;  %3870 = vpow2.f32 %v2035_v6  ;;  %2655 = vmatmul.mubr.bf16.gmra.mrb[84].mxu1 %v2512_v17  ;;  %2171 = vadd.xlane.f32.xlu0 %v5276_v1 }
 0x42c   : > { %v3861_v49 = vpop.eup %3860  ;;  %v2185_v14 = vadd.f32 %v3859_v33, %v3857_v5  ;;  %3872 = vpow2.f32 %v1681_v47  ;;  %v2040_v47 = vld [vmem:[#allocation4 + $0x18] sm:$0xff] }
 0x42d   : > { %v3863_v2 = vpop.eup %3862  ;;  %v2514_v26 = vpack.c.bf16 %v3861_v49, %v3857_v5 }
 0x42e   : > { %2162 = vadd.xlane.f32.xlu1 %v5258_v7  ;;  %v2515_v48 = vpack.c.bf16 %v3863_v2, %v3859_v33  ;;  %v2188_v52 = vadd.f32 %v3863_v2, %v3861_v49 }
 0x42f   : > { %2177 = vadd.xlane.f32.xlu0 %v2176_v55  ;;  %v5303_v55 = vpop.permute.xlu1 %2296 }
 0x430   : > { %2662 = vmatprep.mubr.bf16.mxu1 %v2515_v48 }
 0x432   : > { %v3865_v28 = vpop.eup %3864  ;;  %2168 = vadd.xlane.f32.xlu1 %v5270_v9  ;;  %v5305_v9 = vpop.permute.xlu0 %2316 }
 0x433   : > { %v3867_v54 = vpop.eup %3866  ;;  %2663 = vmatmul.mubr.bf16.gmra.mrb[88].mxu1 %v2514_v26  ;;  %2183 = vadd.xlane.f32.xlu0 %v2182_v15  ;;  %v5307_v60 = vpop.permute.xlu1 %2306 }
 0x434   : > { %v3869_v27 = vpop.eup %3868  ;;  %v2191_v4 = vadd.f32 %v3867_v54, %v3865_v28 }
 0x435   : > { %v3871_v13 = vpop.eup %3870  ;;  %v2516_v1 = vpack.c.bf16 %v3869_v27, %v3865_v28 }
 0x436   : > { %2174 = vadd.xlane.f32.xlu1 %v5282_v57  ;;  %v2517_v36 = vpack.c.bf16 %v3871_v13, %v3867_v54  ;;  %v2194_v7 = vadd.f32 %v3871_v13, %v3869_v27  ;;  %v5312_v11 = vpop.permute.xlu0 %2326  ;;  %v5887_v57 = vsub.f32 %v4985_v20, %v4998_v3  ;;  %v5325_v58 = vpop.eup %3872  ;;  %v2037_v54 = vld [vmem:[#allocation4] sm:$0xff] }
 0x437   : > { %2189 = vadd.xlane.f32.xlu0 %v2188_v52  ;;  %v5317_v44 = vpop.permute.xlu1 %2311 }
 0x438   : > { %2670 = vmatprep.mubr.bf16.mxu1 %v2517_v36  ;;  %v1683_v17 = vmul.f32 1.442695, %v5887_v57 }
 0x43a   : > { %2180 = vadd.xlane.f32.xlu1 %v2179_v56  ;;  %3874 = vpow2.f32 %v1683_v17  ;;  %v5319_v56 = vpop.permute.xlu0 %2336 }
 0x43b   : > { %2671 = vmatmul.mubr.bf16.gmra.mrb[92].mxu1 %v2516_v1  ;;  %2195 = vadd.xlane.f32.xlu0 %v2194_v7  ;;  %v5321_v12 = vpop.permute.xlu1 %2321  ;;  %v2039_v1 = vld [vmem:[#allocation4 + $0x10] sm:$0xff] }
 0x43c   : > { %v2071_v7 = vmul.f32 %v5035_v42, %v2039_v1 }
 0x43e   : > { %2186 = vadd.xlane.f32.xlu1 %v2185_v14  ;;  %v5323_v43 = vpop.permute.xlu0 %2346 }
 0x43f   : > { %v5327_v10 = vpop.permute.xlu1 %2331 }
 0x442   : > { %2192 = vadd.xlane.f32.xlu1 %v2191_v4  ;;  %v5333_v20 = vpop.permute.xlu0 %2356  ;;  %v2069_v4 = vmul.f32 %v5021_v22, %v2037_v54  ;;  %v2262_v54 = vld [vmem:[#allocation5] sm:$0xff] }
 0x443   : > { %v5335_v3 = vpop.permute.xlu1 %2341 }
 0x444   : > { %v5330_v39 = vpop.eup %3874 }
 0x446   : > { %v5337_v21 = vpop.permute.xlu0 %2366 }
 0x447   : > { %v5339_v37 = vpop.permute.xlu1 %2351 }
 0x44a   : > { %v5341_v59 = vpop.permute.xlu0 %2376 }
 0x44b   : > { %v5343_v15 = vpop.permute.xlu1 %2361 }
 0x44e   : > { %v5345_v62 = vpop.permute.xlu0 %2386 }
 0x44f   : > { %v5347_v6 = vpop.permute.xlu1 %2371 }
 0x451   : > { %2446 = vperm.xlu0 %3679, %v5325_v58  }
 0x452   : > { %v5349_v5 = vpop.permute.xlu0 %2396 }
 0x453   : > { %2451 = vperm.xlu1 %3678, %v5330_v39   ;;  %v5351_v33 = vpop.permute.xlu1 %2381 }
 0x456   : > { %v5353_v49 = vpop.permute.xlu0 %2406 }
 0x457   : > { %5888 = vst [vmem:[#allocation9_spill] sm:$0xff] %v5353_v49  ;;  %v5355_v14 = vpop.permute.xlu1 %2391 }
 0x45a   : > { %v5357_v2 = vpop.permute.xlu0 %2416 }
 0x45b   : > { %5889 = vst [vmem:[#allocation10_spill] sm:$0xff] %v5357_v2  ;;  %v5359_v26 = vpop.permute.xlu1 %2401 }
 0x45c   : > { %5890 = vst [vmem:[#allocation63_spill] sm:$0xff] %v5359_v26 }
 0x45e   : > { %v5361_v48 = vpop.permute.xlu0 %2426 }
 0x45f   : > { %5891 = vst [vmem:[#allocation64_spill] sm:$0xff] %v5361_v48  ;;  %v5363_v52 = vpop.permute.xlu1 %2411 }
 0x460   : > { %5892 = vst [vmem:[#allocation11_spill] sm:$0xff] %v5363_v52 }
 0x462   : > { %v5365_v28 = vpop.permute.xlu0 %2436 }
 0x463   : > { %5893 = vst [vmem:[#allocation12_spill] sm:$0xff] %v5365_v28  ;;  %v5367_v27 = vpop.permute.xlu1 %2421  ;;  %v2072_v28 = vmul.f32 %v5046_v45, %v2040_v47  ;;  %v2454_v45 = vmul.f32 %v5303_v55, %v2262_v54  ;;  %v2046_v55 = vld [vmem:[#allocation4 + $0x48] sm:$0xff] }
 0x464   : > { %5894 = vst [vmem:[#allocation65_spill] sm:$0xff] %v5367_v27  ;;  %v2042_v27 = vld [vmem:[#allocation4 + $0x28] sm:$0xff] }
 0x465   : > { %v2074_v42 = vmul.f32 %v5060_v23, %v2042_v27  ;;  %v2041_v27 = vld [vmem:[#allocation4 + $0x20] sm:$0xff] }
 0x467   : > { %v5372_v57 = vpop.permute.xlu1 %2431 }
 0x468   : > { %5895 = vst [vmem:[#allocation66_spill] sm:$0xff] %v5372_v57 }
 0x46b   : > { %v5376_v52 = vpop.permute.xlu1 %2441 }
 0x46c   : > { %5896 = vst [vmem:[#allocation72_spill] sm:$0xff] %v5376_v52 }
 0x488   : > { %v2103_v13 = vpop.xlane.xlu0 %2102 }
 0x489   : > { %v2197_v36 = vadd.f32 %v2103_v13, %v2069_v4  ;;  %v2038_v4 = vld [vmem:[#allocation4 + $0x8] sm:$0xff] }
 0x48a   : > { %v2070_v57 = vmul.f32 %v5012_v18, %v2038_v4  ;;  %v2073_v18 = vmul.f32 %v5027_v8, %v2041_v27 }
 0x48b   : > { %2230 = vst.msk [vmem:[#allocation4] sm:$0xff] %vm681_vm2, %v2197_v36  ;;  %v2044_v36 = vld [vmem:[#allocation4 + $0x38] sm:$0xff] }
 0x48c   : > { %v2109_v51 = vpop.xlane.xlu0 %2108  ;;  %v2076_v23 = vmul.f32 %v5065_v40, %v2044_v36  ;;  %v2078_v40 = vmul.f32 %v5067_v41, %v2046_v55  ;;  %v2043_v36 = vld [vmem:[#allocation4 + $0x30] sm:$0xff] }
 0x48d   : > { %v2199_v17 = vadd.f32 %v2109_v51, %v2071_v7  ;;  %v2263_v7 = vld [vmem:[#allocation5 + $0x8] sm:$0xff]  ;;  %v2075_v8 = vmul.f32 %v5040_v0, %v2043_v36 }
 0x48e   : > { %v2455_v52 = vmul.f32 %v5300_v25, %v2263_v7  ;;  %v2048_v7 = vld [vmem:[#allocation4 + $0x58] sm:$0xff] }
 0x48f   : > { %2232 = vst.msk [vmem:[#allocation4 + $0x10] sm:$0xff] %vm681_vm2, %v2199_v17 }
 0x490   : > { %v2112_v48 = vpop.xlane.xlu0 %2111 }
 0x491   : > { %v2200_v2 = vadd.f32 %v2112_v48, %v2072_v28 }
 0x492   : > { %v2778_v22 = vld [vmem:[#allocation4] sm:$0xff] }
 0x493   : > { %3876 = vrcp.f32 %v2778_v22  ;;  %2233 = vst.msk [vmem:[#allocation4 + $0x18] sm:$0xff] %vm681_vm2, %v2200_v2 }
 0x494   : > { %v3474_v13 = vpop.f32.mrb[32].mxu1  ;;  %v2118_v1 = vpop.xlane.xlu0 %2117 }
 0x495   : > { %v3475_v51 = vpop.f32.mrb[33].mxu1  ;;  %v2202_v17 = vadd.f32 %v2118_v1, %v2074_v42 }
 0x496   : > { %v2780_v47 = vld [vmem:[#allocation4 + $0x10] sm:$0xff]  ;;  %v3476_v48 = vadd.f32 %v3475_v51, %v3474_v13  ;;  %v3477_v28 = vpop.f32.mrb[34].mxu1 }
 0x497   : > { %3878 = vrcp.f32 %v2780_v47  ;;  %2235 = vst.msk [vmem:[#allocation4 + $0x28] sm:$0xff] %vm681_vm2, %v2202_v17  ;;  %v3478_v2 = vpop.f32.mrb[35].mxu1  ;;  %v2106_v22 = vpop.xlane.xlu1 %2105  ;;  %v2264_v17 = vld [vmem:[#allocation5 + $0x10] sm:$0xff] }
 0x498   : > { %v2679_v49 = vadd.f32 %v3476_v48, %v2454_v45  ;;  %v3479_v26 = vadd.f32 %v3478_v2, %v3477_v28  ;;  %v2198_v42 = vadd.f32 %v2106_v22, %v2070_v57  ;;  %v2124_v1 = vpop.xlane.xlu0 %2123  ;;  %v2080_v48 = vmul.f32 %v5097_v50, %v2048_v7 }
 0x499   : > { %v2204_v54 = vadd.f32 %v2124_v1, %v2076_v23  ;;  %v2456_v28 = vmul.f32 %v5307_v60, %v2264_v17 }
 0x49a   : > { %2711 = vst.msk [vmem:[#allocation5] sm:$0xff] %vm438_vm0, %v2679_v49  ;;  %v2680_v13 = vadd.f32 %v3479_v26, %v2455_v52  ;;  %v2045_v26 = vld [vmem:[#allocation4 + $0x40] sm:$0xff]  ;;  %v2265_v52 = vld [vmem:[#allocation5 + $0x18] sm:$0xff] }
 0x49b   : > { %2231 = vst.msk [vmem:[#allocation4 + $0x8] sm:$0xff] %vm681_vm2, %v2198_v42  ;;  %2237 = vst.msk [vmem:[#allocation4 + $0x38] sm:$0xff] %vm681_vm2, %v2204_v54  ;;  %v2115_v4 = vpop.xlane.xlu1 %2114  ;;  %v2050_v42 = vld [vmem:[#allocation4 + $0x68] sm:$0xff]  ;;  %v2077_v0 = vmul.f32 %v5055_v46, %v2045_v26  ;;  %v2049_v26 = vld [vmem:[#allocation4 + $0x60] sm:$0xff] }
 0x49c   : > { %2712 = vst.msk [vmem:[#allocation5 + $0x8] sm:$0xff] %vm438_vm0, %v2680_v13  ;;  %v2201_v25 = vadd.f32 %v2115_v4, %v2073_v18  ;;  %v2130_v57 = vpop.xlane.xlu0 %2129  ;;  %v2457_v18 = vmul.f32 %v5317_v44, %v2265_v52  ;;  %v2781_v4 = vld [vmem:[#allocation4 + $0x18] sm:$0xff]  ;;  %v2082_v36 = vmul.f32 %v5106_v29, %v2050_v42  ;;  %v2266_v44 = vld [vmem:[#allocation5 + $0x20] sm:$0xff]  ;;  %v2267_v52 = vld [vmem:[#allocation5 + $0x28] sm:$0xff] }
 0x49d   : > { %v3877_v51 = vpop.eup %3876  ;;  %v2206_v45 = vadd.f32 %v2130_v57, %v2078_v40  ;;  %v2054_v42 = vld [vmem:[#allocation4 + $0x88] sm:$0xff] }
 0x49e   : > { %2234 = vst.msk [vmem:[#allocation4 + $0x20] sm:$0xff] %vm681_vm2, %v2201_v25  ;;  %v3480_v49 = vpop.f32.mrb[36].mxu1  ;;  %2877 = vperm.xlu0 %3679, %v3877_v51   ;;  %v2047_v25 = vld [vmem:[#allocation4 + $0x50] sm:$0xff]  ;;  %v2052_v51 = vld [vmem:[#allocation4 + $0x78] sm:$0xff] }
 0x49f   : > { %2239 = vst.msk [vmem:[#allocation4 + $0x48] sm:$0xff] %vm681_vm2, %v2206_v45  ;;  %v3481_v41 = vpop.f32.mrb[37].mxu1  ;;  %v2121_v47 = vpop.xlane.xlu1 %2120  ;;  %v2079_v29 = vmul.f32 %v5073_v63, %v2047_v25  ;;  %v2081_v63 = vmul.f32 %v5081_v34, %v2049_v26  ;;  %v2056_v25 = vld [vmem:[#allocation4 + $0x98] sm:$0xff] }
 0x4a0   : > { %v3482_v2 = vadd.f32 %v3481_v41, %v3480_v49  ;;  %v3483_v22 = vpop.f32.mrb[38].mxu1  ;;  %v2203_v23 = vadd.f32 %v2121_v47, %v2075_v8  ;;  %v2136_v27 = vpop.xlane.xlu0 %2135  ;;  %v2783_v49 = vld [vmem:[#allocation4 + $0x28] sm:$0xff] }
 0x4a1   : > { %v3879_v1 = vpop.eup %3878  ;;  %v3484_v54 = vpop.f32.mrb[39].mxu1  ;;  %v2208_v13 = vadd.f32 %v2136_v27, %v2080_v48  ;;  %v2084_v48 = vmul.f32 %v5119_v16, %v2052_v51 }
 0x4a2   : > { %v2779_v55 = vld [vmem:[#allocation4 + $0x8] sm:$0xff]  ;;  %v2681_v40 = vadd.f32 %v3482_v2, %v2456_v28  ;;  %2236 = vst.msk [vmem:[#allocation4 + $0x30] sm:$0xff] %vm681_vm2, %v2203_v23  ;;  %v3485_v50 = vadd.f32 %v3484_v54, %v3483_v22  ;;  %2887 = vperm.xlu0 %3679, %v3879_v1   ;;  %v2458_v28 = vmul.f32 %v5305_v9, %v2266_v44  ;;  %v2053_v44 = vld [vmem:[#allocation4 + $0x80] sm:$0xff] }
 0x4a3   : > { %3880 = vrcp.f32 %v2779_v55  ;;  %2241 = vst.msk [vmem:[#allocation4 + $0x58] sm:$0xff] %vm681_vm2, %v2208_v13  ;;  %v2127_v60 = vpop.xlane.xlu1 %2126  ;;  %v2459_v13 = vmul.f32 %v5321_v12, %v2267_v52  ;;  %v2268_v12 = vld [vmem:[#allocation5 + $0x30] sm:$0xff] }
 0x4a4   : > { %2713 = vst.msk [vmem:[#allocation5 + $0x10] sm:$0xff] %vm438_vm0, %v2681_v40  ;;  %v2682_v57 = vadd.f32 %v3485_v50, %v2457_v18  ;;  %v2205_v7 = vadd.f32 %v2127_v60, %v2077_v0  ;;  %v2142_v46 = vpop.xlane.xlu0 %2141  ;;  %3882 = vrcp.f32 %v2781_v4  ;;  %v2785_v0 = vld [vmem:[#allocation4 + $0x38] sm:$0xff]  ;;  %v2086_v4 = vmul.f32 %v5147_v19, %v2054_v42  ;;  %v2051_v40 = vld [vmem:[#allocation4 + $0x70] sm:$0xff] }
 0x4a5   : > { %v2782_v17 = vld [vmem:[#allocation4 + $0x20] sm:$0xff]  ;;  %v2210_v45 = vadd.f32 %v2142_v46, %v2082_v36  ;;  %v2083_v51 = vmul.f32 %v5102_v61, %v2051_v40  ;;  %v2460_v52 = vmul.f32 %v5312_v11, %v2268_v12 }
 0x4a6   : > { %3884 = vrcp.f32 %v2782_v17  ;;  %2714 = vst.msk [vmem:[#allocation5 + $0x18] sm:$0xff] %vm438_vm0, %v2682_v57  ;;  %v3486_v8 = vpop.f32.mrb[40].mxu1  ;;  %v2787_v46 = vld [vmem:[#allocation4 + $0x48] sm:$0xff] }
 0x4a7   : > { %2238 = vst.msk [vmem:[#allocation4 + $0x40] sm:$0xff] %vm681_vm2, %v2205_v7  ;;  %2243 = vst.msk [vmem:[#allocation4 + $0x68] sm:$0xff] %vm681_vm2, %v2210_v45  ;;  %v3487_v41 = vpop.f32.mrb[41].mxu1  ;;  %v2133_v47 = vpop.xlane.xlu1 %2132  ;;  %3886 = vrcp.f32 %v2783_v49  ;;  %v2269_v45 = vld [vmem:[#allocation5 + $0x38] sm:$0xff] }
 0x4a8   : > { %v3488_v2 = vadd.f32 %v3487_v41, %v3486_v8  ;;  %v3489_v22 = vpop.f32.mrb[42].mxu1  ;;  %v2207_v23 = vadd.f32 %v2133_v47, %v2079_v29  ;;  %v2148_v27 = vpop.xlane.xlu0 %2147  ;;  %v2088_v29 = vmul.f32 %v5162_v32, %v2056_v25  ;;  %v2461_v42 = vmul.f32 %v5327_v10, %v2269_v45  ;;  %v2060_v10 = vld [vmem:[#allocation4 + $0xb8] sm:$0xff]  ;;  %v2271_v25 = vld [vmem:[#allocation5 + $0x48] sm:$0xff] }
 0x4a9   : > { %v2784_v1 = vld [vmem:[#allocation4 + $0x30] sm:$0xff]  ;;  %v3490_v55 = vpop.f32.mrb[43].mxu1  ;;  %v2212_v54 = vadd.f32 %v2148_v27, %v2084_v48  ;;  %v2085_v27 = vmul.f32 %v5111_v38, %v2053_v44 }
 0x4aa   : > { %3888 = vrcp.f32 %v2784_v1  ;;  %v2683_v18 = vadd.f32 %v3488_v2, %v2458_v28  ;;  %2240 = vst.msk [vmem:[#allocation4 + $0x50] sm:$0xff] %vm681_vm2, %v2207_v23  ;;  %v3491_v16 = vadd.f32 %v3490_v55, %v3489_v22  ;;  %v2058_v2 = vld [vmem:[#allocation4 + $0xa8] sm:$0xff]  ;;  %v2789_v1 = vld [vmem:[#allocation4 + $0x58] sm:$0xff] }
 0x4ab   : > { %2245 = vst.msk [vmem:[#allocation4 + $0x78] sm:$0xff] %vm681_vm2, %v2212_v54  ;;  %v2139_v9 = vpop.xlane.xlu1 %2138  ;;  %3890 = vrcp.f32 %v2785_v0 }
 0x4ac   : > { %2715 = vst.msk [vmem:[#allocation5 + $0x20] sm:$0xff] %vm438_vm0, %v2683_v18  ;;  %v2684_v60 = vadd.f32 %v3491_v16, %v2459_v13  ;;  %v2209_v36 = vadd.f32 %v2139_v9, %v2081_v63  ;;  %v2154_v34 = vpop.xlane.xlu0 %2153  ;;  %v2090_v63 = vmul.f32 %v5172_v31, %v2058_v2  ;;  %v2055_v13 = vld [vmem:[#allocation4 + $0x90] sm:$0xff]  ;;  %v2270_v9 = vld [vmem:[#allocation5 + $0x40] sm:$0xff] }
 0x4ad   : > { %v3881_v50 = vpop.eup %3880  ;;  %v2214_v7 = vadd.f32 %v2154_v34, %v2086_v4  ;;  %v2059_v2 = vld [vmem:[#allocation4 + $0xb0] sm:$0xff] }
 0x4ae   : > { %v2786_v57 = vld [vmem:[#allocation4 + $0x40] sm:$0xff]  ;;  %2882 = vperm.xlu1 %3678, %v3881_v50   ;;  %2716 = vst.msk [vmem:[#allocation5 + $0x28] sm:$0xff] %vm438_vm0, %v2684_v60  ;;  %v3492_v19 = vpop.f32.mrb[44].mxu1  ;;  %v3883_v17 = vpop.eup %3882  ;;  %v2791_v50 = vld [vmem:[#allocation4 + $0x68] sm:$0xff]  ;;  %v2087_v60 = vmul.f32 %v5126_v53, %v2055_v13  ;;  %v2273_v13 = vld [vmem:[#allocation5 + $0x58] sm:$0xff] }
 0x4af   : > { %3892 = vrcp.f32 %v2786_v57  ;;  %2242 = vst.msk [vmem:[#allocation4 + $0x60] sm:$0xff] %vm681_vm2, %v2209_v36  ;;  %2247 = vst.msk [vmem:[#allocation4 + $0x88] sm:$0xff] %vm681_vm2, %v2214_v7  ;;  %v3493_v49 = vpop.f32.mrb[45].mxu1  ;;  %v2145_v8 = vpop.xlane.xlu1 %2144  ;;  %v2057_v36 = vld [vmem:[#allocation4 + $0xa0] sm:$0xff]  ;;  %v2092_v7 = vmul.f32 %v5184_v30, %v2060_v10 }
 0x4b0   : > { %v3885_v26 = vpop.eup %3884  ;;  %v3494_v41 = vadd.f32 %v3493_v49, %v3492_v19  ;;  %v3495_v47 = vpop.f32.mrb[46].mxu1  ;;  %v2211_v48 = vadd.f32 %v2145_v8, %v2083_v51  ;;  %3894 = vrcp.f32 %v2787_v46  ;;  %v2462_v19 = vmul.f32 %v5319_v56, %v2270_v9  ;;  %v2062_v49 = vld [vmem:[#allocation4 + $0xc8] sm:$0xff] }
 0x4b1   : > { %v2160_v28 = vpop.xlane.xlu0 %2159  ;;  %v2788_v22 = vld [vmem:[#allocation4 + $0x50] sm:$0xff]  ;;  %v3496_v61 = vpop.f32.mrb[47].mxu1  ;;  %2897 = vperm.xlu0 %3679, %v3885_v26   ;;  %v2089_v26 = vmul.f32 %v5137_v24, %v2057_v36 }
 0x4b2   : > { %v2216_v23 = vadd.f32 %v2160_v28, %v2088_v29  ;;  %2892 = vperm.xlu1 %3678, %v3883_v17   ;;  %3896 = vrcp.f32 %v2788_v22  ;;  %v2685_v32 = vadd.f32 %v3494_v41, %v2460_v52  ;;  %2244 = vst.msk [vmem:[#allocation4 + $0x70] sm:$0xff] %vm681_vm2, %v2211_v48  ;;  %v3497_v11 = vadd.f32 %v3496_v61, %v3495_v47  ;;  %v3887_v55 = vpop.eup %3886  ;;  %v2793_v41 = vld [vmem:[#allocation4 + $0x78] sm:$0xff] }
 0x4b3   : > { %v2151_v54 = vpop.xlane.xlu1 %2150  ;;  %3898 = vrcp.f32 %v2789_v1  ;;  %v2463_v52 = vmul.f32 %v5335_v3, %v2271_v25  ;;  %v2094_v28 = vmul.f32 %v5192_v35, %v2062_v49  ;;  %v2064_v3 = vld [vmem:[#allocation4 + $0xd8] sm:$0xff]  ;;  %v2063_v49 = vld [vmem:[#allocation4 + $0xd0] sm:$0xff] }
 0x4b4   : > { %2249 = vst.msk [vmem:[#allocation4 + $0x98] sm:$0xff] %vm681_vm2, %v2216_v23  ;;  %v3889_v0 = vpop.eup %3888  ;;  %v2686_v18 = vadd.f32 %v3497_v11, %v2461_v42  ;;  %v2213_v38 = vadd.f32 %v2151_v54, %v2085_v27  ;;  %v2272_v27 = vld [vmem:[#allocation5 + $0x50] sm:$0xff]  ;;  %v5897_v11 = vld [vmem:[#allocation7_spill] sm:$0xff] }
 0x4b5   : > { %2717 = vst.msk [vmem:[#allocation5 + $0x30] sm:$0xff] %vm438_vm0, %v2685_v32  ;;  %v2166_v16 = vpop.xlane.xlu0 %2165  ;;  %2907 = vperm.xlu0 %3679, %v3889_v0   ;;  %v3891_v34 = vpop.eup %3890  ;;  %v2061_v54 = vld [vmem:[#allocation4 + $0xc0] sm:$0xff]  ;;  %v2464_v9 = vmul.f32 %v5323_v43, %v2272_v27 }
 0x4b6   : > { %v2790_v4 = vld [vmem:[#allocation4 + $0x60] sm:$0xff]  ;;  %v2218_v40 = vadd.f32 %v2166_v16, %v2090_v63  ;;  %2902 = vperm.xlu1 %3678, %v3887_v55   ;;  %2718 = vst.msk [vmem:[#allocation5 + $0x38] sm:$0xff] %vm438_vm0, %v2686_v18  ;;  %v3498_v31 = vpop.f32.mrb[48].mxu1  ;;  %v2795_v32 = vld [vmem:[#allocation4 + $0x88] sm:$0xff]  ;;  %v2091_v55 = vmul.f32 %v5897_v11, %v2059_v2 }
 0x4b7   : > { %3900 = vrcp.f32 %v2790_v4  ;;  %2246 = vst.msk [vmem:[#allocation4 + $0x80] sm:$0xff] %vm681_vm2, %v2213_v38  ;;  %v3499_v12 = vpop.f32.mrb[49].mxu1  ;;  %v2157_v57 = vpop.xlane.xlu1 %2156  ;;  %v5898_v38 = vld [vmem:[#allocation71_spill] sm:$0xff] }
 0x4b8   : > { %2251 = vst.msk [vmem:[#allocation4 + $0xa8] sm:$0xff] %vm681_vm2, %v2218_v40  ;;  %v3500_v51 = vadd.f32 %v3499_v12, %v3498_v31  ;;  %v3501_v44 = vpop.f32.mrb[50].mxu1  ;;  %v2215_v17 = vadd.f32 %v2157_v57, %v2087_v60  ;;  %3902 = vrcp.f32 %v2791_v50  ;;  %v2096_v16 = vmul.f32 %v5898_v38, %v2064_v3  ;;  %v2066_v60 = vld [vmem:[#allocation4 + $0xe8] sm:$0xff]  ;;  %v2065_v2 = vld [vmem:[#allocation4 + $0xe0] sm:$0xff] }
 0x4b9   : > { %v3893_v46 = vpop.eup %3892  ;;  %v2172_v45 = vpop.xlane.xlu0 %2171  ;;  %v2792_v8 = vld [vmem:[#allocation4 + $0x70] sm:$0xff]  ;;  %v5899_v12 = vld [vmem:[#allocation8_spill] sm:$0xff] }
 0x4ba   : > { %v3502_v53 = vpop.f32.mrb[51].mxu1  ;;  %v2220_v29 = vadd.f32 %v2172_v45, %v2092_v7  ;;  %2917 = vperm.xlu0 %3679, %v3893_v46   ;;  %2912 = vperm.xlu1 %3678, %v3891_v34   ;;  %3904 = vrcp.f32 %v2792_v8  ;;  %v2687_v30 = vadd.f32 %v3500_v51, %v2462_v19  ;;  %2248 = vst.msk [vmem:[#allocation4 + $0x90] sm:$0xff] %vm681_vm2, %v2215_v17  ;;  %v3895_v47 = vpop.eup %3894  ;;  %v5900_v17 = vld [vmem:[#allocation69_spill] sm:$0xff] }
 0x4bb   : > { %v3503_v56 = vadd.f32 %v3502_v53, %v3501_v44  ;;  %v2163_v48 = vpop.xlane.xlu1 %2162  ;;  %3906 = vrcp.f32 %v2793_v41  ;;  %v2093_v57 = vmul.f32 %v5899_v12, %v2061_v54  ;;  %v2465_v7 = vmul.f32 %v5339_v37, %v2273_v13  ;;  %v2797_v46 = vld [vmem:[#allocation4 + $0x98] sm:$0xff] }
 0x4bc   : > { %2253 = vst.msk [vmem:[#allocation4 + $0xb8] sm:$0xff] %vm681_vm2, %v2220_v29  ;;  %v3897_v22 = vpop.eup %3896  ;;  %v2217_v24 = vadd.f32 %v2163_v48, %v2089_v26  ;;  %v2098_v45 = vmul.f32 %v5900_v17, %v2066_v60  ;;  %v2068_v37 = vld [vmem:[#allocation4 + $0xf8] sm:$0xff]  ;;  %v5901_v48 = vld [vmem:[#allocation61_spill] sm:$0xff] }
 0x4bd   : > { %2719 = vst.msk [vmem:[#allocation5 + $0x40] sm:$0xff] %vm438_vm0, %v2687_v30  ;;  %v2688_v61 = vadd.f32 %v3503_v56, %v2463_v52  ;;  %v2178_v23 = vpop.xlane.xlu0 %2177  ;;  %v3899_v63 = vpop.eup %3898  ;;  %v2274_v52 = vld [vmem:[#allocation5 + $0x60] sm:$0xff]  ;;  %v2100_v3 = vmul.f32 %v5330_v39, %v2068_v37  ;;  %v5902_v13 = vld [vmem:[#allocation62_spill] sm:$0xff] }
 0x4be   : > { %v2794_v42 = vld [vmem:[#allocation4 + $0x80] sm:$0xff]  ;;  %v2222_v1 = vadd.f32 %v2178_v23, %v2094_v28  ;;  %2927 = vperm.xlu0 %3679, %v3897_v22   ;;  %2922 = vperm.xlu1 %3678, %v3895_v47   ;;  %2250 = vst.msk [vmem:[#allocation4 + $0xa0] sm:$0xff] %vm681_vm2, %v2217_v24  ;;  %v3504_v35 = vpop.f32.mrb[52].mxu1  ;;  %v2095_v28 = vmul.f32 %v5901_v48, %v2063_v49  ;;  %v2277_v12 = vld [vmem:[#allocation5 + $0x78] sm:$0xff] }
 0x4bf   : > { %3908 = vrcp.f32 %v2794_v42  ;;  %2720 = vst.msk [vmem:[#allocation5 + $0x48] sm:$0xff] %vm438_vm0, %v2688_v61  ;;  %v3505_v0 = vpop.f32.mrb[53].mxu1  ;;  %v2169_v18 = vpop.xlane.xlu1 %2168  ;;  %v2799_v56 = vld [vmem:[#allocation4 + $0xa8] sm:$0xff]  ;;  %v2466_v42 = vmul.f32 %v5333_v20, %v2274_v52  ;;  %v2469_v49 = vmul.f32 %v5347_v6, %v2277_v12  ;;  %v2278_v37 = vld [vmem:[#allocation5 + $0x80] sm:$0xff] }
 0x4c0   : > { %2255 = vst.msk [vmem:[#allocation4 + $0xc8] sm:$0xff] %vm681_vm2, %v2222_v1  ;;  %v3506_v4 = vadd.f32 %v3505_v0, %v3504_v35  ;;  %v3507_v40 = vpop.f32.mrb[54].mxu1  ;;  %v2219_v50 = vadd.f32 %v2169_v18, %v2091_v55  ;;  %3910 = vrcp.f32 %v2795_v32  ;;  %v2275_v61 = vld [vmem:[#allocation5 + $0x68] sm:$0xff]  ;;  %v2097_v0 = vmul.f32 %v5902_v13, %v2065_v2 }
 0x4c1   : > { %v3901_v10 = vpop.eup %3900  ;;  %v2184_v31 = vpop.xlane.xlu0 %2183  ;;  %v2796_v36 = vld [vmem:[#allocation4 + $0x90] sm:$0xff]  ;;  %v2467_v18 = vmul.f32 %v5343_v15, %v2275_v61 }
 0x4c2   : > { %v3508_v34 = vpop.f32.mrb[55].mxu1  ;;  %v2224_v25 = vadd.f32 %v2184_v31, %v2096_v16  ;;  %2937 = vperm.xlu0 %3679, %v3901_v10   ;;  %2932 = vperm.xlu1 %3678, %v3899_v63   ;;  %3912 = vrcp.f32 %v2796_v36  ;;  %v2689_v19 = vadd.f32 %v3506_v4, %v2464_v9  ;;  %2252 = vst.msk [vmem:[#allocation4 + $0xb0] sm:$0xff] %vm681_vm2, %v2219_v50  ;;  %v3903_v51 = vpop.eup %3902  ;;  %v2067_v9 = vld [vmem:[#allocation4 + $0xf0] sm:$0xff] }
 0x4c3   : > { %v3509_v43 = vadd.f32 %v3508_v34, %v3507_v40  ;;  %v2175_v44 = vpop.xlane.xlu1 %2174  ;;  %3914 = vrcp.f32 %v2797_v46  ;;  %v2801_v38 = vld [vmem:[#allocation4 + $0xb8] sm:$0xff]  ;;  %v2276_v31 = vld [vmem:[#allocation5 + $0x70] sm:$0xff]  ;;  %v2099_v34 = vmul.f32 %v5325_v58, %v2067_v9 }
 0x4c4   : > { %2257 = vst.msk [vmem:[#allocation4 + $0xd8] sm:$0xff] %vm681_vm2, %v2224_v25  ;;  %v3905_v8 = vpop.eup %3904  ;;  %v2221_v29 = vadd.f32 %v2175_v44, %v2093_v57 }
 0x4c5   : > { %2721 = vst.msk [vmem:[#allocation5 + $0x50] sm:$0xff] %vm438_vm0, %v2689_v19  ;;  %v2690_v53 = vadd.f32 %v3509_v43, %v2465_v7  ;;  %v2190_v26 = vpop.xlane.xlu0 %2189  ;;  %v2798_v41 = vld [vmem:[#allocation4 + $0xa0] sm:$0xff]  ;;  %v3907_v22 = vpop.eup %3906  ;;  %v2468_v19 = vmul.f32 %v5337_v21, %v2276_v31 }
 0x4c6   : > { %v2226_v30 = vadd.f32 %v2190_v26, %v2098_v45  ;;  %2947 = vperm.xlu0 %3679, %v3905_v8   ;;  %2942 = vperm.xlu1 %3678, %v3903_v51   ;;  %3916 = vrcp.f32 %v2798_v41  ;;  %2254 = vst.msk [vmem:[#allocation4 + $0xc0] sm:$0xff] %vm681_vm2, %v2221_v29  ;;  %v3510_v47 = vpop.f32.mrb[56].mxu1 }
 0x4c7   : > { %2722 = vst.msk [vmem:[#allocation5 + $0x58] sm:$0xff] %vm438_vm0, %v2690_v53  ;;  %v3511_v24 = vpop.f32.mrb[57].mxu1  ;;  %v2181_v23 = vpop.xlane.xlu1 %2180  ;;  %3918 = vrcp.f32 %v2799_v56  ;;  %v2803_v15 = vld [vmem:[#allocation4 + $0xc8] sm:$0xff] }
 0x4c8   : > { %2259 = vst.msk [vmem:[#allocation4 + $0xe8] sm:$0xff] %vm681_vm2, %v2226_v30  ;;  %v3512_v1 = vadd.f32 %v3511_v24, %v3510_v47  ;;  %v3513_v32 = vpop.f32.mrb[58].mxu1  ;;  %v2223_v35 = vadd.f32 %v2181_v23, %v2095_v28  ;;  %v2279_v56 = vld [vmem:[#allocation5 + $0x88] sm:$0xff]  ;;  %v2470_v28 = vmul.f32 %v5341_v59, %v2278_v37  ;;  %v2286_v37 = vld [vmem:[#allocation5 + $0xc0] sm:$0xff] }
 0x4c9   : > { %v3909_v27 = vpop.eup %3908  ;;  %v2196_v11 = vpop.xlane.xlu0 %2195  ;;  %v2800_v55 = vld [vmem:[#allocation4 + $0xb0] sm:$0xff]  ;;  %v2471_v23 = vmul.f32 %v5351_v33, %v2279_v56 }
 0x4ca   : > { %v3514_v54 = vpop.f32.mrb[59].mxu1  ;;  %v2228_v63 = vadd.f32 %v2196_v11, %v2100_v3  ;;  %2957 = vperm.xlu0 %3679, %v3909_v27   ;;  %2952 = vperm.xlu1 %3678, %v3907_v22   ;;  %3920 = vrcp.f32 %v2800_v55  ;;  %v2691_v39 = vadd.f32 %v3512_v1, %v2466_v42  ;;  %2256 = vst.msk [vmem:[#allocation4 + $0xd0] sm:$0xff] %vm681_vm2, %v2223_v35  ;;  %v3911_v16 = vpop.eup %3910  ;;  %v2280_v11 = vld [vmem:[#allocation5 + $0x90] sm:$0xff] }
 0x4cb   : > { %v3515_v20 = vadd.f32 %v3514_v54, %v3513_v32  ;;  %v2187_v10 = vpop.xlane.xlu1 %2186  ;;  %3922 = vrcp.f32 %v2801_v38  ;;  %v2805_v8 = vld [vmem:[#allocation4 + $0xd8] sm:$0xff]  ;;  %v2472_v13 = vmul.f32 %v5345_v62, %v2280_v11 }
 0x4cc   : > { %2261 = vst.msk [vmem:[#allocation4 + $0xf8] sm:$0xff] %vm681_vm2, %v2228_v63  ;;  %v3913_v4 = vpop.eup %3912  ;;  %v2225_v50 = vadd.f32 %v2187_v10, %v2097_v0  ;;  %v2281_v54 = vld [vmem:[#allocation5 + $0x98] sm:$0xff] }
 0x4cd   : > { %2723 = vst.msk [vmem:[#allocation5 + $0x60] sm:$0xff] %vm438_vm0, %v2691_v39  ;;  %v2692_v40 = vadd.f32 %v3515_v20, %v2467_v18  ;;  %v2802_v60 = vld [vmem:[#allocation4 + $0xc0] sm:$0xff]  ;;  %v3915_v25 = vpop.eup %3914  ;;  %v2473_v39 = vmul.f32 %v5355_v14, %v2281_v54  ;;  %v5909_v54 = vld [vmem:[#allocation66_spill] sm:$0xff] }
 0x4ce   : > { %2967 = vperm.xlu0 %3679, %v3913_v4   ;;  %2962 = vperm.xlu1 %3678, %v3911_v16   ;;  %3924 = vrcp.f32 %v2802_v60  ;;  %2258 = vst.msk [vmem:[#allocation4 + $0xe0] sm:$0xff] %vm681_vm2, %v2225_v50  ;;  %v3516_v36 = vpop.f32.mrb[60].mxu1  ;;  %v2283_v50 = vld [vmem:[#allocation5 + $0xa8] sm:$0xff] }
 0x4cf   : > { %2724 = vst.msk [vmem:[#allocation5 + $0x68] sm:$0xff] %vm438_vm0, %v2692_v40  ;;  %v3517_v57 = vpop.f32.mrb[61].mxu1  ;;  %v2193_v7 = vpop.xlane.xlu1 %2192  ;;  %3926 = vrcp.f32 %v2803_v15  ;;  %v2807_v41 = vld [vmem:[#allocation4 + $0xe8] sm:$0xff]  ;;  %v2282_v40 = vld [vmem:[#allocation5 + $0xa0] sm:$0xff] }
 0x4d0   : > { %v3917_v46 = vpop.eup %3916  ;;  %v3518_v43 = vadd.f32 %v3517_v57, %v3516_v36  ;;  %v3519_v51 = vpop.f32.mrb[62].mxu1  ;;  %v2227_v44 = vadd.f32 %v2193_v7, %v2099_v34  ;;  %v2474_v15 = vmul.f32 %v5349_v5, %v2282_v40 }
 0x4d1   : > { %v2804_v17 = vld [vmem:[#allocation4 + $0xd0] sm:$0xff]  ;;  %v3520_v45 = vpop.f32.mrb[63].mxu1  ;;  %v3919_v29 = vpop.eup %3918 }
 0x4d2   : > { %2977 = vperm.xlu0 %3679, %v3917_v46   ;;  %2972 = vperm.xlu1 %3678, %v3915_v25   ;;  %3928 = vrcp.f32 %v2804_v17  ;;  %v2693_v58 = vadd.f32 %v3518_v43, %v2468_v19  ;;  %2260 = vst.msk [vmem:[#allocation4 + $0xf0] sm:$0xff] %vm681_vm2, %v2227_v44  ;;  %v3521_v53 = vadd.f32 %v3520_v45, %v3519_v51  ;;  %v5903_v25 = vld [vmem:[#allocation63_spill] sm:$0xff]  ;;  %v2284_v19 = vld [vmem:[#allocation5 + $0xb0] sm:$0xff]  ;;  %v2285_v51 = vld [vmem:[#allocation5 + $0xb8] sm:$0xff] }
 0x4d3   : > { %3930 = vrcp.f32 %v2805_v8  ;;  %v2809_v1 = vld [vmem:[#allocation4 + $0xf8] sm:$0xff]  ;;  %v2475_v12 = vmul.f32 %v5903_v25, %v2283_v50  ;;  %v5904_v17 = vld [vmem:[#allocation9_spill] sm:$0xff] }
 0x4d4   : > { %v3921_v26 = vpop.eup %3920  ;;  %2725 = vst.msk [vmem:[#allocation5 + $0x70] sm:$0xff] %vm438_vm0, %v2693_v58  ;;  %v2694_v21 = vadd.f32 %v3521_v53, %v2469_v49  ;;  %v2476_v45 = vmul.f32 %v5904_v17, %v2284_v19  ;;  %v5905_v58 = vld [vmem:[#allocation11_spill] sm:$0xff]  ;;  %v2293_v25 = vld [vmem:[#allocation5 + $0xf8] sm:$0xff] }
 0x4d5   : > { %v2806_v52 = vld [vmem:[#allocation4 + $0xe0] sm:$0xff]  ;;  %v3923_v30 = vpop.eup %3922  ;;  %v2477_v53 = vmul.f32 %v5905_v58, %v2285_v51 }
 0x4d6   : > { %2987 = vperm.xlu0 %3679, %v3921_v26   ;;  %2982 = vperm.xlu1 %3678, %v3919_v29   ;;  %3932 = vrcp.f32 %v2806_v52  ;;  %2726 = vst.msk [vmem:[#allocation5 + $0x78] sm:$0xff] %vm438_vm0, %v2694_v21  ;;  %v3522_v6 = vpop.f32.mrb[64].mxu1 }
 0x4d7   : > { %v3523_v47 = vpop.f32.mrb[65].mxu1  ;;  %3934 = vrcp.f32 %v2807_v41  ;;  %v2287_v41 = vld [vmem:[#allocation5 + $0xc8] sm:$0xff] }
 0x4d8   : > { %v3925_v48 = vpop.eup %3924  ;;  %v3524_v2 = vadd.f32 %v3523_v47, %v3522_v6  ;;  %v3525_v22 = vpop.f32.mrb[66].mxu1 }
 0x4d9   : > { %v2808_v61 = vld [vmem:[#allocation4 + $0xf0] sm:$0xff]  ;;  %v3526_v24 = vpop.f32.mrb[67].mxu1  ;;  %v3927_v42 = vpop.eup %3926 }
 0x4da   : > { %2997 = vperm.xlu0 %3679, %v3925_v48   ;;  %2992 = vperm.xlu1 %3678, %v3923_v30   ;;  %3936 = vrcp.f32 %v2808_v61  ;;  %v2695_v3 = vadd.f32 %v3524_v2, %v2470_v28  ;;  %v3527_v27 = vadd.f32 %v3526_v24, %v3525_v22  ;;  %v5906_v30 = vld [vmem:[#allocation10_spill] sm:$0xff]  ;;  %v5907_v2 = vld [vmem:[#allocation65_spill] sm:$0xff] }
 0x4db   : > { %3938 = vrcp.f32 %v2809_v1  ;;  %v2478_v56 = vmul.f32 %v5906_v30, %v2286_v37  ;;  %v2479_v22 = vmul.f32 %v5907_v2, %v2287_v41  ;;  %v3102_v41 = vld [vmem:[%s4066_s20 + $0x10] sm:$0xff] }
 0x4dc   : > { %v3929_v32 = vpop.eup %3928  ;;  %2727 = vst.msk [vmem:[#allocation5 + $0x80] sm:$0xff] %vm438_vm0, %v2695_v3  ;;  %v2696_v35 = vadd.f32 %v3527_v27, %v2471_v23  ;;  %v2288_v3 = vld [vmem:[#allocation5 + $0xd0] sm:$0xff] }
 0x4dd   : > { %v3931_v55 = vpop.eup %3930 }
 0x4de   : > { %3007 = vperm.xlu0 %3679, %v3929_v32   ;;  %3002 = vperm.xlu1 %3678, %v3927_v42   ;;  %2728 = vst.msk [vmem:[#allocation5 + $0x88] sm:$0xff] %vm438_vm0, %v2696_v35  ;;  %v3528_v59 = vpop.f32.mrb[68].mxu1  ;;  %v2289_v42 = vld [vmem:[#allocation5 + $0xd8] sm:$0xff]  ;;  %v5908_v32 = vld [vmem:[#allocation64_spill] sm:$0xff] }
 0x4df   : > { %v3529_v63 = vpop.f32.mrb[69].mxu1  ;;  %v2480_v35 = vmul.f32 %v5908_v32, %v2288_v3  ;;  %v3104_v32 = vld [vmem:[%s4066_s20 + $0x20] sm:$0xff] }
 0x4e0   : > { %v3933_v33 = vpop.eup %3932  ;;  %v3530_v0 = vadd.f32 %v3529_v63, %v3528_v59  ;;  %v3531_v18 = vpop.f32.mrb[70].mxu1  ;;  %v2481_v63 = vmul.f32 %v5909_v54, %v2289_v42  ;;  %v2849_v54 = vld [vmem:[#allocation5 + $0x30] sm:$0xff] }
 0x4e1   : > { %v3532_v38 = vpop.f32.mrb[71].mxu1  ;;  %v3935_v10 = vpop.eup %3934 }
 0x4e2   : > { %3017 = vperm.xlu0 %3679, %v3933_v33   ;;  %3012 = vperm.xlu1 %3678, %v3931_v55   ;;  %v2697_v20 = vadd.f32 %v3530_v0, %v2472_v13  ;;  %v3533_v16 = vadd.f32 %v3532_v38, %v3531_v18  ;;  %v2290_v18 = vld [vmem:[#allocation5 + $0xe0] sm:$0xff] }
 0x4e4   : > { %v3937_v9 = vpop.eup %3936  ;;  %2729 = vst.msk [vmem:[#allocation5 + $0x90] sm:$0xff] %vm438_vm0, %v2697_v20  ;;  %v2698_v4 = vadd.f32 %v3533_v16, %v2473_v39  ;;  %v2291_v39 = vld [vmem:[#allocation5 + $0xe8] sm:$0xff] }
 0x4e5   : > { %v3939_v60 = vpop.eup %3938  ;;  %v5910_v16 = vld [vmem:[#allocation12_spill] sm:$0xff] }
 0x4e6   : > { %3027 = vperm.xlu0 %3679, %v3937_v9   ;;  %3022 = vperm.xlu1 %3678, %v3935_v10   ;;  %2730 = vst.msk [vmem:[#allocation5 + $0x98] sm:$0xff] %vm438_vm0, %v2698_v4  ;;  %v3534_v62 = vpop.f32.mrb[72].mxu1  ;;  %v2482_v10 = vmul.f32 %v5910_v16, %v2290_v18 }
 0x4e7   : > { %v3535_v31 = vpop.f32.mrb[73].mxu1 }
 0x4e8   : > { %v3536_v36 = vadd.f32 %v3535_v31, %v3534_v62  ;;  %v3537_v14 = vpop.f32.mrb[74].mxu1  ;;  %v5911_v62 = vld [vmem:[#allocation72_spill] sm:$0xff] }
 0x4e9   : > { %v3538_v34 = vpop.f32.mrb[75].mxu1  ;;  %v2483_v50 = vmul.f32 %v5911_v62, %v2291_v39  ;;  %v3106_v39 = vld [vmem:[%s4066_s20 + $0x30] sm:$0xff] }
 0x4ea   : > { %3032 = vperm.xlu1 %3678, %v3939_v60   ;;  %v2699_v57 = vadd.f32 %v3536_v36, %v2474_v15  ;;  %v3539_v7 = vadd.f32 %v3538_v34, %v3537_v14  ;;  %v2292_v36 = vld [vmem:[#allocation5 + $0xf0] sm:$0xff]  ;;  %v2447_v14 = vpop.permute.xlu0 %2446 }
 0x4ec   : > { %2731 = vst.msk [vmem:[#allocation5 + $0xa0] sm:$0xff] %vm438_vm0, %v2699_v57  ;;  %v2700_v46 = vadd.f32 %v3539_v7, %v2475_v12  ;;  %v2452_v12 = vpop.permute.xlu1 %2451  ;;  %v2484_v7 = vmul.f32 %v2447_v14, %v2292_v36  ;;  %v3108_v36 = vld [vmem:[%s4066_s20 + $0x40] sm:$0xff] }
 0x4ed   : > { %v2485_v51 = vmul.f32 %v2452_v12, %v2293_v25  ;;  %v2852_v25 = vld [vmem:[#allocation5 + $0x48] sm:$0xff] }
 0x4ee   : > { %2732 = vst.msk [vmem:[#allocation5 + $0xa8] sm:$0xff] %vm438_vm0, %v2700_v46  ;;  %v3540_v43 = vpop.f32.mrb[76].mxu1 }
 0x4ef   : > { %v3541_v44 = vpop.f32.mrb[77].mxu1 }
 0x4f0   : > { %v3542_v5 = vadd.f32 %v3541_v44, %v3540_v43  ;;  %v3543_v49 = vpop.f32.mrb[78].mxu1 }
 0x4f1   : > { %v3544_v8 = vpop.f32.mrb[79].mxu1 }
 0x4f2   : > { %v2701_v29 = vadd.f32 %v3542_v5, %v2476_v45  ;;  %v3545_v26 = vadd.f32 %v3544_v8, %v3543_v49  ;;  %v2843_v5 = vld [vmem:[#allocation5] sm:$0xff]  ;;  %v5499_v49 = vstv %s2842_s26 }
 0x4f4   : > { %2733 = vst.msk [vmem:[#allocation5 + $0xb0] sm:$0xff] %vm438_vm0, %v2701_v29  ;;  %v2702_v21 = vadd.f32 %v3545_v26, %v2477_v53  ;;  %v3100_v53 = vld [vmem:[%s4066_s20] sm:$0xff]  ;;  %v2845_v26 = vld [vmem:[#allocation5 + $0x10] sm:$0xff] }
 0x4f6   : > { %2734 = vst.msk [vmem:[#allocation5 + $0xb8] sm:$0xff] %vm438_vm0, %v2702_v21  ;;  %v3546_v52 = vpop.f32.mrb[80].mxu1 }
 0x4f7   : > { %v3547_v6 = vpop.f32.mrb[81].mxu1 }
 0x4f8   : > { %v3548_v47 = vadd.f32 %v3547_v6, %v3546_v52  ;;  %v3549_v48 = vpop.f32.mrb[82].mxu1 }
 0x4f9   : > { %v3550_v28 = vpop.f32.mrb[83].mxu1 }
 0x4fa   : > { %v2703_v61 = vadd.f32 %v3548_v47, %v2478_v56  ;;  %v3551_v24 = vadd.f32 %v3550_v28, %v3549_v48  ;;  %v2844_v47 = vld [vmem:[#allocation5 + $0x8] sm:$0xff] }
 0x4fb   : > { %v3101_v28 = vld [vmem:[%s4066_s20 + $0x8] sm:$0xff] }
 0x4fc   : > { %2735 = vst.msk [vmem:[#allocation5 + $0xc0] sm:$0xff] %vm438_vm0, %v2703_v61  ;;  %v2704_v23 = vadd.f32 %v3551_v24, %v2479_v22  ;;  %v2846_v22 = vld [vmem:[#allocation5 + $0x18] sm:$0xff]  ;;  %v2847_v24 = vld [vmem:[#allocation5 + $0x20] sm:$0xff] }
 0x4fe   : > { %2736 = vst.msk [vmem:[#allocation5 + $0xc8] sm:$0xff] %vm438_vm0, %v2704_v23  ;;  %v3552_v27 = vpop.f32.mrb[84].mxu1 }
 0x4ff   : > { %v3553_v1 = vpop.f32.mrb[85].mxu1 }
 0x500   : > { %v3554_v11 = vadd.f32 %v3553_v1, %v3552_v27  ;;  %v3555_v59 = vpop.f32.mrb[86].mxu1  ;;  %v3103_v1 = vld [vmem:[%s4066_s20 + $0x18] sm:$0xff] }
 0x501   : > { %v3556_v55 = vpop.f32.mrb[87].mxu1 }
 0x502   : > { %v2705_v33 = vadd.f32 %v3554_v11, %v2480_v35  ;;  %v3557_v13 = vadd.f32 %v3556_v55, %v3555_v59  ;;  %v2848_v59 = vld [vmem:[#allocation5 + $0x28] sm:$0xff] }
 0x504   : > { %2737 = vst.msk [vmem:[#allocation5 + $0xd0] sm:$0xff] %vm438_vm0, %v2705_v33  ;;  %v2706_v0 = vadd.f32 %v3557_v13, %v2481_v63 }
 0x506   : > { %2738 = vst.msk [vmem:[#allocation5 + $0xd8] sm:$0xff] %vm438_vm0, %v2706_v0  ;;  %v3558_v38 = vpop.f32.mrb[88].mxu1 }
 0x507   : > { %v3559_v20 = vpop.f32.mrb[89].mxu1 }
 0x508   : > { %v3560_v9 = vadd.f32 %v3559_v20, %v3558_v38  ;;  %v3561_v4 = vpop.f32.mrb[90].mxu1  ;;  %v3105_v38 = vld [vmem:[%s4066_s20 + $0x28] sm:$0xff] }
 0x509   : > { %v3562_v40 = vpop.f32.mrb[91].mxu1 }
 0x50a   : > { %v2707_v31 = vadd.f32 %v3560_v9, %v2482_v10  ;;  %v3563_v60 = vadd.f32 %v3562_v40, %v3561_v4  ;;  %v2850_v10 = vld [vmem:[#allocation5 + $0x38] sm:$0xff]  ;;  %v2851_v4 = vld [vmem:[#allocation5 + $0x40] sm:$0xff] }
 0x50c   : > { %2739 = vst.msk [vmem:[#allocation5 + $0xe0] sm:$0xff] %vm438_vm0, %v2707_v31  ;;  %v2708_v15 = vadd.f32 %v3563_v60, %v2483_v50 }
 0x50e   : > { %2740 = vst.msk [vmem:[#allocation5 + $0xe8] sm:$0xff] %vm438_vm0, %v2708_v15  ;;  %v3564_v34 = vpop.f32.mrb[92].mxu1  ;;  %v3107_v15 = vld [vmem:[%s4066_s20 + $0x38] sm:$0xff] }
 0x50f   : > { %v3565_v57 = vpop.f32.mrb[93].mxu1 }
 0x510   : > { %v3566_v46 = vadd.f32 %v3565_v57, %v3564_v34  ;;  %v3567_v19 = vpop.f32.mrb[94].mxu1  ;;  %v2853_v57 = vld [vmem:[#allocation5 + $0x50] sm:$0xff] }
 0x511   : > { %v3568_v43 = vpop.f32.mrb[95].mxu1 }
 0x512   : > { %v2709_v44 = vadd.f32 %v3566_v46, %v2484_v7  ;;  %v3569_v17 = vadd.f32 %v3568_v43, %v3567_v19 }
 0x514   : > { %2741 = vst.msk [vmem:[#allocation5 + $0xf0] sm:$0xff] %vm438_vm0, %v2709_v44  ;;  %v2710_v45 = vadd.f32 %v3569_v17, %v2485_v51  ;;  %v3109_v44 = vld [vmem:[%s4066_s20 + $0x48] sm:$0xff]  ;;  %v3110_v17 = vld [vmem:[%s4066_s20 + $0x50] sm:$0xff] }
 0x516   : > { %2742 = vst.msk [vmem:[#allocation5 + $0xf8] sm:$0xff] %vm438_vm0, %v2710_v45 }
 0x51d   : > { %v2878_v8 = vpop.permute.xlu0 %2877 }
 0x51e   : > { %v3035_v58 = vmul.f32 %v2878_v8, %v2843_v5  ;;  %v2854_v8 = vld [vmem:[#allocation5 + $0x58] sm:$0xff] }
 0x520   : > { %v3068_v29 = vmul.f32 %v5499_v49, %v3035_v58 }
 0x521   : > { %v2888_v21 = vpop.permute.xlu0 %2887 }
 0x522   : > { %v3132_v37 = vadd.f32 %v3100_v53, %v3068_v29  ;;  %v3037_v52 = vmul.f32 %v2888_v21, %v2845_v26  ;;  %v2855_v53 = vld [vmem:[#allocation5 + $0x60] sm:$0xff] }
 0x524   : > { %3164 = vst.msk [vmem:[%s5507_s8] sm:$0xff] %vm438_vm0, %v3132_v37  ;;  %v3070_v6 = vmul.f32 %v5499_v49, %v3037_v52 }
 0x526   : > { %v3134_v30 = vadd.f32 %v3102_v41, %v3070_v6  ;;  %v3111_v41 = vld [vmem:[%s4066_s20 + $0x58] sm:$0xff]  ;;  %v3112_v6 = vld [vmem:[%s4066_s20 + $0x60] sm:$0xff] }
 0x528   : > { %3166 = vst.msk [vmem:[%s5507_s8 + $0x10] sm:$0xff] %vm438_vm0, %v3134_v30 }
 0x52d   : > { %v2883_v56 = vpop.permute.xlu1 %2882 }
 0x52e   : > { %v3036_v48 = vmul.f32 %v2883_v56, %v2844_v47  ;;  %v2856_v47 = vld [vmem:[#allocation5 + $0x68] sm:$0xff] }
 0x530   : > { %v3069_v2 = vmul.f32 %v5499_v49, %v3036_v48  ;;  %v2898_v23 = vpop.permute.xlu0 %2897 }
 0x531   : > { %v2893_v61 = vpop.permute.xlu1 %2892  ;;  %v3039_v42 = vmul.f32 %v2898_v23, %v2847_v24 }
 0x532   : > { %v3133_v3 = vadd.f32 %v3101_v28, %v3069_v2  ;;  %v3038_v27 = vmul.f32 %v2893_v61, %v2846_v22  ;;  %v2857_v28 = vld [vmem:[#allocation5 + $0x70] sm:$0xff] }
 0x533   : > { %v3072_v11 = vmul.f32 %v5499_v49, %v3039_v42 }
 0x534   : > { %3165 = vst.msk [vmem:[%s5507_s8 + $0x8] sm:$0xff] %vm438_vm0, %v3133_v3  ;;  %v3071_v35 = vmul.f32 %v5499_v49, %v3038_v27  ;;  %v2908_v63 = vpop.permute.xlu0 %2907  ;;  %v3113_v3 = vld [vmem:[%s4066_s20 + $0x68] sm:$0xff]  ;;  %v3114_v27 = vld [vmem:[%s4066_s20 + $0x70] sm:$0xff] }
 0x535   : > { %v2903_v55 = vpop.permute.xlu1 %2902  ;;  %v3136_v13 = vadd.f32 %v3104_v32, %v3072_v11  ;;  %v3041_v18 = vmul.f32 %v2908_v63, %v2849_v54  ;;  %v2858_v32 = vld [vmem:[#allocation5 + $0x78] sm:$0xff]  ;;  %v2859_v11 = vld [vmem:[#allocation5 + $0x80] sm:$0xff] }
 0x536   : > { %v3135_v33 = vadd.f32 %v3103_v1, %v3071_v35  ;;  %v3040_v0 = vmul.f32 %v2903_v55, %v2848_v59 }
 0x537   : > { %3168 = vst.msk [vmem:[%s5507_s8 + $0x20] sm:$0xff] %vm438_vm0, %v3136_v13  ;;  %v3074_v16 = vmul.f32 %v5499_v49, %v3041_v18  ;;  %v3115_v13 = vld [vmem:[%s4066_s20 + $0x78] sm:$0xff] }
 0x538   : > { %3167 = vst.msk [vmem:[%s5507_s8 + $0x18] sm:$0xff] %vm438_vm0, %v3135_v33  ;;  %v3073_v20 = vmul.f32 %v5499_v49, %v3040_v0  ;;  %v3116_v0 = vld [vmem:[%s4066_s20 + $0x80] sm:$0xff] }
 0x539   : > { %v2913_v9 = vpop.permute.xlu1 %2912  ;;  %v2918_v40 = vpop.permute.xlu0 %2917  ;;  %v3138_v50 = vadd.f32 %v3106_v39, %v3074_v16  ;;  %v2860_v39 = vld [vmem:[#allocation5 + $0x88] sm:$0xff]  ;;  %v2861_v16 = vld [vmem:[#allocation5 + $0x90] sm:$0xff] }
 0x53a   : > { %v3137_v62 = vadd.f32 %v3105_v38, %v3073_v20  ;;  %v3042_v31 = vmul.f32 %v2913_v9, %v2850_v10  ;;  %v3043_v60 = vmul.f32 %v2918_v40, %v2851_v4 }
 0x53b   : > { %3170 = vst.msk [vmem:[%s5507_s8 + $0x30] sm:$0xff] %vm438_vm0, %v3138_v50  ;;  %v3117_v50 = vld [vmem:[%s4066_s20 + $0x88] sm:$0xff] }
 0x53c   : > { %3169 = vst.msk [vmem:[%s5507_s8 + $0x28] sm:$0xff] %vm438_vm0, %v3137_v62  ;;  %v3075_v14 = vmul.f32 %v5499_v49, %v3042_v31  ;;  %v3076_v34 = vmul.f32 %v5499_v49, %v3043_v60  ;;  %v3118_v31 = vld [vmem:[%s4066_s20 + $0x90] sm:$0xff] }
 0x53d   : > { %v2923_v12 = vpop.permute.xlu1 %2922  ;;  %v2928_v7 = vpop.permute.xlu0 %2927 }
 0x53e   : > { %v3139_v46 = vadd.f32 %v3107_v15, %v3075_v14  ;;  %v3140_v19 = vadd.f32 %v3108_v36, %v3076_v34  ;;  %v3044_v43 = vmul.f32 %v2923_v12, %v2852_v25  ;;  %v3045_v51 = vmul.f32 %v2928_v7, %v2853_v57  ;;  %v2862_v36 = vld [vmem:[#allocation5 + $0x98] sm:$0xff]  ;;  %v2863_v34 = vld [vmem:[#allocation5 + $0xa0] sm:$0xff] }
 0x540   : > { %3171 = vst.msk [vmem:[%s5507_s8 + $0x38] sm:$0xff] %vm438_vm0, %v3139_v46  ;;  %3172 = vst.msk [vmem:[%s5507_s8 + $0x40] sm:$0xff] %vm438_vm0, %v3140_v19  ;;  %v3077_v45 = vmul.f32 %v5499_v49, %v3044_v43  ;;  %v3078_v5 = vmul.f32 %v5499_v49, %v3045_v51  ;;  %v3119_v19 = vld [vmem:[%s4066_s20 + $0x98] sm:$0xff]  ;;  %v3120_v43 = vld [vmem:[%s4066_s20 + $0xa0] sm:$0xff] }
 0x541   : > { %v2933_v58 = vpop.permute.xlu1 %2932  ;;  %v2938_v29 = vpop.permute.xlu0 %2937 }
 0x542   : > { %v3141_v26 = vadd.f32 %v3109_v44, %v3077_v45  ;;  %v3142_v21 = vadd.f32 %v3110_v17, %v3078_v5  ;;  %v3046_v37 = vmul.f32 %v2933_v58, %v2854_v8  ;;  %v3047_v52 = vmul.f32 %v2938_v29, %v2855_v53  ;;  %v2864_v17 = vld [vmem:[#allocation5 + $0xa8] sm:$0xff]  ;;  %v2865_v5 = vld [vmem:[#allocation5 + $0xb0] sm:$0xff] }
 0x544   : > { %3173 = vst.msk [vmem:[%s5507_s8 + $0x48] sm:$0xff] %vm438_vm0, %v3141_v26  ;;  %3174 = vst.msk [vmem:[%s5507_s8 + $0x50] sm:$0xff] %vm438_vm0, %v3142_v21  ;;  %v3079_v30 = vmul.f32 %v5499_v49, %v3046_v37  ;;  %v3080_v56 = vmul.f32 %v5499_v49, %v3047_v52  ;;  %v3121_v21 = vld [vmem:[%s4066_s20 + $0xa8] sm:$0xff]  ;;  %v3122_v37 = vld [vmem:[%s4066_s20 + $0xb0] sm:$0xff] }
 0x545   : > { %v2943_v48 = vpop.permute.xlu1 %2942  ;;  %v2948_v2 = vpop.permute.xlu0 %2947 }
 0x546   : > { %v3143_v22 = vadd.f32 %v3111_v41, %v3079_v30  ;;  %v3144_v61 = vadd.f32 %v3112_v6, %v3080_v56  ;;  %v3048_v24 = vmul.f32 %v2943_v48, %v2856_v47  ;;  %v3049_v23 = vmul.f32 %v2948_v2, %v2857_v28  ;;  %v2866_v6 = vld [vmem:[#allocation5 + $0xb8] sm:$0xff]  ;;  %v2867_v56 = vld [vmem:[#allocation5 + $0xc0] sm:$0xff] }
 0x548   : > { %3175 = vst.msk [vmem:[%s5507_s8 + $0x58] sm:$0xff] %vm438_vm0, %v3143_v22  ;;  %3176 = vst.msk [vmem:[%s5507_s8 + $0x60] sm:$0xff] %vm438_vm0, %v3144_v61  ;;  %v3081_v42 = vmul.f32 %v5499_v49, %v3048_v24  ;;  %v3082_v1 = vmul.f32 %v5499_v49, %v3049_v23  ;;  %v3123_v61 = vld [vmem:[%s4066_s20 + $0xb8] sm:$0xff]  ;;  %v3124_v24 = vld [vmem:[%s4066_s20 + $0xc0] sm:$0xff] }
 0x549   : > { %v2953_v35 = vpop.permute.xlu1 %2952  ;;  %v2958_v59 = vpop.permute.xlu0 %2957 }
 0x54a   : > { %v3145_v55 = vadd.f32 %v3113_v3, %v3081_v42  ;;  %v3146_v54 = vadd.f32 %v3114_v27, %v3082_v1  ;;  %v3050_v63 = vmul.f32 %v2953_v35, %v2858_v32  ;;  %v3051_v33 = vmul.f32 %v2958_v59, %v2859_v11  ;;  %v2868_v27 = vld [vmem:[#allocation5 + $0xc8] sm:$0xff]  ;;  %v2869_v1 = vld [vmem:[#allocation5 + $0xd0] sm:$0xff] }
 0x54c   : > { %3177 = vst.msk [vmem:[%s5507_s8 + $0x68] sm:$0xff] %vm438_vm0, %v3145_v55  ;;  %3178 = vst.msk [vmem:[%s5507_s8 + $0x70] sm:$0xff] %vm438_vm0, %v3146_v54  ;;  %v3083_v18 = vmul.f32 %v5499_v49, %v3050_v63  ;;  %v3084_v38 = vmul.f32 %v5499_v49, %v3051_v33  ;;  %v3125_v54 = vld [vmem:[%s4066_s20 + $0xc8] sm:$0xff]  ;;  %v3126_v63 = vld [vmem:[%s4066_s20 + $0xd0] sm:$0xff] }
 0x54d   : > { %v2963_v20 = vpop.permute.xlu1 %2962  ;;  %v2968_v10 = vpop.permute.xlu0 %2967 }
 0x54e   : > { %v3147_v9 = vadd.f32 %v3115_v13, %v3083_v18  ;;  %v3148_v4 = vadd.f32 %v3116_v0, %v3084_v38  ;;  %v3052_v40 = vmul.f32 %v2963_v20, %v2860_v39  ;;  %v3053_v62 = vmul.f32 %v2968_v10, %v2861_v16  ;;  %v2870_v0 = vld [vmem:[#allocation5 + $0xd8] sm:$0xff]  ;;  %v2871_v38 = vld [vmem:[#allocation5 + $0xe0] sm:$0xff] }
 0x550   : > { %3179 = vst.msk [vmem:[%s5507_s8 + $0x78] sm:$0xff] %vm438_vm0, %v3147_v9  ;;  %3180 = vst.msk [vmem:[%s5507_s8 + $0x80] sm:$0xff] %vm438_vm0, %v3148_v4  ;;  %v3085_v60 = vmul.f32 %v5499_v49, %v3052_v40  ;;  %v3086_v15 = vmul.f32 %v5499_v49, %v3053_v62  ;;  %v3127_v4 = vld [vmem:[%s4066_s20 + $0xd8] sm:$0xff]  ;;  %v3128_v40 = vld [vmem:[%s4066_s20 + $0xe0] sm:$0xff] }
 0x551   : > { %v2973_v14 = vpop.permute.xlu1 %2972  ;;  %v2978_v25 = vpop.permute.xlu0 %2977 }
 0x552   : > { %v3149_v12 = vadd.f32 %v3117_v50, %v3085_v60  ;;  %v3150_v57 = vadd.f32 %v3118_v31, %v3086_v15  ;;  %v3054_v7 = vmul.f32 %v2973_v14, %v2862_v36  ;;  %v3055_v46 = vmul.f32 %v2978_v25, %v2863_v34  ;;  %v2872_v31 = vld [vmem:[#allocation5 + $0xe8] sm:$0xff]  ;;  %v2873_v15 = vld [vmem:[#allocation5 + $0xf0] sm:$0xff] }
 0x554   : > { %3181 = vst.msk [vmem:[%s5507_s8 + $0x88] sm:$0xff] %vm438_vm0, %v3149_v12  ;;  %3182 = vst.msk [vmem:[%s5507_s8 + $0x90] sm:$0xff] %vm438_vm0, %v3150_v57  ;;  %v3087_v51 = vmul.f32 %v5499_v49, %v3054_v7  ;;  %v3088_v44 = vmul.f32 %v5499_v49, %v3055_v46  ;;  %v3129_v57 = vld [vmem:[%s4066_s20 + $0xe8] sm:$0xff]  ;;  %v3130_v7 = vld [vmem:[%s4066_s20 + $0xf0] sm:$0xff] }
 0x555   : > { %v2983_v45 = vpop.permute.xlu1 %2982  ;;  %v2988_v8 = vpop.permute.xlu0 %2987 }
 0x556   : > { %v3151_v58 = vadd.f32 %v3119_v19, %v3087_v51  ;;  %v3152_v53 = vadd.f32 %v3120_v43, %v3088_v44  ;;  %v3056_v29 = vmul.f32 %v2983_v45, %v2864_v17  ;;  %v3057_v26 = vmul.f32 %v2988_v8, %v2865_v5  ;;  %v2874_v43 = vld [vmem:[#allocation5 + $0xf8] sm:$0xff] }
 0x557   : > { %v3131_v5 = vld [vmem:[%s4066_s20 + $0xf8] sm:$0xff] }
 0x558   : > { %3183 = vst.msk [vmem:[%s5507_s8 + $0x98] sm:$0xff] %vm438_vm0, %v3151_v58  ;;  %3184 = vst.msk [vmem:[%s5507_s8 + $0xa0] sm:$0xff] %vm438_vm0, %v3152_v53  ;;  %v3089_v52 = vmul.f32 %v5499_v49, %v3056_v29  ;;  %v3090_v41 = vmul.f32 %v5499_v49, %v3057_v26 }
 0x559   : > { %v2993_v30 = vpop.permute.xlu1 %2992  ;;  %v2998_v47 = vpop.permute.xlu0 %2997 }
 0x55a   : > { %v3153_v48 = vadd.f32 %v3121_v21, %v3089_v52  ;;  %v3154_v28 = vadd.f32 %v3122_v37, %v3090_v41  ;;  %v3058_v2 = vmul.f32 %v2993_v30, %v2866_v6  ;;  %v3059_v22 = vmul.f32 %v2998_v47, %v2867_v56 }
 0x55c   : > { %3185 = vst.msk [vmem:[%s5507_s8 + $0xa8] sm:$0xff] %vm438_vm0, %v3153_v48  ;;  %3186 = vst.msk [vmem:[%s5507_s8 + $0xb0] sm:$0xff] %vm438_vm0, %v3154_v28  ;;  %v3091_v23 = vmul.f32 %v5499_v49, %v3058_v2  ;;  %v3092_v3 = vmul.f32 %v5499_v49, %v3059_v22 }
 0x55d   : > { %v3003_v42 = vpop.permute.xlu1 %3002  ;;  %v3008_v32 = vpop.permute.xlu0 %3007 }
 0x55e   : > { %v3155_v35 = vadd.f32 %v3123_v61, %v3091_v23  ;;  %v3156_v11 = vadd.f32 %v3124_v24, %v3092_v3  ;;  %v3060_v59 = vmul.f32 %v3003_v42, %v2868_v27  ;;  %v3061_v55 = vmul.f32 %v3008_v32, %v2869_v1 }
 0x560   : > { %3187 = vst.msk [vmem:[%s5507_s8 + $0xb8] sm:$0xff] %vm438_vm0, %v3155_v35  ;;  %3188 = vst.msk [vmem:[%s5507_s8 + $0xc0] sm:$0xff] %vm438_vm0, %v3156_v11  ;;  %v3093_v33 = vmul.f32 %v5499_v49, %v3060_v59  ;;  %v3094_v13 = vmul.f32 %v5499_v49, %v3061_v55 }
 0x561   : > { %v3013_v18 = vpop.permute.xlu1 %3012  ;;  %v3018_v39 = vpop.permute.xlu0 %3017 }
 0x562   : > { %v3157_v20 = vadd.f32 %v3125_v54, %v3093_v33  ;;  %v3158_v16 = vadd.f32 %v3126_v63, %v3094_v13  ;;  %v3062_v10 = vmul.f32 %v3013_v18, %v2870_v0  ;;  %v3063_v9 = vmul.f32 %v3018_v39, %v2871_v38 }
 0x564   : > { %3189 = vst.msk [vmem:[%s5507_s8 + $0xc8] sm:$0xff] %vm438_vm0, %v3157_v20  ;;  %3190 = vst.msk [vmem:[%s5507_s8 + $0xd0] sm:$0xff] %vm438_vm0, %v3158_v16  ;;  %v3095_v62 = vmul.f32 %v5499_v49, %v3062_v10  ;;  %v3096_v50 = vmul.f32 %v5499_v49, %v3063_v9 }
 0x565   : > { %v3023_v60 = vpop.permute.xlu1 %3022  ;;  %v3028_v36 = vpop.permute.xlu0 %3027 }
 0x566   : > { %v3159_v14 = vadd.f32 %v3127_v4, %v3095_v62  ;;  %v3160_v34 = vadd.f32 %v3128_v40, %v3096_v50  ;;  %v3064_v25 = vmul.f32 %v3023_v60, %v2872_v31  ;;  %v3065_v12 = vmul.f32 %v3028_v36, %v2873_v15 }
 0x568   : > { %3191 = vst.msk [vmem:[%s5507_s8 + $0xd8] sm:$0xff] %vm438_vm0, %v3159_v14  ;;  %3192 = vst.msk [vmem:[%s5507_s8 + $0xe0] sm:$0xff] %vm438_vm0, %v3160_v34  ;;  %v3097_v46 = vmul.f32 %v5499_v49, %v3064_v25  ;;  %v3098_v19 = vmul.f32 %v5499_v49, %v3065_v12 }
 0x569   : > { %v3033_v51 = vpop.permute.xlu1 %3032 }
 0x56a   : > { %v3161_v44 = vadd.f32 %v3129_v57, %v3097_v46  ;;  %v3162_v17 = vadd.f32 %v3130_v7, %v3098_v19  ;;  %v3066_v45 = vmul.f32 %v3033_v51, %v2874_v43 }
 0x56c   : > { %3193 = vst.msk [vmem:[%s5507_s8 + $0xe8] sm:$0xff] %vm438_vm0, %v3161_v44  ;;  %3194 = vst.msk [vmem:[%s5507_s8 + $0xf0] sm:$0xff] %vm438_vm0, %v3162_v17  ;;  %v3099_v8 = vmul.f32 %v5499_v49, %v3066_v45 }
 0x56e   : > { %v3163_v58 = vadd.f32 %v3131_v5, %v3099_v8 }
 0x570   : > { %3195 = vst.msk [vmem:[%s5507_s8 + $0xf8] sm:$0xff] %vm438_vm0, %v3163_v58 }
 0x571 PF: > { %s18_s28 = sadd.s32 1, %s3962_s28   ;;  %s5912_s26 = smov %s3958_s27 }
 0x572   : > { %p15_p5 = scmp.ge.s32.totalorder %s18_s28, 4   ;;  %s5913_s27 = smov %s5915_s6 }
 0x574   :  { %17 = sbr.rel (!%p15_p5) target bundleno = 2 (0x2), region = 89 }

</bundles_post_ra>
